<compile_context>
chip_gen: v7x
topology: tpu7x:2x2x1
jax: 0.10.0
libtpu: 0.0.40
codegen_flags: <defaults>
</compile_context>

<pallas_src>
import functools

import jax
import jax.numpy as jnp
from jax import lax
from jax.experimental import pallas as pl
from jax.experimental.pallas import tpu as pltpu


# ------------------------------- fused kernel ----------------------------------

def _ssdecoder_kernel(x_ref, w123_ref, b123_ref, w4_ref, b4_ref, o_ref, *, C, H):
    """Fused SSDecoder forward for one batch-stacked block of images.

    x_ref    : (M, W*C)  bf16   lane-dense rows of nb images (M = nb*H)
    w123_ref : (3, 9, W*C, W*C) bf16  per-tap block-diag weights of the three
               C->C convs (BN scale + dx border masks folded in)
    b123_ref : (3, 1, W*C) f32  lane-tiled biases of those convs
    w4_ref   : (9, W*C, W*cp) bf16  per-tap weights of out_conv_ (class dim padded)
    b4_ref   : (1, W*cp) f32
    o_ref    : (M, W*cp) f32 output rows
    """
    M, WC = x_ref.shape

    # Hoisted per-image row masks: one iota, reused by all four convs.  They give
    # the vertical SAME padding and keep dy rolls from crossing image boundaries
    # inside the batch-stacked tile.
    row = lax.broadcasted_iota(jnp.int32, (M, 1), 0)
    loc = row % H                       # row index within its own image
    m_up = loc > 0                      # dy == -1 tap: source row h-1 exists
    m_dn = loc < (H - 1)                # dy == +1 tap: source row h+1 exists

    def conv(xin, w_of_tap, bias, post_relu):
        """xin: (M, W*C) f32, already pre-activated.  9 accumulating MXU dots on
        rolled taps (no im2col concat buffer).  Horizontal (dx) border masks are
        folded into the weights; only the dy row masks are applied here.  Taps
        are cast to bf16 right before the MXU (v5e has no bf16 VALU)."""
        acc = None
        for dy in (-1, 0, 1):
            t = xin if dy == 0 else pltpu.roll(xin, shift=(-dy) % M, axis=0)
            if dy == -1:
                t = jnp.where(m_up, t, 0.0)
            elif dy == 1:
                t = jnp.where(m_dn, t, 0.0)
            for dx in (-1, 0, 1):
                td = t if dx == 0 else pltpu.roll(t, shift=(-dx * C) % WC, axis=1)
                k = (dy + 1) * 3 + (dx + 1)
                d = jnp.dot(td.astype(jnp.bfloat16), w_of_tap(k),
                            preferred_element_type=jnp.float32)
                acc = d if acc is None else acc + d
        y = acc + bias                                   # f32 epilogue
        if post_relu:
            y = jnp.maximum(y, 0.0)
        return y

    x0 = x_ref[...].astype(jnp.float32)                  # (M, W*C)

    # RCU: x + conv3x3(relu(conv3x3(relu(x))))
    h = conv(jnp.maximum(x0, 0.0), lambda k: w123_ref[0, k], b123_ref[0], False)
    x1 = x0 + conv(jnp.maximum(h, 0.0), lambda k: w123_ref[1, k], b123_ref[1], False)
    # out_conv: 3x3 conv + folded BN + ReLU
    x2 = conv(x1, lambda k: w123_ref[2, k], b123_ref[2], True)
    # out_conv_: plain 3x3 conv into (padded) class lanes
    y = conv(x2, lambda k: w4_ref[k], b4_ref[...], False)

    o_ref[...] = y.astype(o_ref.dtype)


# --------------------------- wrapper-side packing ------------------------------

def _round_up(a, b):
    return -(-a // b) * b


def _padded_classes(num_class, W):
    """Pad the class dim so W * cp is a multiple of 128 lanes."""
    assert 128 % W == 0 or W % 128 == 0, (
        f"W={W}: lane-dense layout needs W | 128 or 128 | W "
        "(TODO(synk): W-tiling for other widths)")
    if W % 128 == 0:
        return num_class
    return _round_up(num_class, 128 // W)


def _per_tap_weights(w, scale, W_img, cout_pad):
    """w: (3,3,Cin,Cout) f32, scale: (Cout,) f32.

    Returns bf16 (9, W*Cin, W*cout_pad) per-tap block-diagonal matmul weights
    with the BN scale folded in AND the horizontal (dx) SAME-padding masks
    folded in (w==0 block zeroed for dx=-1 taps, w==W-1 block for dx=+1 taps),
    so the kernel only applies the row (dy) masks.
    """
    Cin, Cout = w.shape[2], w.shape[3]
    wf = (w.astype(jnp.float32) * scale.reshape(1, 1, 1, Cout)).reshape(9, Cin, Cout)
    if cout_pad > Cout:
        wf = jnp.pad(wf, ((0, 0), (0, 0), (0, cout_pad - Cout)))
    eye = jnp.eye(W_img, dtype=jnp.float32)
    big = jnp.einsum("wv,tio->twivo", eye, wf)            # (9, W, Cin, W, cp)

    # tap index t = (dy+1)*3 + (dx+1)
    mask = jnp.ones((9, W_img), jnp.float32)
    for dy in (-1, 0, 1):
        mask = mask.at[(dy + 1) * 3 + 0, 0].set(0.0)          # dx = -1: w==0 wraps
        mask = mask.at[(dy + 1) * 3 + 2, W_img - 1].set(0.0)  # dx = +1: w==W-1 wraps
    big = big * mask[:, :, None, None, None]

    return big.reshape(9, W_img * Cin, W_img * cout_pad).astype(jnp.bfloat16)


def _lane_bias(bias, W_img, cout_pad):
    Cout = bias.shape[0]
    b = bias.astype(jnp.float32)
    if cout_pad > Cout:
        b = jnp.pad(b, (0, cout_pad - Cout))
    return jnp.tile(b, (W_img,)).reshape(1, W_img * cout_pad)


def pack_params(params, W_img, cp):
    """One-time prep: fold BN scale + dx border masks into per-tap block-diag
    weights, lane-tile biases, stack the three C->C convs into single resident
    operands, cast MXU operands to bf16."""
    rcu, oc, oc_ = params["rcu"], params["out_conv"], params["out_conv_"]
    C = rcu["w1"].shape[2]
    w1 = _per_tap_weights(rcu["w1"], rcu["s1"], W_img, C)
    w2 = _per_tap_weights(rcu["w2"], rcu["s2"], W_img, C)
    w3 = _per_tap_weights(oc["w"], oc["s"], W_img, C)
    return {
        "w123": jnp.stack([w1, w2, w3], axis=0),               # (3, 9, W*C, W*C)
        "b123": jnp.stack([_lane_bias(rcu["b1"], W_img, C),
                           _lane_bias(rcu["b2"], W_img, C),
                           _lane_bias(oc["b"], W_img, C)], axis=0),  # (3, 1, W*C)
        "w4": _per_tap_weights(oc_["w"], oc_["s"], W_img, cp),  # (9, W*C, W*cp)
        "b4": _lane_bias(oc_["b"], W_img, cp),                   # (1, W*cp)
    }


# ------------------------------ fused forward ----------------------------------

def ssdecoder_forward(feat_nchw, packed, *, num_class, cp, num_grid_steps=1):
    N, C, H, W = feat_nchw.shape
    WC, WCP = W * C, W * cp
    assert WC % 128 == 0 and WCP % 128 == 0, (
        f"lane-dense layout needs W*C ({WC}) and W*cp ({WCP}) to be multiples of 128")
    assert H % 8 == 0, f"H={H} must be a multiple of 8 (sublane tiling)"
    assert N % num_grid_steps == 0, (N, num_grid_steps)
    nb = N // num_grid_steps
    m_blk = nb * H                       # batch-stacked rows per grid step

    # Boundary layout plumbing: NCHW -> NHWC -> batch-stacked lane-dense rows
    # (N*H, W*C); bf16 DMA/MXU operands.
    x2d = (jnp.transpose(feat_nchw, (0, 2, 3, 1))
           .reshape(N * H, WC).astype(jnp.bfloat16))

    def resident(arr):                   # weights/biases: same block every step
        nd = arr.ndim
        return pl.BlockSpec(arr.shape, lambda s, _nd=nd: (0,) * _nd)

    grid_spec = pltpu.PrefetchScalarGridSpec(
        num_scalar_prefetch=0,
        grid=(num_grid_steps,),
        in_specs=[
            pl.BlockSpec((m_blk, WC), lambda s: (s, 0)),   # nb images per step
            resident(packed["w123"]), resident(packed["b123"]),
            resident(packed["w4"]), resident(packed["b4"]),
        ],
        out_specs=pl.BlockSpec((m_blk, WCP), lambda s: (s, 0)),
    )

    out2d = pl.pallas_call(
        functools.partial(_ssdecoder_kernel, C=C, H=H),
        out_shape=jax.ShapeDtypeStruct((N * H, WCP), jnp.float32),
        grid_spec=grid_spec,
        compiler_params=pltpu.CompilerParams(
            dimension_semantics=("parallel",),   # v7x: 2 TCs split the grid steps
            vmem_limit_bytes=32 * 1024 * 1024,
        ),
    )(x2d, packed["w123"], packed["b123"], packed["w4"], packed["b4"])

    out = out2d.reshape(N, H, W, cp)[..., :num_class]   # drop class padding
    return jnp.transpose(out, (0, 3, 1, 2))             # back to NCHW


def _num_grid_steps(N):
    """v7x has 2 TensorCores per chip: keep 2 parallel grid steps to feed both.
    v5e/v6e have a single TC: collapse to one step (less per-step overhead)."""
    try:
        kind = jax.devices()[0].device_kind.lower()
    except Exception:
        kind = ""
    if "v7" in kind and N % 2 == 0 and N >= 2:
        return 2
    return 1


# ------------------------------ pure-JAX reference ------------------------------

def _conv3x3_ref(x, w, scale, bias, *, pre_relu=False, post_relu=False):
    xin = jnp.maximum(x, 0.0) if pre_relu else x
    # Same operand rounding as the kernel: bf16 operands, f32 accumulation.
    wf = (w.astype(jnp.float32) * scale.reshape(1, 1, 1, -1)).astype(jnp.bfloat16)
    y = lax.conv_general_dilated(
        xin.astype(jnp.bfloat16).astype(jnp.float32), wf.astype(jnp.float32),
        window_strides=(1, 1), padding="SAME",
        dimension_numbers=("NHWC", "HWIO", "NHWC"))
    y = y + bias.reshape(1, 1, 1, -1)
    if post_relu:
        y = jnp.maximum(y, 0.0)
    return y


def ssdecoder_ref(feat_nchw, params):
    x = jnp.transpose(feat_nchw, (0, 2, 3, 1))
    x = x.astype(jnp.bfloat16).astype(jnp.float32)
    p = params["rcu"]
    h = _conv3x3_ref(x, p["w1"], p["s1"], p["b1"], pre_relu=True)
    x = x + _conv3x3_ref(h, p["w2"], p["s2"], p["b2"], pre_relu=True)
    oc = params["out_conv"]
    x = _conv3x3_ref(x, oc["w"], oc["s"], oc["b"], post_relu=True)
    oc_ = params["out_conv_"]
    x = _conv3x3_ref(x, oc_["w"], oc_["s"], oc_["b"])
    return jnp.transpose(x, (0, 3, 1, 2))


# ------------------------------ parameter init ----------------------------------

def init_params(key, channels, num_class, eps=1e-5):
    ks = jax.random.split(key, 8)

    def conv_w(k, cin, cout):
        return 0.1 * jax.random.normal(k, (3, 3, cin, cout), jnp.float32)

    def bn_fold(k, c):
        k1, k2, k3, k4 = jax.random.split(k, 4)
        gamma = 1.0 + 0.1 * jax.random.normal(k1, (c,), jnp.float32)
        beta = 0.1 * jax.random.normal(k2, (c,), jnp.float32)
        mean = 0.1 * jax.random.normal(k3, (c,), jnp.float32)
        var = jnp.abs(jax.random.normal(k4, (c,), jnp.float32)) + 0.5
        scale = gamma / jnp.sqrt(var + eps)
        bias = beta - mean * scale
        return scale, bias

    ones = jnp.ones((channels,), jnp.float32)
    zeros = jnp.zeros((channels,), jnp.float32)
    oc_scale, oc_bias = bn_fold(ks[4], channels)

    return {
        "rcu": {
            "w1": conv_w(ks[0], channels, channels), "s1": ones, "b1": zeros,
            "w2": conv_w(ks[1], channels, channels), "s2": ones, "b2": zeros,
        },
        "out_conv": {"w": conv_w(ks[2], channels, channels), "s": oc_scale, "b": oc_bias},
        "out_conv_": {"w": conv_w(ks[3], channels, num_class),
                      "s": jnp.ones((num_class,), jnp.float32),
                      "b": jnp.zeros((num_class,), jnp.float32)},
    }


# ----------------------------------- main ----------------------------------------

if __name__ == "__main__":
    cfg = {"base_block": ["RCU"], "channels": 8, "num_class": 3, "is_dsc": False}

    key = jax.random.PRNGKey(0)
    k_x, k_p = jax.random.split(key)

    N, C, H, W = 2, cfg["channels"], 16, 16       # W*C = 128 -> fully lane-dense tiles
    feat = jax.random.normal(k_x, (N, C, H, W), jnp.float32)   # NCHW, like PyTorch

    params = init_params(k_p, cfg["channels"], cfg["num_class"])

    cp = _padded_classes(cfg["num_class"], W)     # 3 -> 8 so W*cp = 128 output lanes
    packed = pack_params(params, W, cp)           # one-time wrapper-side prep
    steps = _num_grid_steps(N)                    # 2 parallel steps on v7x, else 1

    fwd = jax.jit(functools.partial(ssdecoder_forward, num_class=cfg["num_class"],
                                    cp=cp, num_grid_steps=steps))
    out = jax.block_until_ready(fwd(feat, packed))
    ref = jax.block_until_ready(ssdecoder_ref(feat, params))

    assert out.shape == (N, cfg["num_class"], H, W), out.shape
    max_err = float(jnp.max(jnp.abs(out - ref)))
    # bf16 MXU operands + f32 accumulation in both kernel and reference; residual
    # bf16 re-rounding of intermediates bounds the mismatch well below 1e-2.
    assert jnp.allclose(out, ref, atol=1e-2, rtol=1e-2), max_err

    print("KERNEL_OK")
</pallas_src>

<mosaic_0001>
module attributes {stable_mosaic.version = 11 : i64} {
  func.func @_ssdecoder_kernel(%arg0: i32, %arg1: memref<32x128xbf16, #tpu.memory_space<vmem>>, %arg2: memref<3x9x128x128xbf16, #tpu.memory_space<vmem>>, %arg3: memref<3x1x128xf32, #tpu.memory_space<vmem>>, %arg4: memref<9x128x128xbf16, #tpu.memory_space<vmem>>, %arg5: memref<1x128xf32, #tpu.memory_space<vmem>>, %arg6: memref<32x128xf32, #tpu.memory_space<vmem>>) attributes {dimension_semantics = [#tpu.dimension_semantics<parallel>], iteration_bounds = array<i64: 1>, scalar_prefetch = 0 : i64, scratch_operands = 0 : i64, tpu.core_type = #tpu.core_type<tc>, window_params = [{transform_indices = @transform_0, window_bounds = array<i64: 32, 128>}, {pipeline_mode = #tpu.pipeline_mode<synchronous>, transform_indices = @transform_1, window_bounds = array<i64: 3, 9, 128, 128>}, {pipeline_mode = #tpu.pipeline_mode<synchronous>, transform_indices = @transform_2, window_bounds = array<i64: 3, 1, 128>}, {pipeline_mode = #tpu.pipeline_mode<synchronous>, transform_indices = @transform_3, window_bounds = array<i64: 9, 128, 128>}, {pipeline_mode = #tpu.pipeline_mode<synchronous>, transform_indices = @transform_4, window_bounds = array<i64: 1, 128>}, {transform_indices = @transform_5, window_bounds = array<i64: 32, 128>}]} {
    %0 = tpu.iota {dimensions = array<i32: 0>} : vector<32x1xi32>
    %c16_i32 = arith.constant 16 : i32
    %c0_i32 = arith.constant 0 : i32
    %1 = arith.cmpi eq, %c16_i32, %c0_i32 : i32
    %c1_i32 = arith.constant 1 : i32
    %2 = arith.select %1, %c1_i32, %c16_i32 : i32
    %3 = vector.broadcast %2 : i32 to vector<32x1xi32>
    %4 = arith.remsi %0, %3 : vector<32x1xi32>
    %c0_i32_0 = arith.constant 0 : i32
    %5 = vector.broadcast %c0_i32_0 : i32 to vector<32x1xi32>
    %6 = arith.cmpi ne, %4, %5 : vector<32x1xi32>
    %c0_i32_1 = arith.constant 0 : i32
    %7 = vector.broadcast %c0_i32_1 : i32 to vector<32x1xi32>
    %8 = arith.cmpi slt, %4, %7 : vector<32x1xi32>
    %c0_i32_2 = arith.constant 0 : i32
    %9 = arith.cmpi slt, %2, %c0_i32_2 : i32
    %10 = vector.broadcast %9 : i1 to vector<32x1xi1>
    %11 = vector.broadcast %10 : vector<32x1xi1> to vector<32x1xi1>
    %12 = arith.xori %8, %11 : vector<32x1xi1>
    %13 = arith.andi %12, %6 : vector<32x1xi1>
    %14 = vector.broadcast %2 : i32 to vector<32x1xi32>
    %15 = arith.addi %4, %14 : vector<32x1xi32>
    %16 = arith.select %13, %15, %4 : vector<32x1xi1>, vector<32x1xi32>
    %c0_i32_3 = arith.constant 0 : i32
    %17 = vector.broadcast %c0_i32_3 : i32 to vector<32x1xi32>
    %18 = arith.cmpi sgt, %16, %17 : vector<32x1xi32>
    %c15_i32 = arith.constant 15 : i32
    %19 = vector.broadcast %c15_i32 : i32 to vector<32x1xi32>
    %20 = arith.cmpi slt, %16, %19 : vector<32x1xi32>
    %c0 = arith.constant 0 : index
    %c0_4 = arith.constant 0 : index
    %21 = vector.load %arg1[%c0, %c0_4] : memref<32x128xbf16, #tpu.memory_space<vmem>>, vector<32x128xbf16>
    %22 = arith.extf %21 : vector<32x128xbf16> to vector<32x128xf32>
    %cst = arith.constant 0.000000e+00 : f32
    %23 = vector.broadcast %cst : f32 to vector<32x128xf32>
    %24 = arith.maximumf %22, %23 : vector<32x128xf32>
    %c0_5 = arith.constant 0 : index
    %c0_6 = arith.constant 0 : index
    %c0_7 = arith.constant 0 : index
    %25 = vector.load %arg3[%c0_5, %c0_6, %c0_7] : memref<3x1x128xf32, #tpu.memory_space<vmem>>, vector<1x1x128xf32>
    %26 = vector.shape_cast %25 : vector<1x1x128xf32> to vector<1x128xf32>
    %c1_i32_8 = arith.constant 1 : i32
    %27 = tpu.dynamic_rotate %24 by %c1_i32_8 dim 0 : vector<32x128xf32>, i32 -> vector<32x128xf32>
    %cst_9 = arith.constant 0.000000e+00 : f32
    %28 = vector.shape_cast %18 : vector<32x1xi1> to vector<32x1xi1>
    %29 = vector.broadcast %28 : vector<32x1xi1> to vector<32x128xi1>
    %30 = vector.broadcast %cst_9 : f32 to vector<32x128xf32>
    %31 = arith.select %29, %27, %30 : vector<32x128xi1>, vector<32x128xf32>
    %c8_i32 = arith.constant 8 : i32
    %32 = tpu.dynamic_rotate %31 by %c8_i32 dim 1 : vector<32x128xf32>, i32 -> vector<32x128xf32>
    %33 = arith.truncf %32 : vector<32x128xf32> to vector<32x128xbf16>
    %c0_10 = arith.constant 0 : index
    %c0_11 = arith.constant 0 : index
    %c0_12 = arith.constant 0 : index
    %c0_13 = arith.constant 0 : index
    %34 = vector.load %arg2[%c0_10, %c0_11, %c0_12, %c0_13] : memref<3x9x128x128xbf16, #tpu.memory_space<vmem>>, vector<1x1x128x128xbf16>
    %35 = vector.shape_cast %34 : vector<1x1x128x128xbf16> to vector<128x128xbf16>
    %cst_14 = arith.constant dense<0.000000e+00> : vector<32x128xf32>
    %36 = tpu.matmul %33, %35, %cst_14 {dimension_numbers = #tpu.dot_dimension_numbers<[1], [0], [0], [1], [0, 0, 1, 1], [], []>} : vector<32x128xbf16>, vector<128x128xbf16>, vector<32x128xf32> -> vector<32x128xf32>
    %37 = arith.truncf %31 : vector<32x128xf32> to vector<32x128xbf16>
    %c0_15 = arith.constant 0 : index
    %c1 = arith.constant 1 : index
    %c0_16 = arith.constant 0 : index
    %c0_17 = arith.constant 0 : index
    %38 = vector.load %arg2[%c0_15, %c1, %c0_16, %c0_17] : memref<3x9x128x128xbf16, #tpu.memory_space<vmem>>, vector<1x1x128x128xbf16>
    %39 = vector.shape_cast %38 : vector<1x1x128x128xbf16> to vector<128x128xbf16>
    %cst_18 = arith.constant dense<0.000000e+00> : vector<32x128xf32>
    %40 = tpu.matmul %37, %39, %cst_18 {dimension_numbers = #tpu.dot_dimension_numbers<[1], [0], [0], [1], [0, 0, 1, 1], [], []>} : vector<32x128xbf16>, vector<128x128xbf16>, vector<32x128xf32> -> vector<32x128xf32>
    %41 = arith.addf %36, %40 : vector<32x128xf32>
    %c120_i32 = arith.constant 120 : i32
    %42 = tpu.dynamic_rotate %31 by %c120_i32 dim 1 : vector<32x128xf32>, i32 -> vector<32x128xf32>
    %43 = arith.truncf %42 : vector<32x128xf32> to vector<32x128xbf16>
    %c0_19 = arith.constant 0 : index
    %c2 = arith.constant 2 : index
    %c0_20 = arith.constant 0 : index
    %c0_21 = arith.constant 0 : index
    %44 = vector.load %arg2[%c0_19, %c2, %c0_20, %c0_21] : memref<3x9x128x128xbf16, #tpu.memory_space<vmem>>, vector<1x1x128x128xbf16>
    %45 = vector.shape_cast %44 : vector<1x1x128x128xbf16> to vector<128x128xbf16>
    %cst_22 = arith.constant dense<0.000000e+00> : vector<32x128xf32>
    %46 = tpu.matmul %43, %45, %cst_22 {dimension_numbers = #tpu.dot_dimension_numbers<[1], [0], [0], [1], [0, 0, 1, 1], [], []>} : vector<32x128xbf16>, vector<128x128xbf16>, vector<32x128xf32> -> vector<32x128xf32>
    %47 = arith.addf %41, %46 : vector<32x128xf32>
    %c8_i32_23 = arith.constant 8 : i32
    %48 = tpu.dynamic_rotate %24 by %c8_i32_23 dim 1 : vector<32x128xf32>, i32 -> vector<32x128xf32>
    %49 = arith.truncf %48 : vector<32x128xf32> to vector<32x128xbf16>
    %c0_24 = arith.constant 0 : index
    %c3 = arith.constant 3 : index
    %c0_25 = arith.constant 0 : index
    %c0_26 = arith.constant 0 : index
    %50 = vector.load %arg2[%c0_24, %c3, %c0_25, %c0_26] : memref<3x9x128x128xbf16, #tpu.memory_space<vmem>>, vector<1x1x128x128xbf16>
    %51 = vector.shape_cast %50 : vector<1x1x128x128xbf16> to vector<128x128xbf16>
    %cst_27 = arith.constant dense<0.000000e+00> : vector<32x128xf32>
    %52 = tpu.matmul %49, %51, %cst_27 {dimension_numbers = #tpu.dot_dimension_numbers<[1], [0], [0], [1], [0, 0, 1, 1], [], []>} : vector<32x128xbf16>, vector<128x128xbf16>, vector<32x128xf32> -> vector<32x128xf32>
    %53 = arith.addf %47, %52 : vector<32x128xf32>
    %54 = arith.truncf %24 : vector<32x128xf32> to vector<32x128xbf16>
    %c0_28 = arith.constant 0 : index
    %c4 = arith.constant 4 : index
    %c0_29 = arith.constant 0 : index
    %c0_30 = arith.constant 0 : index
    %55 = vector.load %arg2[%c0_28, %c4, %c0_29, %c0_30] : memref<3x9x128x128xbf16, #tpu.memory_space<vmem>>, vector<1x1x128x128xbf16>
    %56 = vector.shape_cast %55 : vector<1x1x128x128xbf16> to vector<128x128xbf16>
    %cst_31 = arith.constant dense<0.000000e+00> : vector<32x128xf32>
    %57 = tpu.matmul %54, %56, %cst_31 {dimension_numbers = #tpu.dot_dimension_numbers<[1], [0], [0], [1], [0, 0, 1, 1], [], []>} : vector<32x128xbf16>, vector<128x128xbf16>, vector<32x128xf32> -> vector<32x128xf32>
    %58 = arith.addf %53, %57 : vector<32x128xf32>
    %c120_i32_32 = arith.constant 120 : i32
    %59 = tpu.dynamic_rotate %24 by %c120_i32_32 dim 1 : vector<32x128xf32>, i32 -> vector<32x128xf32>
    %60 = arith.truncf %59 : vector<32x128xf32> to vector<32x128xbf16>
    %c0_33 = arith.constant 0 : index
    %c5 = arith.constant 5 : index
    %c0_34 = arith.constant 0 : index
    %c0_35 = arith.constant 0 : index
    %61 = vector.load %arg2[%c0_33, %c5, %c0_34, %c0_35] : memref<3x9x128x128xbf16, #tpu.memory_space<vmem>>, vector<1x1x128x128xbf16>
    %62 = vector.shape_cast %61 : vector<1x1x128x128xbf16> to vector<128x128xbf16>
    %cst_36 = arith.constant dense<0.000000e+00> : vector<32x128xf32>
    %63 = tpu.matmul %60, %62, %cst_36 {dimension_numbers = #tpu.dot_dimension_numbers<[1], [0], [0], [1], [0, 0, 1, 1], [], []>} : vector<32x128xbf16>, vector<128x128xbf16>, vector<32x128xf32> -> vector<32x128xf32>
    %64 = arith.addf %58, %63 : vector<32x128xf32>
    %c31_i32 = arith.constant 31 : i32
    %65 = tpu.dynamic_rotate %24 by %c31_i32 dim 0 : vector<32x128xf32>, i32 -> vector<32x128xf32>
    %cst_37 = arith.constant 0.000000e+00 : f32
    %66 = vector.shape_cast %20 : vector<32x1xi1> to vector<32x1xi1>
    %67 = vector.broadcast %66 : vector<32x1xi1> to vector<32x128xi1>
    %68 = vector.broadcast %cst_37 : f32 to vector<32x128xf32>
    %69 = arith.select %67, %65, %68 : vector<32x128xi1>, vector<32x128xf32>
    %c8_i32_38 = arith.constant 8 : i32
    %70 = tpu.dynamic_rotate %69 by %c8_i32_38 dim 1 : vector<32x128xf32>, i32 -> vector<32x128xf32>
    %71 = arith.truncf %70 : vector<32x128xf32> to vector<32x128xbf16>
    %c0_39 = arith.constant 0 : index
    %c6 = arith.constant 6 : index
    %c0_40 = arith.constant 0 : index
    %c0_41 = arith.constant 0 : index
    %72 = vector.load %arg2[%c0_39, %c6, %c0_40, %c0_41] : memref<3x9x128x128xbf16, #tpu.memory_space<vmem>>, vector<1x1x128x128xbf16>
    %73 = vector.shape_cast %72 : vector<1x1x128x128xbf16> to vector<128x128xbf16>
    %cst_42 = arith.constant dense<0.000000e+00> : vector<32x128xf32>
    %74 = tpu.matmul %71, %73, %cst_42 {dimension_numbers = #tpu.dot_dimension_numbers<[1], [0], [0], [1], [0, 0, 1, 1], [], []>} : vector<32x128xbf16>, vector<128x128xbf16>, vector<32x128xf32> -> vector<32x128xf32>
    %75 = arith.addf %64, %74 : vector<32x128xf32>
    %76 = arith.truncf %69 : vector<32x128xf32> to vector<32x128xbf16>
    %c0_43 = arith.constant 0 : index
    %c7 = arith.constant 7 : index
    %c0_44 = arith.constant 0 : index
    %c0_45 = arith.constant 0 : index
    %77 = vector.load %arg2[%c0_43, %c7, %c0_44, %c0_45] : memref<3x9x128x128xbf16, #tpu.memory_space<vmem>>, vector<1x1x128x128xbf16>
    %78 = vector.shape_cast %77 : vector<1x1x128x128xbf16> to vector<128x128xbf16>
    %cst_46 = arith.constant dense<0.000000e+00> : vector<32x128xf32>
    %79 = tpu.matmul %76, %78, %cst_46 {dimension_numbers = #tpu.dot_dimension_numbers<[1], [0], [0], [1], [0, 0, 1, 1], [], []>} : vector<32x128xbf16>, vector<128x128xbf16>, vector<32x128xf32> -> vector<32x128xf32>
    %80 = arith.addf %75, %79 : vector<32x128xf32>
    %c120_i32_47 = arith.constant 120 : i32
    %81 = tpu.dynamic_rotate %69 by %c120_i32_47 dim 1 : vector<32x128xf32>, i32 -> vector<32x128xf32>
    %82 = arith.truncf %81 : vector<32x128xf32> to vector<32x128xbf16>
    %c0_48 = arith.constant 0 : index
    %c8 = arith.constant 8 : index
    %c0_49 = arith.constant 0 : index
    %c0_50 = arith.constant 0 : index
    %83 = vector.load %arg2[%c0_48, %c8, %c0_49, %c0_50] : memref<3x9x128x128xbf16, #tpu.memory_space<vmem>>, vector<1x1x128x128xbf16>
    %84 = vector.shape_cast %83 : vector<1x1x128x128xbf16> to vector<128x128xbf16>
    %cst_51 = arith.constant dense<0.000000e+00> : vector<32x128xf32>
    %85 = tpu.matmul %82, %84, %cst_51 {dimension_numbers = #tpu.dot_dimension_numbers<[1], [0], [0], [1], [0, 0, 1, 1], [], []>} : vector<32x128xbf16>, vector<128x128xbf16>, vector<32x128xf32> -> vector<32x128xf32>
    %86 = arith.addf %80, %85 : vector<32x128xf32>
    %87 = vector.broadcast %26 : vector<1x128xf32> to vector<32x128xf32>
    %88 = arith.addf %86, %87 : vector<32x128xf32>
    %cst_52 = arith.constant 0.000000e+00 : f32
    %89 = vector.broadcast %cst_52 : f32 to vector<32x128xf32>
    %90 = arith.maximumf %88, %89 : vector<32x128xf32>
    %c1_53 = arith.constant 1 : index
    %c0_54 = arith.constant 0 : index
    %c0_55 = arith.constant 0 : index
    %91 = vector.load %arg3[%c1_53, %c0_54, %c0_55] : memref<3x1x128xf32, #tpu.memory_space<vmem>>, vector<1x1x128xf32>
    %92 = vector.shape_cast %91 : vector<1x1x128xf32> to vector<1x128xf32>
    %c1_i32_56 = arith.constant 1 : i32
    %93 = tpu.dynamic_rotate %90 by %c1_i32_56 dim 0 : vector<32x128xf32>, i32 -> vector<32x128xf32>
    %cst_57 = arith.constant 0.000000e+00 : f32
    %94 = vector.shape_cast %18 : vector<32x1xi1> to vector<32x1xi1>
    %95 = vector.broadcast %94 : vector<32x1xi1> to vector<32x128xi1>
    %96 = vector.broadcast %cst_57 : f32 to vector<32x128xf32>
    %97 = arith.select %95, %93, %96 : vector<32x128xi1>, vector<32x128xf32>
    %c8_i32_58 = arith.constant 8 : i32
    %98 = tpu.dynamic_rotate %97 by %c8_i32_58 dim 1 : vector<32x128xf32>, i32 -> vector<32x128xf32>
    %99 = arith.truncf %98 : vector<32x128xf32> to vector<32x128xbf16>
    %c1_59 = arith.constant 1 : index
    %c0_60 = arith.constant 0 : index
    %c0_61 = arith.constant 0 : index
    %c0_62 = arith.constant 0 : index
    %100 = vector.load %arg2[%c1_59, %c0_60, %c0_61, %c0_62] : memref<3x9x128x128xbf16, #tpu.memory_space<vmem>>, vector<1x1x128x128xbf16>
    %101 = vector.shape_cast %100 : vector<1x1x128x128xbf16> to vector<128x128xbf16>
    %cst_63 = arith.constant dense<0.000000e+00> : vector<32x128xf32>
    %102 = tpu.matmul %99, %101, %cst_63 {dimension_numbers = #tpu.dot_dimension_numbers<[1], [0], [0], [1], [0, 0, 1, 1], [], []>} : vector<32x128xbf16>, vector<128x128xbf16>, vector<32x128xf32> -> vector<32x128xf32>
    %103 = arith.truncf %97 : vector<32x128xf32> to vector<32x128xbf16>
    %c1_64 = arith.constant 1 : index
    %c1_65 = arith.constant 1 : index
    %c0_66 = arith.constant 0 : index
    %c0_67 = arith.constant 0 : index
    %104 = vector.load %arg2[%c1_64, %c1_65, %c0_66, %c0_67] : memref<3x9x128x128xbf16, #tpu.memory_space<vmem>>, vector<1x1x128x128xbf16>
    %105 = vector.shape_cast %104 : vector<1x1x128x128xbf16> to vector<128x128xbf16>
    %cst_68 = arith.constant dense<0.000000e+00> : vector<32x128xf32>
    %106 = tpu.matmul %103, %105, %cst_68 {dimension_numbers = #tpu.dot_dimension_numbers<[1], [0], [0], [1], [0, 0, 1, 1], [], []>} : vector<32x128xbf16>, vector<128x128xbf16>, vector<32x128xf32> -> vector<32x128xf32>
    %107 = arith.addf %102, %106 : vector<32x128xf32>
    %c120_i32_69 = arith.constant 120 : i32
    %108 = tpu.dynamic_rotate %97 by %c120_i32_69 dim 1 : vector<32x128xf32>, i32 -> vector<32x128xf32>
    %109 = arith.truncf %108 : vector<32x128xf32> to vector<32x128xbf16>
    %c1_70 = arith.constant 1 : index
    %c2_71 = arith.constant 2 : index
    %c0_72 = arith.constant 0 : index
    %c0_73 = arith.constant 0 : index
    %110 = vector.load %arg2[%c1_70, %c2_71, %c0_72, %c0_73] : memref<3x9x128x128xbf16, #tpu.memory_space<vmem>>, vector<1x1x128x128xbf16>
    %111 = vector.shape_cast %110 : vector<1x1x128x128xbf16> to vector<128x128xbf16>
    %cst_74 = arith.constant dense<0.000000e+00> : vector<32x128xf32>
    %112 = tpu.matmul %109, %111, %cst_74 {dimension_numbers = #tpu.dot_dimension_numbers<[1], [0], [0], [1], [0, 0, 1, 1], [], []>} : vector<32x128xbf16>, vector<128x128xbf16>, vector<32x128xf32> -> vector<32x128xf32>
    %113 = arith.addf %107, %112 : vector<32x128xf32>
    %c8_i32_75 = arith.constant 8 : i32
    %114 = tpu.dynamic_rotate %90 by %c8_i32_75 dim 1 : vector<32x128xf32>, i32 -> vector<32x128xf32>
    %115 = arith.truncf %114 : vector<32x128xf32> to vector<32x128xbf16>
    %c1_76 = arith.constant 1 : index
    %c3_77 = arith.constant 3 : index
    %c0_78 = arith.constant 0 : index
    %c0_79 = arith.constant 0 : index
    %116 = vector.load %arg2[%c1_76, %c3_77, %c0_78, %c0_79] : memref<3x9x128x128xbf16, #tpu.memory_space<vmem>>, vector<1x1x128x128xbf16>
    %117 = vector.shape_cast %116 : vector<1x1x128x128xbf16> to vector<128x128xbf16>
    %cst_80 = arith.constant dense<0.000000e+00> : vector<32x128xf32>
    %118 = tpu.matmul %115, %117, %cst_80 {dimension_numbers = #tpu.dot_dimension_numbers<[1], [0], [0], [1], [0, 0, 1, 1], [], []>} : vector<32x128xbf16>, vector<128x128xbf16>, vector<32x128xf32> -> vector<32x128xf32>
    %119 = arith.addf %113, %118 : vector<32x128xf32>
    %120 = arith.truncf %90 : vector<32x128xf32> to vector<32x128xbf16>
    %c1_81 = arith.constant 1 : index
    %c4_82 = arith.constant 4 : index
    %c0_83 = arith.constant 0 : index
    %c0_84 = arith.constant 0 : index
    %121 = vector.load %arg2[%c1_81, %c4_82, %c0_83, %c0_84] : memref<3x9x128x128xbf16, #tpu.memory_space<vmem>>, vector<1x1x128x128xbf16>
    %122 = vector.shape_cast %121 : vector<1x1x128x128xbf16> to vector<128x128xbf16>
    %cst_85 = arith.constant dense<0.000000e+00> : vector<32x128xf32>
    %123 = tpu.matmul %120, %122, %cst_85 {dimension_numbers = #tpu.dot_dimension_numbers<[1], [0], [0], [1], [0, 0, 1, 1], [], []>} : vector<32x128xbf16>, vector<128x128xbf16>, vector<32x128xf32> -> vector<32x128xf32>
    %124 = arith.addf %119, %123 : vector<32x128xf32>
    %c120_i32_86 = arith.constant 120 : i32
    %125 = tpu.dynamic_rotate %90 by %c120_i32_86 dim 1 : vector<32x128xf32>, i32 -> vector<32x128xf32>
    %126 = arith.truncf %125 : vector<32x128xf32> to vector<32x128xbf16>
    %c1_87 = arith.constant 1 : index
    %c5_88 = arith.constant 5 : index
    %c0_89 = arith.constant 0 : index
    %c0_90 = arith.constant 0 : index
    %127 = vector.load %arg2[%c1_87, %c5_88, %c0_89, %c0_90] : memref<3x9x128x128xbf16, #tpu.memory_space<vmem>>, vector<1x1x128x128xbf16>
    %128 = vector.shape_cast %127 : vector<1x1x128x128xbf16> to vector<128x128xbf16>
    %cst_91 = arith.constant dense<0.000000e+00> : vector<32x128xf32>
    %129 = tpu.matmul %126, %128, %cst_91 {dimension_numbers = #tpu.dot_dimension_numbers<[1], [0], [0], [1], [0, 0, 1, 1], [], []>} : vector<32x128xbf16>, vector<128x128xbf16>, vector<32x128xf32> -> vector<32x128xf32>
    %130 = arith.addf %124, %129 : vector<32x128xf32>
    %c31_i32_92 = arith.constant 31 : i32
    %131 = tpu.dynamic_rotate %90 by %c31_i32_92 dim 0 : vector<32x128xf32>, i32 -> vector<32x128xf32>
    %cst_93 = arith.constant 0.000000e+00 : f32
    %132 = vector.shape_cast %20 : vector<32x1xi1> to vector<32x1xi1>
    %133 = vector.broadcast %132 : vector<32x1xi1> to vector<32x128xi1>
    %134 = vector.broadcast %cst_93 : f32 to vector<32x128xf32>
    %135 = arith.select %133, %131, %134 : vector<32x128xi1>, vector<32x128xf32>
    %c8_i32_94 = arith.constant 8 : i32
    %136 = tpu.dynamic_rotate %135 by %c8_i32_94 dim 1 : vector<32x128xf32>, i32 -> vector<32x128xf32>
    %137 = arith.truncf %136 : vector<32x128xf32> to vector<32x128xbf16>
    %c1_95 = arith.constant 1 : index
    %c6_96 = arith.constant 6 : index
    %c0_97 = arith.constant 0 : index
    %c0_98 = arith.constant 0 : index
    %138 = vector.load %arg2[%c1_95, %c6_96, %c0_97, %c0_98] : memref<3x9x128x128xbf16, #tpu.memory_space<vmem>>, vector<1x1x128x128xbf16>
    %139 = vector.shape_cast %138 : vector<1x1x128x128xbf16> to vector<128x128xbf16>
    %cst_99 = arith.constant dense<0.000000e+00> : vector<32x128xf32>
    %140 = tpu.matmul %137, %139, %cst_99 {dimension_numbers = #tpu.dot_dimension_numbers<[1], [0], [0], [1], [0, 0, 1, 1], [], []>} : vector<32x128xbf16>, vector<128x128xbf16>, vector<32x128xf32> -> vector<32x128xf32>
    %141 = arith.addf %130, %140 : vector<32x128xf32>
    %142 = arith.truncf %135 : vector<32x128xf32> to vector<32x128xbf16>
    %c1_100 = arith.constant 1 : index
    %c7_101 = arith.constant 7 : index
    %c0_102 = arith.constant 0 : index
    %c0_103 = arith.constant 0 : index
    %143 = vector.load %arg2[%c1_100, %c7_101, %c0_102, %c0_103] : memref<3x9x128x128xbf16, #tpu.memory_space<vmem>>, vector<1x1x128x128xbf16>
    %144 = vector.shape_cast %143 : vector<1x1x128x128xbf16> to vector<128x128xbf16>
    %cst_104 = arith.constant dense<0.000000e+00> : vector<32x128xf32>
    %145 = tpu.matmul %142, %144, %cst_104 {dimension_numbers = #tpu.dot_dimension_numbers<[1], [0], [0], [1], [0, 0, 1, 1], [], []>} : vector<32x128xbf16>, vector<128x128xbf16>, vector<32x128xf32> -> vector<32x128xf32>
    %146 = arith.addf %141, %145 : vector<32x128xf32>
    %c120_i32_105 = arith.constant 120 : i32
    %147 = tpu.dynamic_rotate %135 by %c120_i32_105 dim 1 : vector<32x128xf32>, i32 -> vector<32x128xf32>
    %148 = arith.truncf %147 : vector<32x128xf32> to vector<32x128xbf16>
    %c1_106 = arith.constant 1 : index
    %c8_107 = arith.constant 8 : index
    %c0_108 = arith.constant 0 : index
    %c0_109 = arith.constant 0 : index
    %149 = vector.load %arg2[%c1_106, %c8_107, %c0_108, %c0_109] : memref<3x9x128x128xbf16, #tpu.memory_space<vmem>>, vector<1x1x128x128xbf16>
    %150 = vector.shape_cast %149 : vector<1x1x128x128xbf16> to vector<128x128xbf16>
    %cst_110 = arith.constant dense<0.000000e+00> : vector<32x128xf32>
    %151 = tpu.matmul %148, %150, %cst_110 {dimension_numbers = #tpu.dot_dimension_numbers<[1], [0], [0], [1], [0, 0, 1, 1], [], []>} : vector<32x128xbf16>, vector<128x128xbf16>, vector<32x128xf32> -> vector<32x128xf32>
    %152 = arith.addf %146, %151 : vector<32x128xf32>
    %153 = vector.broadcast %92 : vector<1x128xf32> to vector<32x128xf32>
    %154 = arith.addf %152, %153 : vector<32x128xf32>
    %155 = arith.addf %22, %154 : vector<32x128xf32>
    %c2_111 = arith.constant 2 : index
    %c0_112 = arith.constant 0 : index
    %c0_113 = arith.constant 0 : index
    %156 = vector.load %arg3[%c2_111, %c0_112, %c0_113] : memref<3x1x128xf32, #tpu.memory_space<vmem>>, vector<1x1x128xf32>
    %157 = vector.shape_cast %156 : vector<1x1x128xf32> to vector<1x128xf32>
    %c1_i32_114 = arith.constant 1 : i32
    %158 = tpu.dynamic_rotate %155 by %c1_i32_114 dim 0 : vector<32x128xf32>, i32 -> vector<32x128xf32>
    %cst_115 = arith.constant 0.000000e+00 : f32
    %159 = vector.shape_cast %18 : vector<32x1xi1> to vector<32x1xi1>
    %160 = vector.broadcast %159 : vector<32x1xi1> to vector<32x128xi1>
    %161 = vector.broadcast %cst_115 : f32 to vector<32x128xf32>
    %162 = arith.select %160, %158, %161 : vector<32x128xi1>, vector<32x128xf32>
    %c8_i32_116 = arith.constant 8 : i32
    %163 = tpu.dynamic_rotate %162 by %c8_i32_116 dim 1 : vector<32x128xf32>, i32 -> vector<32x128xf32>
    %164 = arith.truncf %163 : vector<32x128xf32> to vector<32x128xbf16>
    %c2_117 = arith.constant 2 : index
    %c0_118 = arith.constant 0 : index
    %c0_119 = arith.constant 0 : index
    %c0_120 = arith.constant 0 : index
    %165 = vector.load %arg2[%c2_117, %c0_118, %c0_119, %c0_120] : memref<3x9x128x128xbf16, #tpu.memory_space<vmem>>, vector<1x1x128x128xbf16>
    %166 = vector.shape_cast %165 : vector<1x1x128x128xbf16> to vector<128x128xbf16>
    %cst_121 = arith.constant dense<0.000000e+00> : vector<32x128xf32>
    %167 = tpu.matmul %164, %166, %cst_121 {dimension_numbers = #tpu.dot_dimension_numbers<[1], [0], [0], [1], [0, 0, 1, 1], [], []>} : vector<32x128xbf16>, vector<128x128xbf16>, vector<32x128xf32> -> vector<32x128xf32>
    %168 = arith.truncf %162 : vector<32x128xf32> to vector<32x128xbf16>
    %c2_122 = arith.constant 2 : index
    %c1_123 = arith.constant 1 : index
    %c0_124 = arith.constant 0 : index
    %c0_125 = arith.constant 0 : index
    %169 = vector.load %arg2[%c2_122, %c1_123, %c0_124, %c0_125] : memref<3x9x128x128xbf16, #tpu.memory_space<vmem>>, vector<1x1x128x128xbf16>
    %170 = vector.shape_cast %169 : vector<1x1x128x128xbf16> to vector<128x128xbf16>
    %cst_126 = arith.constant dense<0.000000e+00> : vector<32x128xf32>
    %171 = tpu.matmul %168, %170, %cst_126 {dimension_numbers = #tpu.dot_dimension_numbers<[1], [0], [0], [1], [0, 0, 1, 1], [], []>} : vector<32x128xbf16>, vector<128x128xbf16>, vector<32x128xf32> -> vector<32x128xf32>
    %172 = arith.addf %167, %171 : vector<32x128xf32>
    %c120_i32_127 = arith.constant 120 : i32
    %173 = tpu.dynamic_rotate %162 by %c120_i32_127 dim 1 : vector<32x128xf32>, i32 -> vector<32x128xf32>
    %174 = arith.truncf %173 : vector<32x128xf32> to vector<32x128xbf16>
    %c2_128 = arith.constant 2 : index
    %c2_129 = arith.constant 2 : index
    %c0_130 = arith.constant 0 : index
    %c0_131 = arith.constant 0 : index
    %175 = vector.load %arg2[%c2_128, %c2_129, %c0_130, %c0_131] : memref<3x9x128x128xbf16, #tpu.memory_space<vmem>>, vector<1x1x128x128xbf16>
    %176 = vector.shape_cast %175 : vector<1x1x128x128xbf16> to vector<128x128xbf16>
    %cst_132 = arith.constant dense<0.000000e+00> : vector<32x128xf32>
    %177 = tpu.matmul %174, %176, %cst_132 {dimension_numbers = #tpu.dot_dimension_numbers<[1], [0], [0], [1], [0, 0, 1, 1], [], []>} : vector<32x128xbf16>, vector<128x128xbf16>, vector<32x128xf32> -> vector<32x128xf32>
    %178 = arith.addf %172, %177 : vector<32x128xf32>
    %c8_i32_133 = arith.constant 8 : i32
    %179 = tpu.dynamic_rotate %155 by %c8_i32_133 dim 1 : vector<32x128xf32>, i32 -> vector<32x128xf32>
    %180 = arith.truncf %179 : vector<32x128xf32> to vector<32x128xbf16>
    %c2_134 = arith.constant 2 : index
    %c3_135 = arith.constant 3 : index
    %c0_136 = arith.constant 0 : index
    %c0_137 = arith.constant 0 : index
    %181 = vector.load %arg2[%c2_134, %c3_135, %c0_136, %c0_137] : memref<3x9x128x128xbf16, #tpu.memory_space<vmem>>, vector<1x1x128x128xbf16>
    %182 = vector.shape_cast %181 : vector<1x1x128x128xbf16> to vector<128x128xbf16>
    %cst_138 = arith.constant dense<0.000000e+00> : vector<32x128xf32>
    %183 = tpu.matmul %180, %182, %cst_138 {dimension_numbers = #tpu.dot_dimension_numbers<[1], [0], [0], [1], [0, 0, 1, 1], [], []>} : vector<32x128xbf16>, vector<128x128xbf16>, vector<32x128xf32> -> vector<32x128xf32>
    %184 = arith.addf %178, %183 : vector<32x128xf32>
    %185 = arith.truncf %155 : vector<32x128xf32> to vector<32x128xbf16>
    %c2_139 = arith.constant 2 : index
    %c4_140 = arith.constant 4 : index
    %c0_141 = arith.constant 0 : index
    %c0_142 = arith.constant 0 : index
    %186 = vector.load %arg2[%c2_139, %c4_140, %c0_141, %c0_142] : memref<3x9x128x128xbf16, #tpu.memory_space<vmem>>, vector<1x1x128x128xbf16>
    %187 = vector.shape_cast %186 : vector<1x1x128x128xbf16> to vector<128x128xbf16>
    %cst_143 = arith.constant dense<0.000000e+00> : vector<32x128xf32>
    %188 = tpu.matmul %185, %187, %cst_143 {dimension_numbers = #tpu.dot_dimension_numbers<[1], [0], [0], [1], [0, 0, 1, 1], [], []>} : vector<32x128xbf16>, vector<128x128xbf16>, vector<32x128xf32> -> vector<32x128xf32>
    %189 = arith.addf %184, %188 : vector<32x128xf32>
    %c120_i32_144 = arith.constant 120 : i32
    %190 = tpu.dynamic_rotate %155 by %c120_i32_144 dim 1 : vector<32x128xf32>, i32 -> vector<32x128xf32>
    %191 = arith.truncf %190 : vector<32x128xf32> to vector<32x128xbf16>
    %c2_145 = arith.constant 2 : index
    %c5_146 = arith.constant 5 : index
    %c0_147 = arith.constant 0 : index
    %c0_148 = arith.constant 0 : index
    %192 = vector.load %arg2[%c2_145, %c5_146, %c0_147, %c0_148] : memref<3x9x128x128xbf16, #tpu.memory_space<vmem>>, vector<1x1x128x128xbf16>
    %193 = vector.shape_cast %192 : vector<1x1x128x128xbf16> to vector<128x128xbf16>
    %cst_149 = arith.constant dense<0.000000e+00> : vector<32x128xf32>
    %194 = tpu.matmul %191, %193, %cst_149 {dimension_numbers = #tpu.dot_dimension_numbers<[1], [0], [0], [1], [0, 0, 1, 1], [], []>} : vector<32x128xbf16>, vector<128x128xbf16>, vector<32x128xf32> -> vector<32x128xf32>
    %195 = arith.addf %189, %194 : vector<32x128xf32>
    %c31_i32_150 = arith.constant 31 : i32
    %196 = tpu.dynamic_rotate %155 by %c31_i32_150 dim 0 : vector<32x128xf32>, i32 -> vector<32x128xf32>
    %cst_151 = arith.constant 0.000000e+00 : f32
    %197 = vector.shape_cast %20 : vector<32x1xi1> to vector<32x1xi1>
    %198 = vector.broadcast %197 : vector<32x1xi1> to vector<32x128xi1>
    %199 = vector.broadcast %cst_151 : f32 to vector<32x128xf32>
    %200 = arith.select %198, %196, %199 : vector<32x128xi1>, vector<32x128xf32>
    %c8_i32_152 = arith.constant 8 : i32
    %201 = tpu.dynamic_rotate %200 by %c8_i32_152 dim 1 : vector<32x128xf32>, i32 -> vector<32x128xf32>
    %202 = arith.truncf %201 : vector<32x128xf32> to vector<32x128xbf16>
    %c2_153 = arith.constant 2 : index
    %c6_154 = arith.constant 6 : index
    %c0_155 = arith.constant 0 : index
    %c0_156 = arith.constant 0 : index
    %203 = vector.load %arg2[%c2_153, %c6_154, %c0_155, %c0_156] : memref<3x9x128x128xbf16, #tpu.memory_space<vmem>>, vector<1x1x128x128xbf16>
    %204 = vector.shape_cast %203 : vector<1x1x128x128xbf16> to vector<128x128xbf16>
    %cst_157 = arith.constant dense<0.000000e+00> : vector<32x128xf32>
    %205 = tpu.matmul %202, %204, %cst_157 {dimension_numbers = #tpu.dot_dimension_numbers<[1], [0], [0], [1], [0, 0, 1, 1], [], []>} : vector<32x128xbf16>, vector<128x128xbf16>, vector<32x128xf32> -> vector<32x128xf32>
    %206 = arith.addf %195, %205 : vector<32x128xf32>
    %207 = arith.truncf %200 : vector<32x128xf32> to vector<32x128xbf16>
    %c2_158 = arith.constant 2 : index
    %c7_159 = arith.constant 7 : index
    %c0_160 = arith.constant 0 : index
    %c0_161 = arith.constant 0 : index
    %208 = vector.load %arg2[%c2_158, %c7_159, %c0_160, %c0_161] : memref<3x9x128x128xbf16, #tpu.memory_space<vmem>>, vector<1x1x128x128xbf16>
    %209 = vector.shape_cast %208 : vector<1x1x128x128xbf16> to vector<128x128xbf16>
    %cst_162 = arith.constant dense<0.000000e+00> : vector<32x128xf32>
    %210 = tpu.matmul %207, %209, %cst_162 {dimension_numbers = #tpu.dot_dimension_numbers<[1], [0], [0], [1], [0, 0, 1, 1], [], []>} : vector<32x128xbf16>, vector<128x128xbf16>, vector<32x128xf32> -> vector<32x128xf32>
    %211 = arith.addf %206, %210 : vector<32x128xf32>
    %c120_i32_163 = arith.constant 120 : i32
    %212 = tpu.dynamic_rotate %200 by %c120_i32_163 dim 1 : vector<32x128xf32>, i32 -> vector<32x128xf32>
    %213 = arith.truncf %212 : vector<32x128xf32> to vector<32x128xbf16>
    %c2_164 = arith.constant 2 : index
    %c8_165 = arith.constant 8 : index
    %c0_166 = arith.constant 0 : index
    %c0_167 = arith.constant 0 : index
    %214 = vector.load %arg2[%c2_164, %c8_165, %c0_166, %c0_167] : memref<3x9x128x128xbf16, #tpu.memory_space<vmem>>, vector<1x1x128x128xbf16>
    %215 = vector.shape_cast %214 : vector<1x1x128x128xbf16> to vector<128x128xbf16>
    %cst_168 = arith.constant dense<0.000000e+00> : vector<32x128xf32>
    %216 = tpu.matmul %213, %215, %cst_168 {dimension_numbers = #tpu.dot_dimension_numbers<[1], [0], [0], [1], [0, 0, 1, 1], [], []>} : vector<32x128xbf16>, vector<128x128xbf16>, vector<32x128xf32> -> vector<32x128xf32>
    %217 = arith.addf %211, %216 : vector<32x128xf32>
    %218 = vector.broadcast %157 : vector<1x128xf32> to vector<32x128xf32>
    %219 = arith.addf %217, %218 : vector<32x128xf32>
    %cst_169 = arith.constant 0.000000e+00 : f32
    %220 = vector.broadcast %cst_169 : f32 to vector<32x128xf32>
    %221 = arith.maximumf %219, %220 : vector<32x128xf32>
    %c0_170 = arith.constant 0 : index
    %c0_171 = arith.constant 0 : index
    %222 = vector.load %arg5[%c0_170, %c0_171] : memref<1x128xf32, #tpu.memory_space<vmem>>, vector<1x128xf32>
    %c1_i32_172 = arith.constant 1 : i32
    %223 = tpu.dynamic_rotate %221 by %c1_i32_172 dim 0 : vector<32x128xf32>, i32 -> vector<32x128xf32>
    %cst_173 = arith.constant 0.000000e+00 : f32
    %224 = vector.shape_cast %18 : vector<32x1xi1> to vector<32x1xi1>
    %225 = vector.broadcast %224 : vector<32x1xi1> to vector<32x128xi1>
    %226 = vector.broadcast %cst_173 : f32 to vector<32x128xf32>
    %227 = arith.select %225, %223, %226 : vector<32x128xi1>, vector<32x128xf32>
    %c8_i32_174 = arith.constant 8 : i32
    %228 = tpu.dynamic_rotate %227 by %c8_i32_174 dim 1 : vector<32x128xf32>, i32 -> vector<32x128xf32>
    %229 = arith.truncf %228 : vector<32x128xf32> to vector<32x128xbf16>
    %c0_175 = arith.constant 0 : index
    %c0_176 = arith.constant 0 : index
    %c0_177 = arith.constant 0 : index
    %230 = vector.load %arg4[%c0_175, %c0_176, %c0_177] : memref<9x128x128xbf16, #tpu.memory_space<vmem>>, vector<1x128x128xbf16>
    %231 = vector.shape_cast %230 : vector<1x128x128xbf16> to vector<128x128xbf16>
    %cst_178 = arith.constant dense<0.000000e+00> : vector<32x128xf32>
    %232 = tpu.matmul %229, %231, %cst_178 {dimension_numbers = #tpu.dot_dimension_numbers<[1], [0], [0], [1], [0, 0, 1, 1], [], []>} : vector<32x128xbf16>, vector<128x128xbf16>, vector<32x128xf32> -> vector<32x128xf32>
    %233 = arith.truncf %227 : vector<32x128xf32> to vector<32x128xbf16>
    %c1_179 = arith.constant 1 : index
    %c0_180 = arith.constant 0 : index
    %c0_181 = arith.constant 0 : index
    %234 = vector.load %arg4[%c1_179, %c0_180, %c0_181] : memref<9x128x128xbf16, #tpu.memory_space<vmem>>, vector<1x128x128xbf16>
    %235 = vector.shape_cast %234 : vector<1x128x128xbf16> to vector<128x128xbf16>
    %cst_182 = arith.constant dense<0.000000e+00> : vector<32x128xf32>
    %236 = tpu.matmul %233, %235, %cst_182 {dimension_numbers = #tpu.dot_dimension_numbers<[1], [0], [0], [1], [0, 0, 1, 1], [], []>} : vector<32x128xbf16>, vector<128x128xbf16>, vector<32x128xf32> -> vector<32x128xf32>
    %237 = arith.addf %232, %236 : vector<32x128xf32>
    %c120_i32_183 = arith.constant 120 : i32
    %238 = tpu.dynamic_rotate %227 by %c120_i32_183 dim 1 : vector<32x128xf32>, i32 -> vector<32x128xf32>
    %239 = arith.truncf %238 : vector<32x128xf32> to vector<32x128xbf16>
    %c2_184 = arith.constant 2 : index
    %c0_185 = arith.constant 0 : index
    %c0_186 = arith.constant 0 : index
    %240 = vector.load %arg4[%c2_184, %c0_185, %c0_186] : memref<9x128x128xbf16, #tpu.memory_space<vmem>>, vector<1x128x128xbf16>
    %241 = vector.shape_cast %240 : vector<1x128x128xbf16> to vector<128x128xbf16>
    %cst_187 = arith.constant dense<0.000000e+00> : vector<32x128xf32>
    %242 = tpu.matmul %239, %241, %cst_187 {dimension_numbers = #tpu.dot_dimension_numbers<[1], [0], [0], [1], [0, 0, 1, 1], [], []>} : vector<32x128xbf16>, vector<128x128xbf16>, vector<32x128xf32> -> vector<32x128xf32>
    %243 = arith.addf %237, %242 : vector<32x128xf32>
    %c8_i32_188 = arith.constant 8 : i32
    %244 = tpu.dynamic_rotate %221 by %c8_i32_188 dim 1 : vector<32x128xf32>, i32 -> vector<32x128xf32>
    %245 = arith.truncf %244 : vector<32x128xf32> to vector<32x128xbf16>
    %c3_189 = arith.constant 3 : index
    %c0_190 = arith.constant 0 : index
    %c0_191 = arith.constant 0 : index
    %246 = vector.load %arg4[%c3_189, %c0_190, %c0_191] : memref<9x128x128xbf16, #tpu.memory_space<vmem>>, vector<1x128x128xbf16>
    %247 = vector.shape_cast %246 : vector<1x128x128xbf16> to vector<128x128xbf16>
    %cst_192 = arith.constant dense<0.000000e+00> : vector<32x128xf32>
    %248 = tpu.matmul %245, %247, %cst_192 {dimension_numbers = #tpu.dot_dimension_numbers<[1], [0], [0], [1], [0, 0, 1, 1], [], []>} : vector<32x128xbf16>, vector<128x128xbf16>, vector<32x128xf32> -> vector<32x128xf32>
    %249 = arith.addf %243, %248 : vector<32x128xf32>
    %250 = arith.truncf %221 : vector<32x128xf32> to vector<32x128xbf16>
    %c4_193 = arith.constant 4 : index
    %c0_194 = arith.constant 0 : index
    %c0_195 = arith.constant 0 : index
    %251 = vector.load %arg4[%c4_193, %c0_194, %c0_195] : memref<9x128x128xbf16, #tpu.memory_space<vmem>>, vector<1x128x128xbf16>
    %252 = vector.shape_cast %251 : vector<1x128x128xbf16> to vector<128x128xbf16>
    %cst_196 = arith.constant dense<0.000000e+00> : vector<32x128xf32>
    %253 = tpu.matmul %250, %252, %cst_196 {dimension_numbers = #tpu.dot_dimension_numbers<[1], [0], [0], [1], [0, 0, 1, 1], [], []>} : vector<32x128xbf16>, vector<128x128xbf16>, vector<32x128xf32> -> vector<32x128xf32>
    %254 = arith.addf %249, %253 : vector<32x128xf32>
    %c120_i32_197 = arith.constant 120 : i32
    %255 = tpu.dynamic_rotate %221 by %c120_i32_197 dim 1 : vector<32x128xf32>, i32 -> vector<32x128xf32>
    %256 = arith.truncf %255 : vector<32x128xf32> to vector<32x128xbf16>
    %c5_198 = arith.constant 5 : index
    %c0_199 = arith.constant 0 : index
    %c0_200 = arith.constant 0 : index
    %257 = vector.load %arg4[%c5_198, %c0_199, %c0_200] : memref<9x128x128xbf16, #tpu.memory_space<vmem>>, vector<1x128x128xbf16>
    %258 = vector.shape_cast %257 : vector<1x128x128xbf16> to vector<128x128xbf16>
    %cst_201 = arith.constant dense<0.000000e+00> : vector<32x128xf32>
    %259 = tpu.matmul %256, %258, %cst_201 {dimension_numbers = #tpu.dot_dimension_numbers<[1], [0], [0], [1], [0, 0, 1, 1], [], []>} : vector<32x128xbf16>, vector<128x128xbf16>, vector<32x128xf32> -> vector<32x128xf32>
    %260 = arith.addf %254, %259 : vector<32x128xf32>
    %c31_i32_202 = arith.constant 31 : i32
    %261 = tpu.dynamic_rotate %221 by %c31_i32_202 dim 0 : vector<32x128xf32>, i32 -> vector<32x128xf32>
    %cst_203 = arith.constant 0.000000e+00 : f32
    %262 = vector.shape_cast %20 : vector<32x1xi1> to vector<32x1xi1>
    %263 = vector.broadcast %262 : vector<32x1xi1> to vector<32x128xi1>
    %264 = vector.broadcast %cst_203 : f32 to vector<32x128xf32>
    %265 = arith.select %263, %261, %264 : vector<32x128xi1>, vector<32x128xf32>
    %c8_i32_204 = arith.constant 8 : i32
    %266 = tpu.dynamic_rotate %265 by %c8_i32_204 dim 1 : vector<32x128xf32>, i32 -> vector<32x128xf32>
    %267 = arith.truncf %266 : vector<32x128xf32> to vector<32x128xbf16>
    %c6_205 = arith.constant 6 : index
    %c0_206 = arith.constant 0 : index
    %c0_207 = arith.constant 0 : index
    %268 = vector.load %arg4[%c6_205, %c0_206, %c0_207] : memref<9x128x128xbf16, #tpu.memory_space<vmem>>, vector<1x128x128xbf16>
    %269 = vector.shape_cast %268 : vector<1x128x128xbf16> to vector<128x128xbf16>
    %cst_208 = arith.constant dense<0.000000e+00> : vector<32x128xf32>
    %270 = tpu.matmul %267, %269, %cst_208 {dimension_numbers = #tpu.dot_dimension_numbers<[1], [0], [0], [1], [0, 0, 1, 1], [], []>} : vector<32x128xbf16>, vector<128x128xbf16>, vector<32x128xf32> -> vector<32x128xf32>
    %271 = arith.addf %260, %270 : vector<32x128xf32>
    %272 = arith.truncf %265 : vector<32x128xf32> to vector<32x128xbf16>
    %c7_209 = arith.constant 7 : index
    %c0_210 = arith.constant 0 : index
    %c0_211 = arith.constant 0 : index
    %273 = vector.load %arg4[%c7_209, %c0_210, %c0_211] : memref<9x128x128xbf16, #tpu.memory_space<vmem>>, vector<1x128x128xbf16>
    %274 = vector.shape_cast %273 : vector<1x128x128xbf16> to vector<128x128xbf16>
    %cst_212 = arith.constant dense<0.000000e+00> : vector<32x128xf32>
    %275 = tpu.matmul %272, %274, %cst_212 {dimension_numbers = #tpu.dot_dimension_numbers<[1], [0], [0], [1], [0, 0, 1, 1], [], []>} : vector<32x128xbf16>, vector<128x128xbf16>, vector<32x128xf32> -> vector<32x128xf32>
    %276 = arith.addf %271, %275 : vector<32x128xf32>
    %c120_i32_213 = arith.constant 120 : i32
    %277 = tpu.dynamic_rotate %265 by %c120_i32_213 dim 1 : vector<32x128xf32>, i32 -> vector<32x128xf32>
    %278 = arith.truncf %277 : vector<32x128xf32> to vector<32x128xbf16>
    %c8_214 = arith.constant 8 : index
    %c0_215 = arith.constant 0 : index
    %c0_216 = arith.constant 0 : index
    %279 = vector.load %arg4[%c8_214, %c0_215, %c0_216] : memref<9x128x128xbf16, #tpu.memory_space<vmem>>, vector<1x128x128xbf16>
    %280 = vector.shape_cast %279 : vector<1x128x128xbf16> to vector<128x128xbf16>
    %cst_217 = arith.constant dense<0.000000e+00> : vector<32x128xf32>
    %281 = tpu.matmul %278, %280, %cst_217 {dimension_numbers = #tpu.dot_dimension_numbers<[1], [0], [0], [1], [0, 0, 1, 1], [], []>} : vector<32x128xbf16>, vector<128x128xbf16>, vector<32x128xf32> -> vector<32x128xf32>
    %282 = arith.addf %276, %281 : vector<32x128xf32>
    %283 = vector.broadcast %222 : vector<1x128xf32> to vector<32x128xf32>
    %284 = arith.addf %282, %283 : vector<32x128xf32>
    %c0_218 = arith.constant 0 : index
    %c0_219 = arith.constant 0 : index
    %285 = vector.load %arg6[%c0_218, %c0_219] : memref<32x128xf32, #tpu.memory_space<vmem>>, vector<32x128xf32>
    tpu.vector_store %arg6[%c0_218, %c0_219], %284 {strides = array<i32>} : memref<32x128xf32, #tpu.memory_space<vmem>>, vector<32x128xf32>,
    return
  }
  func.func @transform_0(%arg0: i32) -> (i32, i32) {
    %c0_i32 = arith.constant 0 : i32
    %c0_i32_0 = arith.constant 0 : i32
    return %arg0, %c0_i32 : i32, i32
  }
  func.func @transform_1(%arg0: i32) -> (i32, i32, i32, i32) {
    %c0_i32 = arith.constant 0 : i32
    %c0_i32_0 = arith.constant 0 : i32
    %c0_i32_1 = arith.constant 0 : i32
    %c0_i32_2 = arith.constant 0 : i32
    %c0_i32_3 = arith.constant 0 : i32
    return %c0_i32, %c0_i32_0, %c0_i32_1, %c0_i32_2 : i32, i32, i32, i32
  }
  func.func @transform_2(%arg0: i32) -> (i32, i32, i32) {
    %c0_i32 = arith.constant 0 : i32
    %c0_i32_0 = arith.constant 0 : i32
    %c0_i32_1 = arith.constant 0 : i32
    %c0_i32_2 = arith.constant 0 : i32
    return %c0_i32, %c0_i32_0, %c0_i32_1 : i32, i32, i32
  }
  func.func @transform_3(%arg0: i32) -> (i32, i32, i32) {
    %c0_i32 = arith.constant 0 : i32
    %c0_i32_0 = arith.constant 0 : i32
    %c0_i32_1 = arith.constant 0 : i32
    %c0_i32_2 = arith.constant 0 : i32
    return %c0_i32, %c0_i32_0, %c0_i32_1 : i32, i32, i32
  }
  func.func @transform_4(%arg0: i32) -> (i32, i32) {
    %c0_i32 = arith.constant 0 : i32
    %c0_i32_0 = arith.constant 0 : i32
    %c0_i32_1 = arith.constant 0 : i32
    return %c0_i32, %c0_i32_0 : i32, i32
  }
  func.func @transform_5(%arg0: i32) -> (i32, i32) {
    %c0_i32 = arith.constant 0 : i32
    %c0_i32_0 = arith.constant 0 : i32
    return %arg0, %c0_i32 : i32, i32
  }
}

</mosaic_0001>

<bundles_post_ra>
// kernel: ssdecoder_forward.1
= control target key start
LH: loop header
LB: loop body
LE: loop exit
PB: predicated region body
PF: predicated region fallthrough
CT: control target
= control target key end

     0   :  { %10 = vsyncpa [#allocation3], 0  ;;  %s7012_s18 = smov [#allocation2]   ;;  %s7760_s0 = inlined_call_operand.vmem [shape: bf16[32,128], index: 0, kind: input, shape index: {}]   ;;  %s7761_s1 = inlined_call_operand.hbm [shape: bf16[3,9,128,128], index: 1, kind: input, shape index: {}]   ;;  %s7762_s2 = inlined_call_operand.vmem [shape: f32[3,1,128], index: 2, kind: input, shape index: {}]   ;;  %s7763_s3 = inlined_call_operand.vmem [shape: bf16[9,128,128], index: 3, kind: input, shape index: {}]   ;;  %s7764_s4 = inlined_call_operand.vmem [shape: f32[1,128], index: 4, kind: input, shape index: {}]   ;;  %s7765_s5 = inlined_call_operand.vmem [shape: f32[32,128], index: 5, kind: output, shape index: {}]  }
   0x1   :  { %s18_s19 = sshll.u32 %s7012_s18, 4  ;;  %s6988_s22 = scalar_lea.hbm %s7761_s1, 27648  ;;  %s19_s19 = int_to_ptr.vmem [resolvable:$true] %s18_s19 }
   0x2   :  { %p6989_p0 = scmp.ne.s32.totalorder %s7761_s1, %s6988_s22  ;;  %p6992_p1 = scmp.lt.u32.totalorder %s6988_s22, %s7761_s1 }
   0x4   :  { %p6994_p2 = pnand %p6992_p1, %p6989_p0 }
   0x6   :  { %6997 = shalt.err (!%p6994_p2)
}
   0x7   :  { %s6998_s27 = scalar_lea.vmem %s19_s19, 27648  ;;  %p7003_p4 = scmp.lt.s32.totalorder %s19_s19, %s19_s19 }
   0x8   :  { %p6999_p3 = scmp.ne.s32.totalorder %s19_s19, %s6998_s27  ;;  %p7004_p5 = scmp.lt.s32.totalorder %s6998_s27, %s6998_s27 }
   0xa   :  { %p7005_p6 = por %p7004_p5, %p7003_p4 }
   0xc   :  { %p7006_p7 = pnand %p7005_p6, %p6999_p3 }
   0xe   :  { %7009 = shalt.err (!%p7006_p7)
}
   0xf   :  { %s7013_s28 = smov 64   ;;  %s7014_s29 = smov 4  }
  0x10   :  { %24 = dma.hbm_to_vmem [thread:$0]  %s7761_s1, 27648, %s19_s19, [#allocation3], %s7013_s28, %s7013_s28, %s7014_s29  }
  0x11   :  { %7010 = dma.done.wait [#allocation3], 27648  }
  0x12   :  { %7011 = vsyncadd [#allocation3], 4294939648  ;;  %v35_v0 = vlaneseq  ;;  %v7067_v4 = vld [vmem:[%s7760_s0] sm:$0xff]   ;;  %v7072_v5 = vld [vmem:[%s7760_s0 + $0x8] sm:$0xff]   ;;  %vm7015_vm3 = vmmov 1   ;;  %s7016_s0 = smov 8  }
  0x13   :  { %v5239_v7 = vunpack.c.l.bf16 %v7067_v4  ;;  %v5240_v8 = vunpack.c.h.bf16 %v7067_v4  ;;  %v5243_v9 = vunpack.c.l.bf16 %v7072_v5  ;;  %v5244_v10 = vunpack.c.h.bf16 %v7072_v5  ;;  %v6700_v11 = vld [vmem:[#allocation2 + $0x40] sm:$0xff]   ;;  %v6701_v12 = vld [vmem:[#allocation2 + $0x48] sm:$0xff]   ;;  %v6702_v23 = vld [vmem:[#allocation2 + $0x50] sm:$0xff]   ;;  %s7017_s1 = smov 120  }
  0x14   :  { %v7060_v1 = vshrl.u32 %v35_v0, 7  ;;  %5606 = vmatprep.subr.bf16.mxu0 %v6700_v11  ;;  %v6703_v31 = vld [vmem:[#allocation2 + $0x58] sm:$0xff]   ;;  %v6704_v35 = vld [vmem:[#allocation2 + $0x60] sm:$0xff]   ;;  %v6705_v38 = vld [vmem:[#allocation2 + $0x68] sm:$0xff]  }
  0x15   :  { %v7081_v13 = vmax.f32 %v5239_v7, 0.0  ;;  %v7085_v14 = vmax.f32 %v5240_v8, 0.0  ;;  %v7089_v15 = vmax.f32 %v5244_v10, 0.0  ;;  %v7093_v16 = vmax.f32 %v5243_v9, 0.0  ;;  %5607 = vmatpush3.bf16.msra.mxu0 %v6700_v11  ;;  %v6706_v39 = vld [vmem:[#allocation2 + $0x70] sm:$0xff]   ;;  %v6707_v40 = vld [vmem:[#allocation2 + $0x78] sm:$0xff]  }
  0x16   :  { %v38_v2 = vadd.s32 16, %v7060_v1  ;;  %v44_v3 = vand.u32 15, %v7060_v1  ;;  %vm113_vm0 = vcmp.lt.s32.totalorder %v7060_v1, 1  ;;  %5608 = vmatprep.subr.bf16.mxu0 %v6701_v12  ;;  %v6708_v42 = vld [vmem:[#allocation2] sm:$0xff]   ;;  %v6709_v44 = vld [vmem:[#allocation2 + $0x8] sm:$0xff]   ;;  %v6710_v45 = vld [vmem:[#allocation2 + $0x10] sm:$0xff]  }
  0x17   :  { %v109_v19 = vrot.slane %v7081_v13, 7  ;;  %v110_v20 = vrot.slane %v7085_v14, 7  ;;  %v112_v21 = vrot.slane %v7089_v15, 7  ;;  %v111_v22 = vrot.slane %v7093_v16, 7  ;;  %v6711_v48 = vld [vmem:[#allocation2 + $0x18] sm:$0xff]   ;;  %v6712_v61 = vld [vmem:[#allocation2 + $0x20] sm:$0xff]  }
  0x18   :  { %v58_v6 = vand.u32 15, %v38_v2  ;;  %vm7095_vm1 = vcmp.gt.s32.totalorder %v44_v3, 0  ;;  %v6480_v36 = vpack.i.bf16 %v7085_v14, %v7081_v13  ;;  %v6485_v37 = vpack.i.bf16 %v7089_v15, %v7093_v16  ;;  %v6925_v17 = vld [vmem:[%s7763_s3 + $0x8] sm:$0xff]   ;;  %v6927_v41 = vld [vmem:[%s7763_s3 + $0x18] sm:$0xff]  }
  0x19   :  { %v116_v24 = vsel %vm113_vm0, %v109_v19, %v110_v20  ;;  %v117_v25 = vsel %vm113_vm0, %v112_v21, %v109_v19  ;;  %v115_v26 = vsel %vm113_vm0, %v110_v20, %v111_v22  ;;  %vm7116_vm4 = vmpackc.low %vm7015_vm3, %vm7095_vm1  ;;  %v114_v29 = vsel %vm113_vm0, %v111_v22, %v112_v21  ;;  %5609 = vmatpush3.bf16.msra.mxu0 %v6701_v12  ;;  %v6714_v12 = vld [vmem:[#allocation2 + $0x30] sm:$0xff]   ;;  %v6715_v19 = vld [vmem:[#allocation2 + $0x38] sm:$0xff]  }
  0x1a   :  { %vm7099_vm2 = vcmp.gt.s32.totalorder %v58_v6, 0  ;;  %v126_v28 = vsel %vm7095_vm1, %v117_v25, 0.0  ;;  %v4776_v32 = vpack.c.bf16 %v116_v24, %v117_v25  ;;  %5610 = vmatprep.subr.bf16.mxu0 %v6702_v23  ;;  %v4779_v43 = vpack.c.bf16 %v114_v29, %v115_v26  ;;  %v6713_v6 = vld [vmem:[#allocation2 + $0x28] sm:$0xff]   ;;  %v6716_v20 = vld [vmem:[#allocation2 + $0x80] sm:$0xff]  }
  0x1b   :  { %v128_v30 = vsel %vm7099_vm2, %v115_v26, 0.0  ;;  %v6460_v33 = vpack.i.bf16 %v116_v24, %v126_v28  ;;  %vm7143_vm5 = vmpackc.low %vm7015_vm3, %vm7099_vm2  ;;  %v37_v46 = vadd.s32 8, %v7060_v1  ;;  %vm877_vm6 = vcmp.lt.s32.totalorder %v7060_v1, 7 }
  0x1c   :  { %5622 = vmatprep.mubr.msk.bf16.mxu0 %vm7116_vm4, %v4776_v32  ;;  %v6465_v34 = vpack.i.bf16 %v114_v29, %v128_v30  ;;  %v39_v47 = vadd.s32 24, %v7060_v1  ;;  %v874_v50 = vrot.slane %v7085_v14, 1  ;;  %v875_v51 = vrot.slane %v7093_v16, 1  ;;  %v6717_v32 = vld [vmem:[#allocation2 + $0x88] sm:$0xff]  }
  0x1d   :  { %6461 = vrot.lane.b32.xlu0 %v6460_v33, %s7016_s0  ;;  %6471 = vrot.lane.b32.xlu1 %v6460_v33, %s7017_s1  ;;  %v51_v49 = vand.u32 15, %v37_v46  ;;  %v873_v52 = vrot.slane %v7081_v13, 1  ;;  %v876_v54 = vrot.slane %v7089_v15, 1  ;;  %v6724_v46 = vld [vmem:[#allocation2 + $0xc0] sm:$0xff]  }
  0x1e   :  { %5611 = vmatpush3.bf16.msra.mxu0 %v6702_v23  ;;  %v65_v53 = vand.u32 15, %v39_v47  ;;  %v7162_v56 = vsel %vm877_vm6, %v874_v50, %v875_v51 }
  0x1f   :  { %5612 = vmatprep.subr.bf16.mxu0 %v6703_v31  ;;  %vm7156_vm7 = vcmp.lt.s32.totalorder %v51_v49, 15  ;;  %v7166_v57 = vsel %vm877_vm6, %v873_v52, %v874_v50  ;;  %v7177_v60 = vsel %vm877_vm6, %v876_v54, %v873_v52  ;;  %v7184_v0 = vsel %vm877_vm6, %v875_v51, %v876_v54  ;;  %v6725_v50 = vld [vmem:[#allocation2 + $0xc8] sm:$0xff]   ;;  %v6726_v52 = vld [vmem:[#allocation2 + $0xd0] sm:$0xff]   ;;  %v6728_v54 = vld [vmem:[#allocation2 + $0xe0] sm:$0xff]  }
  0x20   :  { %v891_v58 = vsel %vm7156_vm7, %v7162_v56, 0.0  ;;  %vm7171_vm8 = vcmp.lt.s32.totalorder %v65_v53, 15  ;;  %v4838_v63 = vpack.c.bf16 %v7162_v56, %v7166_v57  ;;  %v4841_v11 = vpack.c.bf16 %v7177_v60, %v7184_v0  ;;  %v6727_v53 = vld [vmem:[#allocation2 + $0xd8] sm:$0xff]   ;;  %vm7203_vm9 = vmpackc.low %vm7156_vm7, %vm7015_vm3 }
  0x21   :  { %6466 = vrot.lane.b32.xlu0 %v6465_v34, %s7016_s0  ;;  %6476 = vrot.lane.b32.xlu1 %v6465_v34, %s7017_s1  ;;  %v6500_v62 = vpack.i.bf16 %v891_v58, %v7166_v57  ;;  %v893_v2 = vsel %vm7171_vm8, %v7177_v60, 0.0  ;;  %v6729_v58 = vld [vmem:[#allocation2 + $0xe8] sm:$0xff]   ;;  %v6763_v56 = vld [vmem:[#allocation2 + $0x1f8] sm:$0xff]   ;;  %vm7215_vm10 = vmpackc.low %vm7171_vm8, %vm7015_vm3 }
  0x22   :  { %5613 = vmatpush3.bf16.msra.mxu0 %v6703_v31  ;;  %v6505_v3 = vpack.i.bf16 %v893_v2, %v7184_v0  ;;  %v6731_v2 = vld [vmem:[#allocation2 + $0xf8] sm:$0xff]  }
  0x23   :  { %5614 = vmatprep.subr.bf16.mxu0 %v6704_v35  ;;  %v6771_v0 = vld [vmem:[#allocation2 + $0x238] sm:$0xff]  }
  0x25   :  { %6481 = vrot.lane.b32.xlu0 %v6480_v36, %s7016_s0  ;;  %6486 = vrot.lane.b32.xlu1 %v6485_v37, %s7016_s0 }
  0x26   :  { %5615 = vmatpush3.bf16.msra.mxu0 %v6704_v35  ;;  %v6718_v35 = vld [vmem:[#allocation2 + $0x90] sm:$0xff]  }
  0x27   :  { %5616 = vmatprep.subr.bf16.mxu0 %v6705_v38 }
  0x29   :  { %6491 = vrot.lane.b32.xlu0 %v6480_v36, %s7017_s1  ;;  %6496 = vrot.lane.b32.xlu1 %v6485_v37, %s7017_s1  ;;  %v6719_v36 = vld [vmem:[#allocation2 + $0x98] sm:$0xff]   ;;  %v6720_v37 = vld [vmem:[#allocation2 + $0xa0] sm:$0xff]  }
  0x2a   :  { %5617 = vmatpush3.bf16.msra.mxu0 %v6705_v38  ;;  %v6721_v38 = vld [vmem:[#allocation2 + $0xa8] sm:$0xff]  }
  0x2b   :  { %5618 = vmatprep.subr.bf16.mxu0 %v6706_v39 }
  0x2d   :  { %6501 = vrot.lane.b32.xlu0 %v6500_v62, %s7016_s0  ;;  %6506 = vrot.lane.b32.xlu1 %v6505_v3, %s7016_s0 }
  0x2e   :  { %5619 = vmatpush3.bf16.msra.mxu0 %v6706_v39  ;;  %v6722_v39 = vld [vmem:[#allocation2 + $0xb0] sm:$0xff]  }
  0x2f   :  { %5620 = vmatprep.subr.bf16.mxu0 %v6707_v40 }
  0x31   :  { %6511 = vrot.lane.b32.xlu0 %v6500_v62, %s7017_s1  ;;  %6516 = vrot.lane.b32.xlu1 %v6505_v3, %s7017_s1 }
  0x32   :  { %5621 = vmatpush3.bf16.msra.mxu0 %v6707_v40 }
  0x33   :  { %5626 = vmatprep.subr.bf16.mxu0 %v6708_v42 }
  0x35   :  { %5623 = vmatmul.mubr.msk.bf16.vlgmr.msra.gmra.mrb[0].mxu0 %vm7143_vm5, %v4779_v43 }
  0x36   :  { %5627 = vmatpush3.bf16.msra.mxu0 %v6708_v42  ;;  %v6723_v42 = vld [vmem:[#allocation2 + $0xb8] sm:$0xff]  }
  0x37   :  { %5628 = vmatprep.subr.bf16.mxu0 %v6709_v44 }
  0x3a   :  { %5629 = vmatpush3.bf16.msra.mxu0 %v6709_v44 }
  0x3b   :  { %5630 = vmatprep.subr.bf16.mxu0 %v6710_v45 }
  0x3e   :  { %5631 = vmatpush3.bf16.msra.mxu0 %v6710_v45 }
  0x3f   :  { %5632 = vmatprep.subr.bf16.mxu0 %v6711_v48 }
  0x42   :  { %5633 = vmatpush3.bf16.msra.mxu0 %v6711_v48 }
  0x43   :  { %5634 = vmatprep.subr.bf16.mxu0 %v6712_v61 }
  0x46   :  { %5635 = vmatpush3.bf16.msra.mxu0 %v6712_v61  ;;  %v6730_v61 = vld [vmem:[#allocation2 + $0xf0] sm:$0xff]  }
  0x47   :  { %5636 = vmatprep.subr.bf16.mxu0 %v6713_v6 }
  0x4a   :  { %5637 = vmatpush3.bf16.msra.mxu0 %v6713_v6 }
  0x4b   :  { %5638 = vmatprep.subr.bf16.mxu0 %v6714_v12 }
  0x4e   :  { %5639 = vmatpush3.bf16.msra.mxu0 %v6714_v12  ;;  %v6732_v12 = vld [vmem:[#allocation2 + $0x100] sm:$0xff]  }
  0x4f   :  { %5640 = vmatprep.subr.bf16.mxu0 %v6715_v19 }
  0x52   :  { %5641 = vmatpush3.bf16.msra.mxu0 %v6715_v19 }
  0x53   :  { %5646 = vmatprep.subr.bf16.mxu0 %v6716_v20 }
  0x8f   :  { %v6462_v21 = vpop.permute.xlu0 %6461  ;;  %v6472_v22 = vpop.permute.xlu1 %6471 }
  0x90   :  { %v6464_v23 = vunpack.i.h.bf16 %v6462_v21  ;;  %v6463_v24 = vunpack.i.l.bf16 %v6462_v21  ;;  %v6474_v25 = vunpack.i.h.bf16 %v6472_v22  ;;  %v6473_v26 = vunpack.i.l.bf16 %v6472_v22  ;;  %v6733_v21 = vld [vmem:[#allocation2 + $0x108] sm:$0xff]   ;;  %v6734_v22 = vld [vmem:[#allocation2 + $0x110] sm:$0xff]  }
  0x92   :  { %v138_v28 = vpack.c.bf16 %v6464_v23, %v6463_v24  ;;  %v377_v33 = vpack.c.bf16 %v6474_v25, %v6473_v26  ;;  %v6735_v23 = vld [vmem:[#allocation2 + $0x118] sm:$0xff]   ;;  %v6736_v24 = vld [vmem:[#allocation2 + $0x120] sm:$0xff]   ;;  %v6737_v25 = vld [vmem:[#allocation2 + $0x128] sm:$0xff]  }
  0x93   :  { %v6467_v29 = vpop.permute.xlu0 %6466  ;;  %v6477_v40 = vpop.permute.xlu1 %6476  ;;  %v6738_v26 = vld [vmem:[#allocation2 + $0x130] sm:$0xff]  }
  0x94   :  { %v6469_v30 = vunpack.i.h.bf16 %v6467_v29  ;;  %v6468_v31 = vunpack.i.l.bf16 %v6467_v29  ;;  %5642 = vmatprep.mubr.bf16.mxu0 %v138_v28  ;;  %v6479_v44 = vunpack.i.h.bf16 %v6477_v40  ;;  %v6478_v45 = vunpack.i.l.bf16 %v6477_v40  ;;  %v6745_v40 = vld [vmem:[#allocation2 + $0x168] sm:$0xff]  }
  0x96   :  { %v139_v34 = vpack.c.bf16 %v6469_v30, %v6468_v31  ;;  %v378_v49 = vpack.c.bf16 %v6479_v44, %v6478_v45  ;;  %v6740_v30 = vld [vmem:[#allocation2 + $0x140] sm:$0xff]   ;;  %v626_v31 = vpack.c.bf16 %v7089_v15, %v7093_v16  ;;  %v6775_v15 = vld [vmem:[#allocation2 + $0x298] sm:$0xff]  }
  0x97   :  { %v6482_v43 = vpop.permute.xlu0 %6481  ;;  %v6487_v62 = vpop.permute.xlu1 %6486  ;;  %v6744_v16 = vld [vmem:[#allocation2 + $0x160] sm:$0xff]   ;;  %v6747_v44 = vld [vmem:[#allocation2 + $0x178] sm:$0xff]  }
  0x98   :  { %5643 = vmatmul.mubr.bf16.vlgmr.msra.gmra.mrb[0].mxu0 %v139_v34  ;;  %v6484_v47 = vunpack.i.h.bf16 %v6482_v43  ;;  %v6483_v48 = vunpack.i.l.bf16 %v6482_v43  ;;  %v6489_v3 = vunpack.i.h.bf16 %v6487_v62  ;;  %v6488_v6 = vunpack.i.l.bf16 %v6487_v62  ;;  %v6772_v34 = vld [vmem:[#allocation2 + $0x280] sm:$0xff]   ;;  %v6753_v62 = vld [vmem:[#allocation2 + $0x1a8] sm:$0xff]  }
  0x99   :  { %5647 = vmatpush3.bf16.msra.mxu0 %v6716_v20  ;;  %5662 = vmatprep.mubr.bf16.mxu0 %v377_v33  ;;  %v625_v20 = vpack.c.bf16 %v7085_v14, %v7081_v13  ;;  %v6739_v13 = vld [vmem:[#allocation2 + $0x138] sm:$0xff]   ;;  %v6741_v33 = vld [vmem:[#allocation2 + $0x148] sm:$0xff]  }
  0x9a   :  { %5648 = vmatprep.subr.bf16.mxu0 %v6717_v32  ;;  %v505_v51 = vpack.c.bf16 %v6484_v47, %v6483_v48  ;;  %v506_v19 = vpack.c.bf16 %v6489_v3, %v6488_v6  ;;  %5786 = vmatprep.subr.bf16.mxu1 %v6772_v34  ;;  %v6755_v6 = vld [vmem:[#allocation2 + $0x1b8] sm:$0xff]  }
  0x9b   :  { %v6492_v14 = vpop.permute.xlu0 %6491  ;;  %5787 = vmatpush3.bf16.msra.mxu1 %v6772_v34  ;;  %v6497_v43 = vpop.permute.xlu1 %6496  ;;  %v6767_v34 = vld [vmem:[#allocation2 + $0x218] sm:$0xff]  }
  0x9c   :  { %v6494_v28 = vunpack.i.h.bf16 %v6492_v14  ;;  %v6493_v29 = vunpack.i.l.bf16 %v6492_v14  ;;  %v6498_v47 = vunpack.i.l.bf16 %v6497_v43  ;;  %v6762_v14 = vld [vmem:[#allocation2 + $0x1f0] sm:$0xff]  }
  0x9d   :  { %5649 = vmatpush3.bf16.msra.mxu0 %v6717_v32 }
  0x9e   :  { %5650 = vmatprep.subr.bf16.mxu0 %v6718_v35  ;;  %v753_v32 = vpack.c.bf16 %v6494_v28, %v6493_v29  ;;  %v6764_v29 = vld [vmem:[#allocation2 + $0x200] sm:$0xff]  }
  0x9f   :  { %v6502_v45 = vpop.permute.xlu0 %6501  ;;  %v6507_v3 = vpop.permute.xlu1 %6506 }
  0xa0   :  { %v6504_v48 = vunpack.i.h.bf16 %v6502_v45 }
  0xa1   :  { %5651 = vmatpush3.bf16.msra.mxu0 %v6718_v35  ;;  %v6773_v35 = vld [vmem:[#allocation2 + $0x288] sm:$0xff]  }
  0xa2   :  { %5652 = vmatprep.subr.bf16.mxu0 %v6719_v36  ;;  %5788 = vmatprep.subr.bf16.mxu1 %v6773_v35 }
  0xa3   :  { %5789 = vmatpush3.bf16.msra.mxu1 %v6773_v35  ;;  %v6512_v57 = vpop.permute.xlu0 %6511  ;;  %v6768_v35 = vld [vmem:[#allocation2 + $0x220] sm:$0xff]   ;;  %v6517_v60 = vpop.permute.xlu1 %6516 }
  0xa4   :  { %v6513_v28 = vunpack.i.l.bf16 %v6512_v57 }
  0xa5   :  { %5653 = vmatpush3.bf16.msra.mxu0 %v6719_v36  ;;  %v6742_v36 = vld [vmem:[#allocation2 + $0x150] sm:$0xff]  }
  0xa6   :  { %5654 = vmatprep.subr.bf16.mxu0 %v6720_v37 }
  0xa9   :  { %5655 = vmatpush3.bf16.msra.mxu0 %v6720_v37  ;;  %v6774_v37 = vld [vmem:[#allocation2 + $0x290] sm:$0xff]  }
  0xaa   :  { %5656 = vmatprep.subr.bf16.mxu0 %v6721_v38  ;;  %5790 = vmatprep.subr.bf16.mxu1 %v6774_v37 }
  0xab   :  { %5791 = vmatpush3.bf16.msra.mxu1 %v6774_v37  ;;  %v6770_v37 = vld [vmem:[#allocation2 + $0x230] sm:$0xff]  }
  0xac   :  { %5792 = vmatprep.subr.bf16.mxu1 %v6775_v15 }
  0xad   :  { %5657 = vmatpush3.bf16.msra.mxu0 %v6721_v38  ;;  %v6743_v38 = vld [vmem:[#allocation2 + $0x158] sm:$0xff]  }
  0xae   :  { %5658 = vmatprep.subr.bf16.mxu0 %v6722_v39 }
  0xaf   :  { %5793 = vmatpush3.bf16.msra.mxu1 %v6775_v15 }
  0xb1   :  { %5659 = vmatpush3.bf16.msra.mxu0 %v6722_v39  ;;  %v6776_v39 = vld [vmem:[#allocation2 + $0x2a0] sm:$0xff]  }
  0xb2   :  { %5660 = vmatprep.subr.bf16.mxu0 %v6723_v42  ;;  %5794 = vmatprep.subr.bf16.mxu1 %v6776_v39 }
  0xb3   :  { %5795 = vmatpush3.bf16.msra.mxu1 %v6776_v39  ;;  %v6778_v39 = vld [vmem:[#allocation2 + $0x2b0] sm:$0xff]  }
  0xb5   :  { %5661 = vmatpush3.bf16.msra.mxu0 %v6723_v42  ;;  %v6746_v42 = vld [vmem:[#allocation2 + $0x170] sm:$0xff]  }
  0xb6   :  { %5666 = vmatprep.subr.bf16.mxu0 %v6724_v46 }
  0xb8   :  { %5663 = vmatmul.mubr.bf16.vlgmr.msra.gmra.mrb[0].mxu0 %v378_v49  ;;  %v6503_v49 = vunpack.i.l.bf16 %v6502_v45 }
  0xb9   :  { %5667 = vmatpush3.bf16.msra.mxu0 %v6724_v46  ;;  %5682 = vmatprep.mubr.bf16.mxu0 %v505_v51  ;;  %v6499_v46 = vunpack.i.h.bf16 %v6497_v43  ;;  %v4851_v43 = vld [vmem:[%s7762_s2] ss:$0 sm:$0xff] }
  0xba   :  { %5668 = vmatprep.subr.bf16.mxu0 %v6725_v50 }
  0xbb   :  { %v754_v51 = vpack.c.bf16 %v6499_v46, %v6498_v47 }
  0xbd   :  { %5669 = vmatpush3.bf16.msra.mxu0 %v6725_v50  ;;  %v6748_v50 = vld [vmem:[#allocation2 + $0x180] sm:$0xff]  }
  0xbe   :  { %5670 = vmatprep.subr.bf16.mxu0 %v6726_v52 }
  0xc1   :  { %5671 = vmatpush3.bf16.msra.mxu0 %v6726_v52  ;;  %v902_v52 = vpack.c.bf16 %v6504_v48, %v6503_v49 }
  0xc2   :  { %5672 = vmatprep.subr.bf16.mxu0 %v6727_v53 }
  0xc5   :  { %5673 = vmatpush3.bf16.msra.mxu0 %v6727_v53  ;;  %v6749_v53 = vld [vmem:[#allocation2 + $0x188] sm:$0xff]  }
  0xc6   :  { %5674 = vmatprep.subr.bf16.mxu0 %v6728_v54 }
  0xc9   :  { %5675 = vmatpush3.bf16.msra.mxu0 %v6728_v54  ;;  %v6750_v54 = vld [vmem:[#allocation2 + $0x190] sm:$0xff]  }
  0xca   :  { %5676 = vmatprep.subr.bf16.mxu0 %v6729_v58 }
  0xcd   :  { %5677 = vmatpush3.bf16.msra.mxu0 %v6729_v58  ;;  %v6751_v58 = vld [vmem:[#allocation2 + $0x198] sm:$0xff]  }
  0xce   :  { %5678 = vmatprep.subr.bf16.mxu0 %v6730_v61 }
  0xd1   :  { %5679 = vmatpush3.bf16.msra.mxu0 %v6730_v61  ;;  %v6752_v61 = vld [vmem:[#allocation2 + $0x1a0] sm:$0xff]  }
  0xd2   :  { %5680 = vmatprep.subr.bf16.mxu0 %v6731_v2 }
  0xd5   :  { %5681 = vmatpush3.bf16.msra.mxu0 %v6731_v2  ;;  %v6754_v2 = vld [vmem:[#allocation2 + $0x1b0] sm:$0xff]  }
  0xd6   :  { %5686 = vmatprep.subr.bf16.mxu0 %v6732_v12 }
  0xd8   :  { %5683 = vmatmul.mubr.bf16.vlgmr.msra.gmra.mrb[0].mxu0 %v506_v19  ;;  %v6508_v19 = vunpack.i.l.bf16 %v6507_v3 }
  0xd9   :  { %5687 = vmatpush3.bf16.msra.mxu0 %v6732_v12  ;;  %5702 = vmatprep.mubr.bf16.mxu0 %v625_v20  ;;  %v6509_v12 = vunpack.i.h.bf16 %v6507_v3  ;;  %v6756_v20 = vld [vmem:[#allocation2 + $0x1c0] sm:$0xff]  }
  0xda   :  { %5688 = vmatprep.subr.bf16.mxu0 %v6733_v21 }
  0xdd   :  { %5689 = vmatpush3.bf16.msra.mxu0 %v6733_v21  ;;  %v903_v21 = vpack.c.bf16 %v6509_v12, %v6508_v19 }
  0xde   :  { %5690 = vmatprep.subr.bf16.mxu0 %v6734_v22 }
  0xe1   :  { %5691 = vmatpush3.bf16.msra.mxu0 %v6734_v22  ;;  %v6757_v22 = vld [vmem:[#allocation2 + $0x1c8] sm:$0xff]  }
  0xe2   :  { %5692 = vmatprep.subr.bf16.mxu0 %v6735_v23 }
  0xe5   :  { %5693 = vmatpush3.bf16.msra.mxu0 %v6735_v23  ;;  %v6977_v23 = vld [vmem:[%s7763_s3 + $0x1e8] sm:$0xff]  }
  0xe6   :  { %5694 = vmatprep.subr.bf16.mxu0 %v6736_v24 }
  0xe9   :  { %5695 = vmatpush3.bf16.msra.mxu0 %v6736_v24  ;;  %v6758_v24 = vld [vmem:[#allocation2 + $0x1d0] sm:$0xff]  }
  0xea   :  { %5696 = vmatprep.subr.bf16.mxu0 %v6737_v25 }
  0xed   :  { %5697 = vmatpush3.bf16.msra.mxu0 %v6737_v25  ;;  %v6759_v25 = vld [vmem:[#allocation2 + $0x1d8] sm:$0xff]  }
  0xee   :  { %5698 = vmatprep.subr.bf16.mxu0 %v6738_v26 }
  0xf1   :  { %5699 = vmatpush3.bf16.msra.mxu0 %v6738_v26  ;;  %v6760_v26 = vld [vmem:[#allocation2 + $0x1e0] sm:$0xff]  }
  0xf2   :  { %5700 = vmatprep.subr.bf16.mxu0 %v6739_v13 }
  0xf5   :  { %5701 = vmatpush3.bf16.msra.mxu0 %v6739_v13  ;;  %v6761_v13 = vld [vmem:[#allocation2 + $0x1e8] sm:$0xff]  }
  0xf6   :  { %5706 = vmatprep.subr.bf16.mxu0 %v6740_v30 }
  0xf8   :  { %5703 = vmatmul.mubr.bf16.vlgmr.msra.gmra.mrb[0].mxu0 %v626_v31 }
  0xf9   :  { %5707 = vmatpush3.bf16.msra.mxu0 %v6740_v30  ;;  %5722 = vmatprep.mubr.bf16.mxu0 %v753_v32  ;;  %v6765_v32 = vld [vmem:[#allocation2 + $0x208] sm:$0xff]   ;;  %v6984_v30 = vld [vmem:[%s7763_s3 + $0x220] sm:$0xff]  }
  0xfa   :  { %5708 = vmatprep.subr.bf16.mxu0 %v6741_v33 }
  0xfd   :  { %5709 = vmatpush3.bf16.msra.mxu0 %v6741_v33  ;;  %v6766_v33 = vld [vmem:[#allocation2 + $0x210] sm:$0xff]  }
  0xfe   :  { %5710 = vmatprep.subr.bf16.mxu0 %v6742_v36 }
 0x101   :  { %5711 = vmatpush3.bf16.msra.mxu0 %v6742_v36  ;;  %v6769_v36 = vld [vmem:[#allocation2 + $0x228] sm:$0xff]  }
 0x102   :  { %5712 = vmatprep.subr.bf16.mxu0 %v6743_v38 }
 0x105   :  { %5713 = vmatpush3.bf16.msra.mxu0 %v6743_v38  ;;  %v6518_v38 = vunpack.i.l.bf16 %v6517_v60 }
 0x106   :  { %5714 = vmatprep.subr.bf16.mxu0 %v6744_v16 }
 0x109   :  { %5715 = vmatpush3.bf16.msra.mxu0 %v6744_v16  ;;  %v6777_v16 = vld [vmem:[#allocation2 + $0x2a8] sm:$0xff]  }
 0x10a   :  { %5716 = vmatprep.subr.bf16.mxu0 %v6745_v40  ;;  %5796 = vmatprep.subr.bf16.mxu1 %v6777_v16 }
 0x10b   :  { %5797 = vmatpush3.bf16.msra.mxu1 %v6777_v16 }
 0x10c   :  { %5798 = vmatprep.subr.bf16.mxu1 %v6778_v39 }
 0x10d   :  { %5717 = vmatpush3.bf16.msra.mxu0 %v6745_v40  ;;  %v6779_v40 = vld [vmem:[#allocation2 + $0x2b8] sm:$0xff]  }
 0x10e   :  { %5718 = vmatprep.subr.bf16.mxu0 %v6746_v42 }
 0x10f   :  { %5799 = vmatpush3.bf16.msra.mxu1 %v6778_v39  ;;  %v6782_v39 = vld [vmem:[#allocation2 + $0x250] sm:$0xff]  }
 0x110   :  { %5800 = vmatprep.subr.bf16.mxu1 %v6779_v40 }
 0x111   :  { %5719 = vmatpush3.bf16.msra.mxu0 %v6746_v42  ;;  %v6780_v42 = vld [vmem:[#allocation2 + $0x240] sm:$0xff]  }
 0x112   :  { %5720 = vmatprep.subr.bf16.mxu0 %v6747_v44 }
 0x113   :  { %5801 = vmatpush3.bf16.msra.mxu1 %v6779_v40  ;;  %v6783_v40 = vld [vmem:[#allocation2 + $0x258] sm:$0xff]  }
 0x114   :  { %5806 = vmatprep.subr.bf16.mxu1 %v6780_v42 }
 0x115   :  { %5721 = vmatpush3.bf16.msra.mxu0 %v6747_v44 }
 0x116   :  { %5726 = vmatprep.subr.bf16.mxu0 %v6748_v50 }
 0x118   :  { %5723 = vmatmul.mubr.bf16.vlgmr.msra.gmra.mrb[0].mxu0 %v754_v51 }
 0x119   :  { %5727 = vmatpush3.bf16.msra.mxu0 %v6748_v50  ;;  %5742 = vmatprep.mubr.bf16.mxu0 %v902_v52 }
 0x11a   :  { %5728 = vmatprep.subr.bf16.mxu0 %v6749_v53 }
 0x11d   :  { %5729 = vmatpush3.bf16.msra.mxu0 %v6749_v53 }
 0x11e   :  { %5730 = vmatprep.subr.bf16.mxu0 %v6750_v54 }
 0x121   :  { %5731 = vmatpush3.bf16.msra.mxu0 %v6750_v54 }
 0x122   :  { %5732 = vmatprep.subr.bf16.mxu0 %v6751_v58 }
 0x125   :  { %5733 = vmatpush3.bf16.msra.mxu0 %v6751_v58 }
 0x126   :  { %5734 = vmatprep.subr.bf16.mxu0 %v6752_v61 }
 0x129   :  { %5735 = vmatpush3.bf16.msra.mxu0 %v6752_v61 }
 0x12a   :  { %5736 = vmatprep.subr.bf16.mxu0 %v6753_v62 }
 0x12d   :  { %5737 = vmatpush3.bf16.msra.mxu0 %v6753_v62 }
 0x12e   :  { %5738 = vmatprep.subr.bf16.mxu0 %v6754_v2 }
 0x131   :  { %5739 = vmatpush3.bf16.msra.mxu0 %v6754_v2 }
 0x132   :  { %5740 = vmatprep.subr.bf16.mxu0 %v6755_v6 }
 0x135   :  { %5741 = vmatpush3.bf16.msra.mxu0 %v6755_v6 }
 0x136   :  { %5746 = vmatprep.subr.bf16.mxu0 %v6756_v20 }
 0x138   :  { %5743 = vmatmul.mubr.bf16.vlgmr.msra.gmra.mrb[0].mxu0 %v903_v21 }
 0x139   :  { %5747 = vmatpush3.bf16.msra.mxu0 %v6756_v20  ;;  %5762 = vmatprep.mubr.msk.bf16.mxu0 %vm7203_vm9, %v4838_v63  ;;  %v6514_v63 = vunpack.i.h.bf16 %v6512_v57 }
 0x13a   :  { %5748 = vmatprep.subr.bf16.mxu0 %v6757_v22 }
 0x13b   :  { %v1150_v31 = vpack.c.bf16 %v6514_v63, %v6513_v28 }
 0x13d   :  { %5749 = vmatpush3.bf16.msra.mxu0 %v6757_v22 }
 0x13e   :  { %5750 = vmatprep.subr.bf16.mxu0 %v6758_v24 }
 0x141   :  { %5751 = vmatpush3.bf16.msra.mxu0 %v6758_v24 }
 0x142   :  { %5752 = vmatprep.subr.bf16.mxu0 %v6759_v25 }
 0x145   :  { %5753 = vmatpush3.bf16.msra.mxu0 %v6759_v25 }
 0x146   :  { %5754 = vmatprep.subr.bf16.mxu0 %v6760_v26 }
 0x149   :  { %5755 = vmatpush3.bf16.msra.mxu0 %v6760_v26 }
 0x14a   :  { %5756 = vmatprep.subr.bf16.mxu0 %v6761_v13 }
 0x14d   :  { %5757 = vmatpush3.bf16.msra.mxu0 %v6761_v13 }
 0x14e   :  { %5758 = vmatprep.subr.bf16.mxu0 %v6762_v14 }
 0x151   :  { %5759 = vmatpush3.bf16.msra.mxu0 %v6762_v14 }
 0x152   :  { %5760 = vmatprep.subr.bf16.mxu0 %v6763_v56 }
 0x155   :  { %5761 = vmatpush3.bf16.msra.mxu0 %v6763_v56 }
 0x156   :  { %5766 = vmatprep.subr.bf16.mxu0 %v6764_v29 }
 0x158   :  { %5763 = vmatmul.mubr.msk.bf16.vlgmr.msra.gmra.mrb[0].mxu0 %vm7215_vm10, %v4841_v11  ;;  %v6519_v11 = vunpack.i.h.bf16 %v6517_v60 }
 0x159   :  { %5767 = vmatpush3.bf16.msra.mxu0 %v6764_v29  ;;  %5782 = vmatprep.mubr.bf16.mxu0 %v1150_v31 }
 0x15a   :  { %5768 = vmatprep.subr.bf16.mxu0 %v6765_v32  ;;  %v1151_v15 = vpack.c.bf16 %v6519_v11, %v6518_v38 }
 0x15d   :  { %5769 = vmatpush3.bf16.msra.mxu0 %v6765_v32 }
 0x15e   :  { %5770 = vmatprep.subr.bf16.mxu0 %v6766_v33 }
 0x161   :  { %5771 = vmatpush3.bf16.msra.mxu0 %v6766_v33 }
 0x162   :  { %5772 = vmatprep.subr.bf16.mxu0 %v6767_v34 }
 0x165   :  { %5773 = vmatpush3.bf16.msra.mxu0 %v6767_v34 }
 0x166   :  { %5774 = vmatprep.subr.bf16.mxu0 %v6768_v35 }
 0x169   :  { %5775 = vmatpush3.bf16.msra.mxu0 %v6768_v35  ;;  %v6781_v35 = vld [vmem:[#allocation2 + $0x248] sm:$0xff]  }
 0x16a   :  { %5776 = vmatprep.subr.bf16.mxu0 %v6769_v36 }
 0x16d   :  { %5777 = vmatpush3.bf16.msra.mxu0 %v6769_v36 }
 0x16e   :  { %5778 = vmatprep.subr.bf16.mxu0 %v6770_v37 }
 0x171   :  { %5779 = vmatpush3.bf16.msra.mxu0 %v6770_v37 }
 0x172   :  { %5780 = vmatprep.subr.bf16.mxu0 %v6771_v0 }
 0x175   :  { %5781 = vmatpush3.bf16.msra.mxu0 %v6771_v0 }
 0x178   :  { %5783 = vmatmul.mubr.bf16.vlgmr.msra.gmra.mrb[0].mxu0 %v1151_v15 }
 0x24b   :  { %v5784_v44 = vpop.f32.mrb[0].mxu0 }
 0x24c   :  { %v1278_v45 = vadd.f32 %v5784_v44, %v4851_v43  ;;  %v1251_v46 = vpop.f32.mrb[1].mxu0  ;;  %v6786_v44 = vld [vmem:[#allocation2 + $0x270] sm:$0xff]  }
 0x24d   :  { %v1276_v47 = vadd.f32 %v4851_v43, %v1251_v46  ;;  %v5785_v48 = vpop.f32.mrb[2].mxu0  ;;  %v6788_v46 = vld [vmem:[#allocation2 + $0x2c0] sm:$0xff]  }
 0x24e   :  { %v7227_v49 = vmax.f32 %v1278_v45, 0.0  ;;  %v1279_v50 = vadd.f32 %v5785_v48, %v4851_v43  ;;  %v1254_v51 = vpop.f32.mrb[3].mxu0  ;;  %v6787_v45 = vld [vmem:[#allocation2 + $0x278] sm:$0xff]  }
 0x24f   :  { %v7229_v52 = vmax.f32 %v1276_v47, 0.0  ;;  %v1277_v53 = vadd.f32 %v4851_v43, %v1254_v51  ;;  %v6785_v43 = vld [vmem:[#allocation2 + $0x268] sm:$0xff]  }
 0x250   :  { %v7231_v54 = vmax.f32 %v1279_v50, 0.0  ;;  %v1288_v58 = vrot.slane %v7227_v49, 7  ;;  %v2044_v3 = vrot.slane %v7227_v49, 1 }
 0x251   :  { %v7234_v61 = vmax.f32 %v1277_v53, 0.0  ;;  %v1286_v62 = vrot.slane %v7229_v52, 7  ;;  %v2042_v2 = vrot.slane %v7229_v52, 1 }
 0x252   :  { %v1289_v6 = vrot.slane %v7231_v54, 7  ;;  %v6545_v12 = vpack.i.bf16 %v7231_v54, %v7227_v49  ;;  %v2045_v19 = vrot.slane %v7231_v54, 1  ;;  %v1795_v16 = vpack.c.bf16 %v7231_v54, %v7227_v49  ;;  %v6816_v49 = vld [vmem:[#allocation2 + $0x3a0] sm:$0xff]  }
 0x253   :  { %v1287_v20 = vrot.slane %v7234_v61, 7  ;;  %v6540_v21 = vpack.i.bf16 %v7234_v61, %v7229_v52  ;;  %v2043_v22 = vrot.slane %v7234_v61, 1  ;;  %v1794_v15 = vpack.c.bf16 %v7234_v61, %v7229_v52  ;;  %v6812_v52 = vld [vmem:[#allocation2 + $0x380] sm:$0xff]  }
 0x254   :  { %v1293_v24 = vsel %vm113_vm0, %v1289_v6, %v1286_v62  ;;  %v1290_v25 = vsel %vm113_vm0, %v1288_v58, %v1289_v6  ;;  %v7253_v26 = vsel %vm877_vm6, %v2044_v3, %v2045_v19  ;;  %v7257_v13 = vsel %vm877_vm6, %v2045_v19, %v2042_v2  ;;  %v6789_v6 = vld [vmem:[#allocation2 + $0x2c8] sm:$0xff]   ;;  %v6848_v54 = vld [vmem:[#allocation2 + $0x4e0] sm:$0xff]  }
 0x255   :  { %v1292_v14 = vsel %vm113_vm0, %v1286_v62, %v1287_v20  ;;  %v1294_v56 = vsel %vm7095_vm1, %v1293_v24, 0.0  ;;  %v1291_v57 = vsel %vm113_vm0, %v1287_v20, %v1288_v58  ;;  %v7267_v63 = vsel %vm877_vm6, %v2043_v22, %v2044_v3 }
 0x256   :  { %v6520_v28 = vpack.i.bf16 %v1292_v14, %v1294_v56  ;;  %v4862_v29 = vpack.c.bf16 %v1292_v14, %v1293_v24  ;;  %v4865_v31 = vpack.c.bf16 %v1290_v25, %v1291_v57  ;;  %v1296_v32 = vsel %vm7099_vm2, %v1291_v57, 0.0  ;;  %v6792_v24 = vld [vmem:[#allocation2 + $0x2e0] sm:$0xff]   ;;  %v6794_v14 = vld [vmem:[#allocation2 + $0x2f0] sm:$0xff]   ;;  %v6795_v56 = vld [vmem:[#allocation2 + $0x2f8] sm:$0xff]  }
 0x257   :  { %v6525_v33 = vpack.i.bf16 %v1290_v25, %v1296_v32  ;;  %v7273_v34 = vsel %vm877_vm6, %v2042_v2, %v2043_v22  ;;  %v2051_v36 = vsel %vm7156_vm7, %v7267_v63, 0.0  ;;  %v2053_v60 = vsel %vm7171_vm8, %v7257_v13, 0.0  ;;  %v6791_v22 = vld [vmem:[#allocation2 + $0x2d8] sm:$0xff]   ;;  %v6793_v25 = vld [vmem:[#allocation2 + $0x2e8] sm:$0xff]   ;;  %v6796_v32 = vld [vmem:[#allocation2 + $0x300] sm:$0xff]  }
 0x258   :  { %6521 = vrot.lane.b32.xlu0 %v6520_v28, %s7016_s0  ;;  %5802 = vmatprep.mubr.msk.bf16.mxu1 %vm7116_vm4, %v4862_v29  ;;  %v4924_v37 = vpack.c.bf16 %v7267_v63, %v7273_v34  ;;  %v4927_v0 = vpack.c.bf16 %v7257_v13, %v7253_v26  ;;  %v6560_v11 = vpack.i.bf16 %v2051_v36, %v7273_v34  ;;  %v6835_v63 = vld [vmem:[#allocation2 + $0x438] sm:$0xff]  }
 0x259   :  { %5803 = vmatmul.mubr.msk.bf16.vlgmr.msra.gmra.mrb[0].mxu1 %vm7143_vm5, %v4865_v31  ;;  %6526 = vrot.lane.b32.xlu1 %v6525_v33, %s7016_s0  ;;  %v6565_v38 = vpack.i.bf16 %v2053_v60, %v7253_v26  ;;  %v6797_v60 = vld [vmem:[#allocation2 + $0x308] sm:$0xff]   ;;  %v6843_v26 = vld [vmem:[#allocation2 + $0x478] sm:$0xff]  }
 0x25a   :  { %5807 = vmatpush3.bf16.msra.mxu1 %v6780_v42  ;;  %v6784_v42 = vld [vmem:[#allocation2 + $0x260] sm:$0xff]  }
 0x25b   :  { %5808 = vmatprep.subr.bf16.mxu1 %v6781_v35 }
 0x25c   :  { %6531 = vrot.lane.b32.xlu0 %v6520_v28, %s7017_s1 }
 0x25d   :  { %6536 = vrot.lane.b32.xlu1 %v6525_v33, %s7017_s1 }
 0x25e   :  { %5809 = vmatpush3.bf16.msra.mxu1 %v6781_v35 }
 0x25f   :  { %5810 = vmatprep.subr.bf16.mxu1 %v6782_v39 }
 0x260   :  { %6541 = vrot.lane.b32.xlu0 %v6540_v21, %s7016_s0 }
 0x261   :  { %6546 = vrot.lane.b32.xlu1 %v6545_v12, %s7016_s0 }
 0x262   :  { %5811 = vmatpush3.bf16.msra.mxu1 %v6782_v39  ;;  %v6799_v39 = vld [vmem:[#allocation2 + $0x318] sm:$0xff]  }
 0x263   :  { %5812 = vmatprep.subr.bf16.mxu1 %v6783_v40 }
 0x264   :  { %6551 = vrot.lane.b32.xlu0 %v6540_v21, %s7017_s1  ;;  %v6790_v21 = vld [vmem:[#allocation2 + $0x2d0] sm:$0xff]  }
 0x265   :  { %6556 = vrot.lane.b32.xlu1 %v6545_v12, %s7017_s1 }
 0x266   :  { %5813 = vmatpush3.bf16.msra.mxu1 %v6783_v40  ;;  %v6800_v40 = vld [vmem:[#allocation2 + $0x320] sm:$0xff]  }
 0x267   :  { %5814 = vmatprep.subr.bf16.mxu1 %v6784_v42 }
 0x268   :  { %6561 = vrot.lane.b32.xlu0 %v6560_v11, %s7016_s0 }
 0x269   :  { %6566 = vrot.lane.b32.xlu1 %v6565_v38, %s7016_s0 }
 0x26a   :  { %5815 = vmatpush3.bf16.msra.mxu1 %v6784_v42  ;;  %v6801_v42 = vld [vmem:[#allocation2 + $0x328] sm:$0xff]  }
 0x26b   :  { %5816 = vmatprep.subr.bf16.mxu1 %v6785_v43 }
 0x26c   :  { %6571 = vrot.lane.b32.xlu0 %v6560_v11, %s7017_s1 }
 0x26d   :  { %6576 = vrot.lane.b32.xlu1 %v6565_v38, %s7017_s1  ;;  %v6798_v38 = vld [vmem:[#allocation2 + $0x310] sm:$0xff]  }
 0x26e   :  { %5817 = vmatpush3.bf16.msra.mxu1 %v6785_v43  ;;  %v6802_v43 = vld [vmem:[#allocation2 + $0x330] sm:$0xff]  }
 0x26f   :  { %5818 = vmatprep.subr.bf16.mxu1 %v6786_v44 }
 0x272   :  { %5819 = vmatpush3.bf16.msra.mxu1 %v6786_v44  ;;  %v6803_v44 = vld [vmem:[#allocation2 + $0x338] sm:$0xff]  }
 0x273   :  { %5820 = vmatprep.subr.bf16.mxu1 %v6787_v45 }
 0x276   :  { %5821 = vmatpush3.bf16.msra.mxu1 %v6787_v45 }
 0x277   :  { %5826 = vmatprep.subr.bf16.mxu1 %v6788_v46 }
 0x2ca   :  { %v6522_v47 = vpop.permute.xlu0 %6521 }
 0x2cb   :  { %v6524_v48 = vunpack.i.h.bf16 %v6522_v47  ;;  %v6523_v50 = vunpack.i.l.bf16 %v6522_v47  ;;  %v6527_v51 = vpop.permute.xlu1 %6526 }
 0x2cc   :  { %v6529_v53 = vunpack.i.h.bf16 %v6527_v51  ;;  %v6528_v58 = vunpack.i.l.bf16 %v6527_v51  ;;  %v6805_v51 = vld [vmem:[#allocation2 + $0x348] sm:$0xff]  }
 0x2cd   :  { %v1306_v62 = vpack.c.bf16 %v6524_v48, %v6523_v50  ;;  %v6804_v48 = vld [vmem:[#allocation2 + $0x340] sm:$0xff]  }
 0x2ce   :  { %v1307_v2 = vpack.c.bf16 %v6529_v53, %v6528_v58  ;;  %v6532_v3 = vpop.permute.xlu0 %6531  ;;  %v6806_v53 = vld [vmem:[#allocation2 + $0x350] sm:$0xff]   ;;  %v6807_v58 = vld [vmem:[#allocation2 + $0x358] sm:$0xff]  }
 0x2cf   :  { %v6534_v12 = vunpack.i.h.bf16 %v6532_v3  ;;  %v6533_v19 = vunpack.i.l.bf16 %v6532_v3  ;;  %5822 = vmatprep.mubr.bf16.mxu1 %v1306_v62  ;;  %v6537_v57 = vpop.permute.xlu1 %6536  ;;  %v6808_v62 = vld [vmem:[#allocation2 + $0x360] sm:$0xff]   ;;  %v6810_v3 = vld [vmem:[#allocation2 + $0x370] sm:$0xff]  }
 0x2d0   :  { %5823 = vmatmul.mubr.bf16.vlgmr.msra.gmra.mrb[0].mxu1 %v1307_v2  ;;  %v6539_v29 = vunpack.i.h.bf16 %v6537_v57  ;;  %v6538_v31 = vunpack.i.l.bf16 %v6537_v57  ;;  %v6809_v2 = vld [vmem:[#allocation2 + $0x368] sm:$0xff]   ;;  %v6818_v57 = vld [vmem:[#allocation2 + $0x3b0] sm:$0xff]  }
 0x2d1   :  { %v1546_v20 = vpack.c.bf16 %v6534_v12, %v6533_v19  ;;  %5827 = vmatpush3.bf16.msra.mxu1 %v6788_v46  ;;  %v6813_v19 = vld [vmem:[#allocation2 + $0x388] sm:$0xff]  }
 0x2d2   :  { %5828 = vmatprep.subr.bf16.mxu1 %v6789_v6  ;;  %v6542_v28 = vpop.permute.xlu0 %6541  ;;  %v1547_v36 = vpack.c.bf16 %v6539_v29, %v6538_v31 }
 0x2d3   :  { %5842 = vmatprep.mubr.bf16.mxu1 %v1546_v20  ;;  %v6544_v33 = vunpack.i.h.bf16 %v6542_v28  ;;  %v6543_v35 = vunpack.i.l.bf16 %v6542_v28  ;;  %v6547_v45 = vpop.permute.xlu1 %6546  ;;  %v6819_v28 = vld [vmem:[#allocation2 + $0x3b8] sm:$0xff]  }
 0x2d4   :  { %v6549_v46 = vunpack.i.h.bf16 %v6547_v45  ;;  %v6548_v47 = vunpack.i.l.bf16 %v6547_v45  ;;  %v6826_v45 = vld [vmem:[#allocation2 + $0x3f0] sm:$0xff]  }
 0x2d5   :  { %5829 = vmatpush3.bf16.msra.mxu1 %v6789_v6  ;;  %v1674_v11 = vpack.c.bf16 %v6544_v33, %v6543_v35  ;;  %v6811_v6 = vld [vmem:[#allocation2 + $0x378] sm:$0xff]   ;;  %v6820_v35 = vld [vmem:[#allocation2 + $0x3c0] sm:$0xff]  }
 0x2d6   :  { %5830 = vmatprep.subr.bf16.mxu1 %v6790_v21  ;;  %v1675_v50 = vpack.c.bf16 %v6549_v46, %v6548_v47  ;;  %v6552_v12 = vpop.permute.xlu0 %6551  ;;  %v6827_v46 = vld [vmem:[#allocation2 + $0x3f8] sm:$0xff]  }
 0x2d7   :  { %v6554_v61 = vunpack.i.h.bf16 %v6552_v12  ;;  %v6557_v29 = vpop.permute.xlu1 %6556 }
 0x2d8   :  { %v6558_v33 = vunpack.i.l.bf16 %v6557_v29 }
 0x2d9   :  { %5831 = vmatpush3.bf16.msra.mxu1 %v6790_v21  ;;  %v6844_v21 = vld [vmem:[#allocation2 + $0x4c0] sm:$0xff]  }
 0x2da   :  { %5832 = vmatprep.subr.bf16.mxu1 %v6791_v22  ;;  %5966 = vmatprep.subr.bf16.mxu0 %v6844_v21  ;;  %v6562_v31 = vpop.permute.xlu0 %6561 }
 0x2db   :  { %5967 = vmatpush3.bf16.msra.mxu0 %v6844_v21  ;;  %v6567_v47 = vpop.permute.xlu1 %6566  ;;  %v6839_v21 = vld [vmem:[#allocation2 + $0x458] sm:$0xff]  }
 0x2dd   :  { %5833 = vmatpush3.bf16.msra.mxu1 %v6791_v22  ;;  %v6845_v22 = vld [vmem:[#allocation2 + $0x4c8] sm:$0xff]  }
 0x2de   :  { %5834 = vmatprep.subr.bf16.mxu1 %v6792_v24  ;;  %5968 = vmatprep.subr.bf16.mxu0 %v6845_v22  ;;  %v6572_v34 = vpop.permute.xlu0 %6571 }
 0x2df   :  { %5969 = vmatpush3.bf16.msra.mxu0 %v6845_v22  ;;  %v6840_v22 = vld [vmem:[#allocation2 + $0x460] sm:$0xff]   ;;  %v6577_v13 = vpop.permute.xlu1 %6576 }
 0x2e1   :  { %5835 = vmatpush3.bf16.msra.mxu1 %v6792_v24  ;;  %v6814_v24 = vld [vmem:[#allocation2 + $0x390] sm:$0xff]  }
 0x2e2   :  { %5836 = vmatprep.subr.bf16.mxu1 %v6793_v25 }
 0x2e5   :  { %5837 = vmatpush3.bf16.msra.mxu1 %v6793_v25  ;;  %v6846_v25 = vld [vmem:[#allocation2 + $0x4d0] sm:$0xff]  }
 0x2e6   :  { %5838 = vmatprep.subr.bf16.mxu1 %v6794_v14  ;;  %5970 = vmatprep.subr.bf16.mxu0 %v6846_v25 }
 0x2e7   :  { %5971 = vmatpush3.bf16.msra.mxu0 %v6846_v25  ;;  %v6842_v25 = vld [vmem:[#allocation2 + $0x470] sm:$0xff]  }
 0x2e9   :  { %5839 = vmatpush3.bf16.msra.mxu1 %v6794_v14  ;;  %v6815_v14 = vld [vmem:[#allocation2 + $0x398] sm:$0xff]  }
 0x2ea   :  { %5840 = vmatprep.subr.bf16.mxu1 %v6795_v56 }
 0x2ed   :  { %5841 = vmatpush3.bf16.msra.mxu1 %v6795_v56  ;;  %v6847_v56 = vld [vmem:[#allocation2 + $0x4d8] sm:$0xff]  }
 0x2ee   :  { %5846 = vmatprep.subr.bf16.mxu1 %v6796_v32  ;;  %5972 = vmatprep.subr.bf16.mxu0 %v6847_v56 }
 0x2ef   :  { %5973 = vmatpush3.bf16.msra.mxu0 %v6847_v56 }
 0x2f0   :  { %5843 = vmatmul.mubr.bf16.vlgmr.msra.gmra.mrb[0].mxu1 %v1547_v36  ;;  %5974 = vmatprep.subr.bf16.mxu0 %v6848_v54  ;;  %v6564_v36 = vunpack.i.h.bf16 %v6562_v31 }
 0x2f1   :  { %5847 = vmatpush3.bf16.msra.mxu1 %v6796_v32  ;;  %5862 = vmatprep.mubr.bf16.mxu1 %v1674_v11  ;;  %v6559_v32 = vunpack.i.h.bf16 %v6557_v29 }
 0x2f2   :  { %5848 = vmatprep.subr.bf16.mxu1 %v6797_v60 }
 0x2f3   :  { %5975 = vmatpush3.bf16.msra.mxu0 %v6848_v54  ;;  %v1923_v11 = vpack.c.bf16 %v6559_v32, %v6558_v33  ;;  %v6850_v54 = vld [vmem:[#allocation2 + $0x4f0] sm:$0xff]  }
 0x2f5   :  { %5849 = vmatpush3.bf16.msra.mxu1 %v6797_v60  ;;  %v6563_v60 = vunpack.i.l.bf16 %v6562_v31 }
 0x2f6   :  { %5850 = vmatprep.subr.bf16.mxu1 %v6798_v38 }
 0x2f9   :  { %5851 = vmatpush3.bf16.msra.mxu1 %v6798_v38  ;;  %v6821_v38 = vld [vmem:[#allocation2 + $0x3c8] sm:$0xff]  }
 0x2fa   :  { %5852 = vmatprep.subr.bf16.mxu1 %v6799_v39 }
 0x2fd   :  { %5853 = vmatpush3.bf16.msra.mxu1 %v6799_v39  ;;  %v2062_v39 = vpack.c.bf16 %v6564_v36, %v6563_v60 }
 0x2fe   :  { %5854 = vmatprep.subr.bf16.mxu1 %v6800_v40 }
 0x301   :  { %5855 = vmatpush3.bf16.msra.mxu1 %v6800_v40  ;;  %v6822_v40 = vld [vmem:[#allocation2 + $0x3d0] sm:$0xff]  }
 0x302   :  { %5856 = vmatprep.subr.bf16.mxu1 %v6801_v42 }
 0x305   :  { %5857 = vmatpush3.bf16.msra.mxu1 %v6801_v42  ;;  %v6823_v42 = vld [vmem:[#allocation2 + $0x3d8] sm:$0xff]  }
 0x306   :  { %5858 = vmatprep.subr.bf16.mxu1 %v6802_v43 }
 0x309   :  { %5859 = vmatpush3.bf16.msra.mxu1 %v6802_v43  ;;  %v6824_v43 = vld [vmem:[#allocation2 + $0x3e0] sm:$0xff]  }
 0x30a   :  { %5860 = vmatprep.subr.bf16.mxu1 %v6803_v44 }
 0x30d   :  { %5861 = vmatpush3.bf16.msra.mxu1 %v6803_v44  ;;  %v6825_v44 = vld [vmem:[#allocation2 + $0x3e8] sm:$0xff]  }
 0x30e   :  { %5866 = vmatprep.subr.bf16.mxu1 %v6804_v48 }
 0x310   :  { %5863 = vmatmul.mubr.bf16.vlgmr.msra.gmra.mrb[0].mxu1 %v1675_v50  ;;  %v6568_v50 = vunpack.i.l.bf16 %v6567_v47 }
 0x311   :  { %5867 = vmatpush3.bf16.msra.mxu1 %v6804_v48  ;;  %5882 = vmatprep.mubr.bf16.mxu1 %v1794_v15  ;;  %v6553_v15 = vunpack.i.l.bf16 %v6552_v12  ;;  %v6569_v48 = vunpack.i.h.bf16 %v6567_v47  ;;  %v6834_v12 = vld [vmem:[#allocation2 + $0x430] sm:$0xff]  }
 0x312   :  { %5868 = vmatprep.subr.bf16.mxu1 %v6805_v51 }
 0x313   :  { %v1922_v20 = vpack.c.bf16 %v6554_v61, %v6553_v15  ;;  %v6573_v61 = vunpack.i.l.bf16 %v6572_v34  ;;  %v6837_v15 = vld [vmem:[#allocation2 + $0x448] sm:$0xff]  }
 0x315   :  { %5869 = vmatpush3.bf16.msra.mxu1 %v6805_v51  ;;  %v6828_v51 = vld [vmem:[#allocation2 + $0x400] sm:$0xff]  }
 0x316   :  { %5870 = vmatprep.subr.bf16.mxu1 %v6806_v53 }
 0x319   :  { %5871 = vmatpush3.bf16.msra.mxu1 %v6806_v53  ;;  %v2063_v53 = vpack.c.bf16 %v6569_v48, %v6568_v50 }
 0x31a   :  { %5872 = vmatprep.subr.bf16.mxu1 %v6807_v58 }
 0x31d   :  { %5873 = vmatpush3.bf16.msra.mxu1 %v6807_v58  ;;  %v6829_v58 = vld [vmem:[#allocation2 + $0x408] sm:$0xff]  }
 0x31e   :  { %5874 = vmatprep.subr.bf16.mxu1 %v6808_v62 }
 0x321   :  { %5875 = vmatpush3.bf16.msra.mxu1 %v6808_v62  ;;  %v6830_v62 = vld [vmem:[#allocation2 + $0x410] sm:$0xff]  }
 0x322   :  { %5876 = vmatprep.subr.bf16.mxu1 %v6809_v2 }
 0x325   :  { %5877 = vmatpush3.bf16.msra.mxu1 %v6809_v2  ;;  %v6831_v2 = vld [vmem:[#allocation2 + $0x418] sm:$0xff]  }
 0x326   :  { %5878 = vmatprep.subr.bf16.mxu1 %v6810_v3 }
 0x329   :  { %5879 = vmatpush3.bf16.msra.mxu1 %v6810_v3  ;;  %v6832_v3 = vld [vmem:[#allocation2 + $0x420] sm:$0xff]  }
 0x32a   :  { %5880 = vmatprep.subr.bf16.mxu1 %v6811_v6 }
 0x32d   :  { %5881 = vmatpush3.bf16.msra.mxu1 %v6811_v6  ;;  %v6833_v6 = vld [vmem:[#allocation2 + $0x428] sm:$0xff]  }
 0x32e   :  { %5886 = vmatprep.subr.bf16.mxu1 %v6812_v52 }
 0x330   :  { %5883 = vmatmul.mubr.bf16.vlgmr.msra.gmra.mrb[0].mxu1 %v1795_v16  ;;  %v6817_v16 = vld [vmem:[#allocation2 + $0x3a8] sm:$0xff]  }
 0x331   :  { %5887 = vmatpush3.bf16.msra.mxu1 %v6812_v52  ;;  %5902 = vmatprep.mubr.bf16.mxu1 %v1922_v20  ;;  %v6574_v52 = vunpack.i.h.bf16 %v6572_v34  ;;  %v6838_v20 = vld [vmem:[#allocation2 + $0x450] sm:$0xff]  }
 0x332   :  { %5888 = vmatprep.subr.bf16.mxu1 %v6813_v19 }
 0x335   :  { %5889 = vmatpush3.bf16.msra.mxu1 %v6813_v19  ;;  %v2310_v19 = vpack.c.bf16 %v6574_v52, %v6573_v61  ;;  %v6853_v52 = vld [vmem:[#allocation2 + $0x488] sm:$0xff]  }
 0x336   :  { %5890 = vmatprep.subr.bf16.mxu1 %v6814_v24 }
 0x339   :  { %5891 = vmatpush3.bf16.msra.mxu1 %v6814_v24  ;;  %v6841_v24 = vld [vmem:[#allocation2 + $0x468] sm:$0xff]  }
 0x33a   :  { %5892 = vmatprep.subr.bf16.mxu1 %v6815_v14 }
 0x33d   :  { %5893 = vmatpush3.bf16.msra.mxu1 %v6815_v14  ;;  %v6578_v14 = vunpack.i.l.bf16 %v6577_v13 }
 0x33e   :  { %5894 = vmatprep.subr.bf16.mxu1 %v6816_v49 }
 0x341   :  { %5895 = vmatpush3.bf16.msra.mxu1 %v6816_v49  ;;  %v6849_v49 = vld [vmem:[#allocation2 + $0x4e8] sm:$0xff]  }
 0x342   :  { %5896 = vmatprep.subr.bf16.mxu1 %v6817_v16  ;;  %5976 = vmatprep.subr.bf16.mxu0 %v6849_v49 }
 0x343   :  { %5977 = vmatpush3.bf16.msra.mxu0 %v6849_v49  ;;  %v6859_v49 = vld [vmem:[#allocation2 + $0x4b8] sm:$0xff]  }
 0x344   :  { %5978 = vmatprep.subr.bf16.mxu0 %v6850_v54 }
 0x345   :  { %5897 = vmatpush3.bf16.msra.mxu1 %v6817_v16  ;;  %v6851_v16 = vld [vmem:[#allocation2 + $0x4f8] sm:$0xff]  }
 0x346   :  { %5898 = vmatprep.subr.bf16.mxu1 %v6818_v57 }
 0x347   :  { %5979 = vmatpush3.bf16.msra.mxu0 %v6850_v54  ;;  %v6860_v54 = vld [vmem:[#allocation2 + $0x500] sm:$0xff]  }
 0x348   :  { %5980 = vmatprep.subr.bf16.mxu0 %v6851_v16 }
 0x349   :  { %5899 = vmatpush3.bf16.msra.mxu1 %v6818_v57  ;;  %v6852_v57 = vld [vmem:[#allocation2 + $0x480] sm:$0xff]  }
 0x34a   :  { %5900 = vmatprep.subr.bf16.mxu1 %v6819_v28 }
 0x34b   :  { %5981 = vmatpush3.bf16.msra.mxu0 %v6851_v16 }
 0x34c   :  { %5986 = vmatprep.subr.bf16.mxu0 %v6852_v57 }
 0x34d   :  { %5901 = vmatpush3.bf16.msra.mxu1 %v6819_v28  ;;  %v4937_v28 = vld [vmem:[%s7762_s2 + $0x1] ss:$0 sm:$0xff] }
 0x34e   :  { %5906 = vmatprep.subr.bf16.mxu1 %v6820_v35 }
 0x350   :  { %5903 = vmatmul.mubr.bf16.vlgmr.msra.gmra.mrb[0].mxu1 %v1923_v11 }
 0x351   :  { %5907 = vmatpush3.bf16.msra.mxu1 %v6820_v35  ;;  %5922 = vmatprep.mubr.bf16.mxu1 %v2062_v39 }
 0x352   :  { %5908 = vmatprep.subr.bf16.mxu1 %v6821_v38 }
 0x355   :  { %5909 = vmatpush3.bf16.msra.mxu1 %v6821_v38 }
 0x356   :  { %5910 = vmatprep.subr.bf16.mxu1 %v6822_v40 }
 0x359   :  { %5911 = vmatpush3.bf16.msra.mxu1 %v6822_v40 }
 0x35a   :  { %5912 = vmatprep.subr.bf16.mxu1 %v6823_v42 }
 0x35d   :  { %5913 = vmatpush3.bf16.msra.mxu1 %v6823_v42 }
 0x35e   :  { %5914 = vmatprep.subr.bf16.mxu1 %v6824_v43 }
 0x361   :  { %5915 = vmatpush3.bf16.msra.mxu1 %v6824_v43 }
 0x362   :  { %5916 = vmatprep.subr.bf16.mxu1 %v6825_v44 }
 0x365   :  { %5917 = vmatpush3.bf16.msra.mxu1 %v6825_v44 }
 0x366   :  { %5918 = vmatprep.subr.bf16.mxu1 %v6826_v45 }
 0x369   :  { %5919 = vmatpush3.bf16.msra.mxu1 %v6826_v45 }
 0x36a   :  { %5920 = vmatprep.subr.bf16.mxu1 %v6827_v46 }
 0x36d   :  { %5921 = vmatpush3.bf16.msra.mxu1 %v6827_v46 }
 0x36e   :  { %5926 = vmatprep.subr.bf16.mxu1 %v6828_v51 }
 0x370   :  { %5923 = vmatmul.mubr.bf16.vlgmr.msra.gmra.mrb[0].mxu1 %v2063_v53 }
 0x371   :  { %5927 = vmatpush3.bf16.msra.mxu1 %v6828_v51  ;;  %5942 = vmatprep.mubr.msk.bf16.mxu1 %vm7203_vm9, %v4924_v37  ;;  %v6836_v37 = vld [vmem:[#allocation2 + $0x440] sm:$0xff]  }
 0x372   :  { %5928 = vmatprep.subr.bf16.mxu1 %v6829_v58 }
 0x375   :  { %5929 = vmatpush3.bf16.msra.mxu1 %v6829_v58 }
 0x376   :  { %5930 = vmatprep.subr.bf16.mxu1 %v6830_v62 }
 0x379   :  { %5931 = vmatpush3.bf16.msra.mxu1 %v6830_v62 }
 0x37a   :  { %5932 = vmatprep.subr.bf16.mxu1 %v6831_v2 }
 0x37d   :  { %5933 = vmatpush3.bf16.msra.mxu1 %v6831_v2 }
 0x37e   :  { %5934 = vmatprep.subr.bf16.mxu1 %v6832_v3 }
 0x381   :  { %5935 = vmatpush3.bf16.msra.mxu1 %v6832_v3 }
 0x382   :  { %5936 = vmatprep.subr.bf16.mxu1 %v6833_v6 }
 0x385   :  { %5937 = vmatpush3.bf16.msra.mxu1 %v6833_v6 }
 0x386   :  { %5938 = vmatprep.subr.bf16.mxu1 %v6834_v12 }
 0x389   :  { %5939 = vmatpush3.bf16.msra.mxu1 %v6834_v12 }
 0x38a   :  { %5940 = vmatprep.subr.bf16.mxu1 %v6835_v63 }
 0x38d   :  { %5941 = vmatpush3.bf16.msra.mxu1 %v6835_v63 }
 0x38e   :  { %5946 = vmatprep.subr.bf16.mxu1 %v6836_v37 }
 0x390   :  { %5943 = vmatmul.mubr.msk.bf16.vlgmr.msra.gmra.mrb[0].mxu1 %vm7215_vm10, %v4927_v0  ;;  %v6579_v0 = vunpack.i.h.bf16 %v6577_v13  ;;  %v6855_v13 = vld [vmem:[#allocation2 + $0x498] sm:$0xff]  }
 0x391   :  { %5947 = vmatpush3.bf16.msra.mxu1 %v6836_v37  ;;  %5962 = vmatprep.mubr.bf16.mxu1 %v2310_v19 }
 0x392   :  { %5948 = vmatprep.subr.bf16.mxu1 %v6837_v15  ;;  %v2311_v56 = vpack.c.bf16 %v6579_v0, %v6578_v14  ;;  %v6856_v0 = vld [vmem:[#allocation2 + $0x4a0] sm:$0xff]   ;;  %v6857_v14 = vld [vmem:[#allocation2 + $0x4a8] sm:$0xff]  }
 0x395   :  { %5949 = vmatpush3.bf16.msra.mxu1 %v6837_v15 }
 0x396   :  { %5950 = vmatprep.subr.bf16.mxu1 %v6838_v20 }
 0x399   :  { %5951 = vmatpush3.bf16.msra.mxu1 %v6838_v20 }
 0x39a   :  { %5952 = vmatprep.subr.bf16.mxu1 %v6839_v21 }
 0x39d   :  { %5953 = vmatpush3.bf16.msra.mxu1 %v6839_v21 }
 0x39e   :  { %5954 = vmatprep.subr.bf16.mxu1 %v6840_v22 }
 0x3a1   :  { %5955 = vmatpush3.bf16.msra.mxu1 %v6840_v22 }
 0x3a2   :  { %5956 = vmatprep.subr.bf16.mxu1 %v6841_v24 }
 0x3a5   :  { %5957 = vmatpush3.bf16.msra.mxu1 %v6841_v24 }
 0x3a6   :  { %5958 = vmatprep.subr.bf16.mxu1 %v6842_v25 }
 0x3a9   :  { %5959 = vmatpush3.bf16.msra.mxu1 %v6842_v25 }
 0x3aa   :  { %5960 = vmatprep.subr.bf16.mxu1 %v6843_v26 }
 0x3ad   :  { %5961 = vmatpush3.bf16.msra.mxu1 %v6843_v26  ;;  %v6854_v26 = vld [vmem:[#allocation2 + $0x490] sm:$0xff]  }
 0x3b0   :  { %5963 = vmatmul.mubr.bf16.vlgmr.msra.gmra.mrb[0].mxu1 %v2311_v56  ;;  %v6858_v56 = vld [vmem:[#allocation2 + $0x4b0] sm:$0xff]  }
 0x483   :  { %v5964_v29 = vpop.f32.mrb[0].mxu1 }
 0x484   :  { %v2438_v31 = vadd.f32 %v5964_v29, %v4937_v28  ;;  %v2411_v32 = vpop.f32.mrb[1].mxu1 }
 0x485   :  { %v2436_v33 = vadd.f32 %v4937_v28, %v2411_v32  ;;  %v5965_v35 = vpop.f32.mrb[2].mxu1 }
 0x486   :  { %v7328_v36 = vadd.f32 %v5243_v9, %v2438_v31  ;;  %v2439_v60 = vadd.f32 %v5965_v35, %v4937_v28  ;;  %v2414_v11 = vpop.f32.mrb[3].mxu1 }
 0x487   :  { %v7332_v38 = vadd.f32 %v5239_v7, %v2436_v33  ;;  %v2437_v39 = vadd.f32 %v4937_v28, %v2414_v11  ;;  %v6861_v11 = vld [vmem:[#allocation2 + $0x508] sm:$0xff]  }
 0x488   :  { %v2448_v40 = vrot.slane %v7328_v36, 7  ;;  %v7337_v42 = vadd.f32 %v5244_v10, %v2439_v60  ;;  %v3204_v45 = vrot.slane %v7328_v36, 1 }
 0x489   :  { %v7341_v43 = vadd.f32 %v5240_v8, %v2437_v39  ;;  %v2446_v9 = vrot.slane %v7332_v38, 7  ;;  %v3202_v44 = vrot.slane %v7332_v38, 1 }
 0x48a   :  { %v2449_v7 = vrot.slane %v7337_v42, 7  ;;  %v6605_v46 = vpack.i.bf16 %v7337_v42, %v7328_v36  ;;  %v3205_v47 = vrot.slane %v7337_v42, 1  ;;  %v2955_v25 = vpack.c.bf16 %v7337_v42, %v7328_v36  ;;  %v6918_v36 = vld [vmem:[%s7763_s3 + $0x50] sm:$0xff]   ;;  %v6887_v42 = vld [vmem:[#allocation2 + $0x5d8] sm:$0xff]  }
 0x48b   :  { %v2447_v5 = vrot.slane %v7341_v43, 7  ;;  %v6600_v4 = vpack.i.bf16 %v7341_v43, %v7332_v38  ;;  %v3203_v8 = vrot.slane %v7341_v43, 1  ;;  %v2954_v24 = vpack.c.bf16 %v7341_v43, %v7332_v38  ;;  %v6884_v38 = vld [vmem:[#allocation2 + $0x5c0] sm:$0xff]  }
 0x48c   :  { %v2453_v10 = vsel %vm113_vm0, %v2449_v7, %v2446_v9  ;;  %v2450_v48 = vsel %vm113_vm0, %v2448_v40, %v2449_v7  ;;  %v7360_v50 = vsel %vm877_vm6, %v3204_v45, %v3205_v47  ;;  %v7364_v51 = vsel %vm877_vm6, %v3205_v47, %v3202_v44  ;;  %v6864_v7 = vld [vmem:[#allocation2 + $0x520] sm:$0xff]   ;;  %v6866_v47 = vld [vmem:[#allocation2 + $0x530] sm:$0xff]  }
 0x48d   :  { %v2452_v53 = vsel %vm113_vm0, %v2446_v9, %v2447_v5  ;;  %v2454_v58 = vsel %vm7095_vm1, %v2453_v10, 0.0  ;;  %v2451_v62 = vsel %vm113_vm0, %v2447_v5, %v2448_v40  ;;  %v7374_v2 = vsel %vm877_vm6, %v3203_v8, %v3204_v45  ;;  %v6863_v45 = vld [vmem:[#allocation2 + $0x518] sm:$0xff]  }
 0x48e   :  { %v6580_v3 = vpack.i.bf16 %v2452_v53, %v2454_v58  ;;  %v4948_v6 = vpack.c.bf16 %v2452_v53, %v2453_v10  ;;  %v4951_v12 = vpack.c.bf16 %v2450_v48, %v2451_v62  ;;  %v2456_v63 = vsel %vm7099_vm2, %v2451_v62, 0.0  ;;  %v6867_v5 = vld [vmem:[#allocation2 + $0x538] sm:$0xff]   ;;  %v6868_v53 = vld [vmem:[#allocation2 + $0x540] sm:$0xff]  }
 0x48f   :  { %v6585_v34 = vpack.i.bf16 %v2450_v48, %v2456_v63  ;;  %v7380_v37 = vsel %vm877_vm6, %v3202_v44, %v3203_v8  ;;  %v3211_v61 = vsel %vm7156_vm7, %v7374_v2, 0.0  ;;  %v3213_v19 = vsel %vm7171_vm8, %v7364_v51, 0.0  ;;  %v6862_v44 = vld [vmem:[#allocation2 + $0x510] sm:$0xff]  }
 0x490   :  { %6581 = vrot.lane.b32.xlu0 %v6580_v3, %s7016_s0  ;;  %5982 = vmatprep.mubr.msk.bf16.mxu0 %vm7116_vm4, %v4948_v6  ;;  %v5010_v15 = vpack.c.bf16 %v7374_v2, %v7380_v37  ;;  %v5013_v20 = vpack.c.bf16 %v7364_v51, %v7360_v50  ;;  %v6620_v21 = vpack.i.bf16 %v3211_v61, %v7380_v37  ;;  %v6869_v6 = vld [vmem:[#allocation2 + $0x548] sm:$0xff]   ;;  %v6870_v63 = vld [vmem:[#allocation2 + $0x550] sm:$0xff]   ;;  %v6907_v2 = vld [vmem:[#allocation2 + $0x678] sm:$0xff]  }
 0x491   :  { %5983 = vmatmul.mubr.msk.bf16.vlgmr.msra.gmra.mrb[4].mxu0 %vm7143_vm5, %v4951_v12  ;;  %6586 = vrot.lane.b32.xlu1 %v6585_v34, %s7016_s0  ;;  %v6625_v22 = vpack.i.bf16 %v3213_v19, %v7360_v50  ;;  %v6873_v61 = vld [vmem:[#allocation2 + $0x568] sm:$0xff]   ;;  %v6874_v19 = vld [vmem:[#allocation2 + $0x570] sm:$0xff]   ;;  %v6915_v50 = vld [vmem:[#allocation2 + $0x6b8] sm:$0xff]  }
 0x492   :  { %5987 = vmatpush3.bf16.msra.mxu0 %v6852_v57 }
 0x493   :  { %5988 = vmatprep.subr.bf16.mxu0 %v6853_v52 }
 0x494   :  { %6591 = vrot.lane.b32.xlu0 %v6580_v3, %s7017_s1 }
 0x495   :  { %6596 = vrot.lane.b32.xlu1 %v6585_v34, %s7017_s1  ;;  %v6871_v34 = vld [vmem:[#allocation2 + $0x558] sm:$0xff]  }
 0x496   :  { %5989 = vmatpush3.bf16.msra.mxu0 %v6853_v52  ;;  %v6872_v52 = vld [vmem:[#allocation2 + $0x560] sm:$0xff]  }
 0x497   :  { %5990 = vmatprep.subr.bf16.mxu0 %v6854_v26 }
 0x498   :  { %6601 = vrot.lane.b32.xlu0 %v6600_v4, %s7016_s0 }
 0x499   :  { %6606 = vrot.lane.b32.xlu1 %v6605_v46, %s7016_s0 }
 0x49a   :  { %5991 = vmatpush3.bf16.msra.mxu0 %v6854_v26 }
 0x49b   :  { %5992 = vmatprep.subr.bf16.mxu0 %v6855_v13 }
 0x49c   :  { %6611 = vrot.lane.b32.xlu0 %v6600_v4, %s7017_s1 }
 0x49d   :  { %6616 = vrot.lane.b32.xlu1 %v6605_v46, %s7017_s1  ;;  %v6865_v46 = vld [vmem:[#allocation2 + $0x528] sm:$0xff]  }
 0x49e   :  { %5993 = vmatpush3.bf16.msra.mxu0 %v6855_v13 }
 0x49f   :  { %5994 = vmatprep.subr.bf16.mxu0 %v6856_v0 }
 0x4a0   :  { %6621 = vrot.lane.b32.xlu0 %v6620_v21, %s7016_s0 }
 0x4a1   :  { %6626 = vrot.lane.b32.xlu1 %v6625_v22, %s7016_s0 }
 0x4a2   :  { %5995 = vmatpush3.bf16.msra.mxu0 %v6856_v0  ;;  %v6876_v0 = vld [vmem:[#allocation2 + $0x580] sm:$0xff]  }
 0x4a3   :  { %5996 = vmatprep.subr.bf16.mxu0 %v6857_v14 }
 0x4a4   :  { %6631 = vrot.lane.b32.xlu0 %v6620_v21, %s7017_s1  ;;  %v6875_v21 = vld [vmem:[#allocation2 + $0x578] sm:$0xff]  }
 0x4a5   :  { %6636 = vrot.lane.b32.xlu1 %v6625_v22, %s7017_s1 }
 0x4a6   :  { %5997 = vmatpush3.bf16.msra.mxu0 %v6857_v14 }
 0x4a7   :  { %5998 = vmatprep.subr.bf16.mxu0 %v6858_v56 }
 0x4aa   :  { %5999 = vmatpush3.bf16.msra.mxu0 %v6858_v56  ;;  %v6877_v56 = vld [vmem:[#allocation2 + $0x588] sm:$0xff]  }
 0x4ab   :  { %6000 = vmatprep.subr.bf16.mxu0 %v6859_v49 }
 0x4ae   :  { %6001 = vmatpush3.bf16.msra.mxu0 %v6859_v49  ;;  %v6878_v49 = vld [vmem:[#allocation2 + $0x590] sm:$0xff]  }
 0x4af   :  { %6006 = vmatprep.subr.bf16.mxu0 %v6860_v54 }
 0x502   :  { %v6582_v16 = vpop.permute.xlu0 %6581 }
 0x503   :  { %v6584_v57 = vunpack.i.h.bf16 %v6582_v16  ;;  %v6583_v28 = vunpack.i.l.bf16 %v6582_v16  ;;  %v6587_v29 = vpop.permute.xlu1 %6586  ;;  %v6880_v16 = vld [vmem:[#allocation2 + $0x5a0] sm:$0xff]  }
 0x504   :  { %v6589_v31 = vunpack.i.h.bf16 %v6587_v29  ;;  %v6588_v32 = vunpack.i.l.bf16 %v6587_v29  ;;  %v6883_v29 = vld [vmem:[#allocation2 + $0x5b8] sm:$0xff]  }
 0x505   :  { %v2466_v33 = vpack.c.bf16 %v6584_v57, %v6583_v28  ;;  %v6881_v57 = vld [vmem:[#allocation2 + $0x5a8] sm:$0xff]   ;;  %v6882_v28 = vld [vmem:[#allocation2 + $0x5b0] sm:$0xff]  }
 0x506   :  { %v2467_v35 = vpack.c.bf16 %v6589_v31, %v6588_v32  ;;  %v6592_v60 = vpop.permute.xlu0 %6591  ;;  %v6885_v32 = vld [vmem:[#allocation2 + $0x5c8] sm:$0xff]  }
 0x507   :  { %v6594_v39 = vunpack.i.h.bf16 %v6592_v60  ;;  %v6593_v40 = vunpack.i.l.bf16 %v6592_v60  ;;  %6002 = vmatprep.mubr.bf16.mxu0 %v2466_v33  ;;  %v6597_v4 = vpop.permute.xlu1 %6596  ;;  %v6917_v60 = vld [vmem:[%s7763_s3 + $0x48] sm:$0xff]  }
 0x508   :  { %6003 = vmatmul.mubr.bf16.vlgmr.msra.gmra.mrb[4].mxu0 %v2467_v35  ;;  %v6599_v10 = vunpack.i.h.bf16 %v6597_v4  ;;  %v6598_v48 = vunpack.i.l.bf16 %v6597_v4  ;;  %v6916_v35 = vld [vmem:[%s7763_s3 + $0x40] sm:$0xff]  }
 0x509   :  { %v2706_v9 = vpack.c.bf16 %v6594_v39, %v6593_v40  ;;  %6007 = vmatpush3.bf16.msra.mxu0 %v6860_v54  ;;  %v6879_v54 = vld [vmem:[#allocation2 + $0x598] sm:$0xff]   ;;  %6146 = vmatprep.subr.bf16.mxu1 %v6916_v35  ;;  %v6888_v39 = vld [vmem:[#allocation2 + $0x5e0] sm:$0xff]  }
 0x50a   :  { %6008 = vmatprep.subr.bf16.mxu0 %v6861_v11  ;;  %v6602_v8 = vpop.permute.xlu0 %6601  ;;  %v2707_v3 = vpack.c.bf16 %v6599_v10, %v6598_v48  ;;  %6147 = vmatpush3.bf16.msra.mxu1 %v6916_v35  ;;  %v6920_v40 = vld [vmem:[%s7763_s3 + $0x60] sm:$0xff]   ;;  %v6921_v35 = vld [vmem:[%s7763_s3 + $0x68] sm:$0xff]  }
 0x50b   :  { %6022 = vmatprep.mubr.bf16.mxu0 %v2706_v9  ;;  %v6604_v58 = vunpack.i.h.bf16 %v6602_v8  ;;  %v6603_v62 = vunpack.i.l.bf16 %v6602_v8  ;;  %v6607_v22 = vpop.permute.xlu1 %6606  ;;  %6148 = vmatprep.subr.bf16.mxu1 %v6917_v60  ;;  %v6889_v9 = vld [vmem:[#allocation2 + $0x5e8] sm:$0xff]   ;;  %v6892_v4 = vld [vmem:[#allocation2 + $0x600] sm:$0xff]  }
 0x50c   :  { %v6609_v26 = vunpack.i.h.bf16 %v6607_v22  ;;  %v6608_v13 = vunpack.i.l.bf16 %v6607_v22 }
 0x50d   :  { %6009 = vmatpush3.bf16.msra.mxu0 %v6861_v11  ;;  %v2834_v12 = vpack.c.bf16 %v6604_v58, %v6603_v62  ;;  %v6886_v11 = vld [vmem:[#allocation2 + $0x5d0] sm:$0xff]  }
 0x50e   :  { %6010 = vmatprep.subr.bf16.mxu0 %v6862_v44  ;;  %v2835_v14 = vpack.c.bf16 %v6609_v26, %v6608_v13  ;;  %v6612_v31 = vpop.permute.xlu0 %6611  ;;  %6149 = vmatpush3.bf16.msra.mxu1 %v6917_v60  ;;  %v6894_v62 = vld [vmem:[#allocation2 + $0x610] sm:$0xff]   ;;  %v6901_v26 = vld [vmem:[#allocation2 + $0x648] sm:$0xff]  }
 0x50f   :  { %v6614_v43 = vunpack.i.h.bf16 %v6612_v31  ;;  %6150 = vmatprep.subr.bf16.mxu1 %v6918_v36  ;;  %v6902_v13 = vld [vmem:[#allocation2 + $0x650] sm:$0xff]  }
 0x510   :  { %v6922_v60 = vld [vmem:[%s7763_s3 + $0x70] sm:$0xff]  }
 0x511   :  { %6011 = vmatpush3.bf16.msra.mxu0 %v6862_v44  ;;  %v6890_v44 = vld [vmem:[#allocation2 + $0x5f0] sm:$0xff]  }
 0x512   :  { %6012 = vmatprep.subr.bf16.mxu0 %v6863_v45  ;;  %6151 = vmatpush3.bf16.msra.mxu1 %v6918_v36  ;;  %v6924_v36 = vld [vmem:[%s7763_s3] sm:$0xff]  }
 0x515   :  { %6013 = vmatpush3.bf16.msra.mxu0 %v6863_v45  ;;  %v6891_v45 = vld [vmem:[#allocation2 + $0x5f8] sm:$0xff]  }
 0x516   :  { %6014 = vmatprep.subr.bf16.mxu0 %v6864_v7 }
 0x519   :  { %6015 = vmatpush3.bf16.msra.mxu0 %v6864_v7  ;;  %v6617_v7 = vpop.permute.xlu1 %6616 }
 0x51a   :  { %6016 = vmatprep.subr.bf16.mxu0 %v6865_v46 }
 0x51d   :  { %6017 = vmatpush3.bf16.msra.mxu0 %v6865_v46  ;;  %v6622_v46 = vpop.permute.xlu0 %6621 }
 0x51e   :  { %6018 = vmatprep.subr.bf16.mxu0 %v6866_v47  ;;  %v6624_v8 = vunpack.i.h.bf16 %v6622_v46  ;;  %v6623_v10 = vunpack.i.l.bf16 %v6622_v46 }
 0x520   :  { %v3222_v58 = vpack.c.bf16 %v6624_v8, %v6623_v10 }
 0x521   :  { %6019 = vmatpush3.bf16.msra.mxu0 %v6866_v47  ;;  %v6619_v47 = vunpack.i.h.bf16 %v6617_v7  ;;  %v6632_v37 = vpop.permute.xlu0 %6631 }
 0x522   :  { %6020 = vmatprep.subr.bf16.mxu0 %v6867_v5 }
 0x525   :  { %6021 = vmatpush3.bf16.msra.mxu0 %v6867_v5  ;;  %v6618_v5 = vunpack.i.l.bf16 %v6617_v7 }
 0x526   :  { %6026 = vmatprep.subr.bf16.mxu0 %v6868_v53 }
 0x527   :  { %v3083_v48 = vpack.c.bf16 %v6619_v47, %v6618_v5 }
 0x528   :  { %6023 = vmatmul.mubr.bf16.vlgmr.msra.gmra.mrb[4].mxu0 %v2707_v3  ;;  %v6895_v3 = vld [vmem:[#allocation2 + $0x618] sm:$0xff]  }
 0x529   :  { %6027 = vmatpush3.bf16.msra.mxu0 %v6868_v53  ;;  %6042 = vmatprep.mubr.bf16.mxu0 %v2834_v12  ;;  %v6893_v53 = vld [vmem:[#allocation2 + $0x608] sm:$0xff]  }
 0x52a   :  { %6028 = vmatprep.subr.bf16.mxu0 %v6869_v6  ;;  %v6897_v12 = vld [vmem:[#allocation2 + $0x628] sm:$0xff]  }
 0x52d   :  { %6029 = vmatpush3.bf16.msra.mxu0 %v6869_v6  ;;  %v6896_v6 = vld [vmem:[#allocation2 + $0x620] sm:$0xff]  }
 0x52e   :  { %6030 = vmatprep.subr.bf16.mxu0 %v6870_v63 }
 0x531   :  { %6031 = vmatpush3.bf16.msra.mxu0 %v6870_v63  ;;  %v6898_v63 = vld [vmem:[#allocation2 + $0x630] sm:$0xff]  }
 0x532   :  { %6032 = vmatprep.subr.bf16.mxu0 %v6871_v34 }
 0x535   :  { %6033 = vmatpush3.bf16.msra.mxu0 %v6871_v34  ;;  %v6899_v34 = vld [vmem:[#allocation2 + $0x638] sm:$0xff]  }
 0x536   :  { %6034 = vmatprep.subr.bf16.mxu0 %v6872_v52 }
 0x539   :  { %6035 = vmatpush3.bf16.msra.mxu0 %v6872_v52  ;;  %v6627_v52 = vpop.permute.xlu1 %6626 }
 0x53a   :  { %6036 = vmatprep.subr.bf16.mxu0 %v6873_v61 }
 0x53d   :  { %6037 = vmatpush3.bf16.msra.mxu0 %v6873_v61  ;;  %v6629_v61 = vunpack.i.h.bf16 %v6627_v52  ;;  %v6637_v51 = vpop.permute.xlu1 %6636 }
 0x53e   :  { %6038 = vmatprep.subr.bf16.mxu0 %v6874_v19 }
 0x541   :  { %6039 = vmatpush3.bf16.msra.mxu0 %v6874_v19  ;;  %v6628_v19 = vunpack.i.l.bf16 %v6627_v52 }
 0x542   :  { %6040 = vmatprep.subr.bf16.mxu0 %v6875_v21 }
 0x543   :  { %v3223_v22 = vpack.c.bf16 %v6629_v61, %v6628_v19 }
 0x545   :  { %6041 = vmatpush3.bf16.msra.mxu0 %v6875_v21  ;;  %v6900_v21 = vld [vmem:[#allocation2 + $0x640] sm:$0xff]  }
 0x546   :  { %6046 = vmatprep.subr.bf16.mxu0 %v6876_v0 }
 0x548   :  { %6043 = vmatmul.mubr.bf16.vlgmr.msra.gmra.mrb[4].mxu0 %v2835_v14  ;;  %v6904_v14 = vld [vmem:[#allocation2 + $0x660] sm:$0xff]  }
 0x549   :  { %6047 = vmatpush3.bf16.msra.mxu0 %v6876_v0  ;;  %6062 = vmatprep.mubr.bf16.mxu0 %v2954_v24  ;;  %v6613_v24 = vunpack.i.l.bf16 %v6612_v31  ;;  %v6903_v0 = vld [vmem:[#allocation2 + $0x658] sm:$0xff]  }
 0x54a   :  { %6048 = vmatprep.subr.bf16.mxu0 %v6877_v56  ;;  %v6911_v31 = vld [vmem:[#allocation2 + $0x698] sm:$0xff]  }
 0x54b   :  { %v3082_v33 = vpack.c.bf16 %v6614_v43, %v6613_v24  ;;  %v6913_v43 = vld [vmem:[#allocation2 + $0x6a8] sm:$0xff]   ;;  %v6914_v24 = vld [vmem:[#allocation2 + $0x6b0] sm:$0xff]  }
 0x54d   :  { %6049 = vmatpush3.bf16.msra.mxu0 %v6877_v56  ;;  %v6905_v56 = vld [vmem:[#allocation2 + $0x668] sm:$0xff]  }
 0x54e   :  { %6050 = vmatprep.subr.bf16.mxu0 %v6878_v49 }
 0x551   :  { %6051 = vmatpush3.bf16.msra.mxu0 %v6878_v49  ;;  %v6906_v49 = vld [vmem:[#allocation2 + $0x670] sm:$0xff]  }
 0x552   :  { %6052 = vmatprep.subr.bf16.mxu0 %v6879_v54 }
 0x555   :  { %6053 = vmatpush3.bf16.msra.mxu0 %v6879_v54  ;;  %v6634_v54 = vunpack.i.h.bf16 %v6632_v37 }
 0x556   :  { %6054 = vmatprep.subr.bf16.mxu0 %v6880_v16 }
 0x559   :  { %6055 = vmatpush3.bf16.msra.mxu0 %v6880_v16  ;;  %v6633_v16 = vunpack.i.l.bf16 %v6632_v37 }
 0x55a   :  { %6056 = vmatprep.subr.bf16.mxu0 %v6881_v57 }
 0x55d   :  { %6057 = vmatpush3.bf16.msra.mxu0 %v6881_v57  ;;  %v6909_v57 = vld [vmem:[#allocation2 + $0x688] sm:$0xff]  }
 0x55e   :  { %6058 = vmatprep.subr.bf16.mxu0 %v6882_v28 }
 0x561   :  { %6059 = vmatpush3.bf16.msra.mxu0 %v6882_v28  ;;  %v3470_v28 = vpack.c.bf16 %v6634_v54, %v6633_v16 }
 0x562   :  { %6060 = vmatprep.subr.bf16.mxu0 %v6883_v29 }
 0x565   :  { %6061 = vmatpush3.bf16.msra.mxu0 %v6883_v29  ;;  %v6910_v29 = vld [vmem:[#allocation2 + $0x690] sm:$0xff]  }
 0x566   :  { %6066 = vmatprep.subr.bf16.mxu0 %v6884_v38 }
 0x568   :  { %6063 = vmatmul.mubr.bf16.vlgmr.msra.gmra.mrb[4].mxu0 %v2955_v25  ;;  %v6919_v25 = vld [vmem:[%s7763_s3 + $0x58] sm:$0xff]  }
 0x569   :  { %6067 = vmatpush3.bf16.msra.mxu0 %v6884_v38  ;;  %6082 = vmatprep.mubr.bf16.mxu0 %v3082_v33  ;;  %v6912_v38 = vld [vmem:[#allocation2 + $0x6a0] sm:$0xff]  }
 0x56a   :  { %6068 = vmatprep.subr.bf16.mxu0 %v6885_v32  ;;  %6152 = vmatprep.subr.bf16.mxu1 %v6919_v25 }
 0x56b   :  { %6153 = vmatpush3.bf16.msra.mxu1 %v6919_v25 }
 0x56c   :  { %6154 = vmatprep.subr.bf16.mxu1 %v6920_v40 }
 0x56d   :  { %6069 = vmatpush3.bf16.msra.mxu0 %v6885_v32  ;;  %v6638_v32 = vunpack.i.l.bf16 %v6637_v51 }
 0x56e   :  { %6070 = vmatprep.subr.bf16.mxu0 %v6886_v11 }
 0x56f   :  { %6155 = vmatpush3.bf16.msra.mxu1 %v6920_v40 }
 0x570   :  { %6156 = vmatprep.subr.bf16.mxu1 %v6921_v35 }
 0x571   :  { %6071 = vmatpush3.bf16.msra.mxu0 %v6886_v11  ;;  %v6923_v11 = vld [vmem:[%s7763_s3 + $0x78] sm:$0xff]  }
 0x572   :  { %6072 = vmatprep.subr.bf16.mxu0 %v6887_v42 }
 0x573   :  { %6157 = vmatpush3.bf16.msra.mxu1 %v6921_v35 }
 0x574   :  { %6158 = vmatprep.subr.bf16.mxu1 %v6922_v60 }
 0x575   :  { %6073 = vmatpush3.bf16.msra.mxu0 %v6887_v42  ;;  %v5023_v42 = vld [vmem:[%s7762_s2 + $0x2] ss:$0 sm:$0xff] }
 0x576   :  { %6074 = vmatprep.subr.bf16.mxu0 %v6888_v39 }
 0x577   :  { %6159 = vmatpush3.bf16.msra.mxu1 %v6922_v60 }
 0x578   :  { %6160 = vmatprep.subr.bf16.mxu1 %v6923_v11 }
 0x579   :  { %6075 = vmatpush3.bf16.msra.mxu0 %v6888_v39 }
 0x57a   :  { %6076 = vmatprep.subr.bf16.mxu0 %v6889_v9 }
 0x57b   :  { %6161 = vmatpush3.bf16.msra.mxu1 %v6923_v11 }
 0x57c   :  { %6166 = vmatprep.subr.bf16.mxu1 %v6924_v36 }
 0x57d   :  { %6077 = vmatpush3.bf16.msra.mxu0 %v6889_v9 }
 0x57e   :  { %6078 = vmatprep.subr.bf16.mxu0 %v6890_v44 }
 0x581   :  { %6079 = vmatpush3.bf16.msra.mxu0 %v6890_v44 }
 0x582   :  { %6080 = vmatprep.subr.bf16.mxu0 %v6891_v45 }
 0x585   :  { %6081 = vmatpush3.bf16.msra.mxu0 %v6891_v45 }
 0x586   :  { %6086 = vmatprep.subr.bf16.mxu0 %v6892_v4 }
 0x588   :  { %6083 = vmatmul.mubr.bf16.vlgmr.msra.gmra.mrb[4].mxu0 %v3083_v48 }
 0x589   :  { %6087 = vmatpush3.bf16.msra.mxu0 %v6892_v4  ;;  %6102 = vmatprep.mubr.bf16.mxu0 %v3222_v58 }
 0x58a   :  { %6088 = vmatprep.subr.bf16.mxu0 %v6893_v53 }
 0x58d   :  { %6089 = vmatpush3.bf16.msra.mxu0 %v6893_v53 }
 0x58e   :  { %6090 = vmatprep.subr.bf16.mxu0 %v6894_v62 }
 0x591   :  { %6091 = vmatpush3.bf16.msra.mxu0 %v6894_v62 }
 0x592   :  { %6092 = vmatprep.subr.bf16.mxu0 %v6895_v3 }
 0x595   :  { %6093 = vmatpush3.bf16.msra.mxu0 %v6895_v3 }
 0x596   :  { %6094 = vmatprep.subr.bf16.mxu0 %v6896_v6 }
 0x599   :  { %6095 = vmatpush3.bf16.msra.mxu0 %v6896_v6 }
 0x59a   :  { %6096 = vmatprep.subr.bf16.mxu0 %v6897_v12 }
 0x59d   :  { %6097 = vmatpush3.bf16.msra.mxu0 %v6897_v12 }
 0x59e   :  { %6098 = vmatprep.subr.bf16.mxu0 %v6898_v63 }
 0x5a1   :  { %6099 = vmatpush3.bf16.msra.mxu0 %v6898_v63 }
 0x5a2   :  { %6100 = vmatprep.subr.bf16.mxu0 %v6899_v34 }
 0x5a5   :  { %6101 = vmatpush3.bf16.msra.mxu0 %v6899_v34 }
 0x5a6   :  { %6106 = vmatprep.subr.bf16.mxu0 %v6900_v21 }
 0x5a8   :  { %6103 = vmatmul.mubr.bf16.vlgmr.msra.gmra.mrb[4].mxu0 %v3223_v22 }
 0x5a9   :  { %6107 = vmatpush3.bf16.msra.mxu0 %v6900_v21  ;;  %6122 = vmatprep.mubr.msk.bf16.mxu0 %vm7203_vm9, %v5010_v15  ;;  %v6908_v15 = vld [vmem:[#allocation2 + $0x680] sm:$0xff]  }
 0x5aa   :  { %6108 = vmatprep.subr.bf16.mxu0 %v6901_v26 }
 0x5ad   :  { %6109 = vmatpush3.bf16.msra.mxu0 %v6901_v26 }
 0x5ae   :  { %6110 = vmatprep.subr.bf16.mxu0 %v6902_v13 }
 0x5b1   :  { %6111 = vmatpush3.bf16.msra.mxu0 %v6902_v13 }
 0x5b2   :  { %6112 = vmatprep.subr.bf16.mxu0 %v6903_v0 }
 0x5b5   :  { %6113 = vmatpush3.bf16.msra.mxu0 %v6903_v0 }
 0x5b6   :  { %6114 = vmatprep.subr.bf16.mxu0 %v6904_v14 }
 0x5b9   :  { %6115 = vmatpush3.bf16.msra.mxu0 %v6904_v14 }
 0x5ba   :  { %6116 = vmatprep.subr.bf16.mxu0 %v6905_v56 }
 0x5bd   :  { %6117 = vmatpush3.bf16.msra.mxu0 %v6905_v56 }
 0x5be   :  { %6118 = vmatprep.subr.bf16.mxu0 %v6906_v49 }
 0x5c1   :  { %6119 = vmatpush3.bf16.msra.mxu0 %v6906_v49 }
 0x5c2   :  { %6120 = vmatprep.subr.bf16.mxu0 %v6907_v2 }
 0x5c5   :  { %6121 = vmatpush3.bf16.msra.mxu0 %v6907_v2 }
 0x5c6   :  { %6126 = vmatprep.subr.bf16.mxu0 %v6908_v15 }
 0x5c8   :  { %6123 = vmatmul.mubr.msk.bf16.vlgmr.msra.gmra.mrb[4].mxu0 %vm7215_vm10, %v5013_v20  ;;  %v6639_v20 = vunpack.i.h.bf16 %v6637_v51 }
 0x5c9   :  { %6127 = vmatpush3.bf16.msra.mxu0 %v6908_v15  ;;  %6142 = vmatprep.mubr.bf16.mxu0 %v3470_v28  ;;  %v6926_v28 = vld [vmem:[%s7763_s3 + $0x10] sm:$0xff]  }
 0x5ca   :  { %6128 = vmatprep.subr.bf16.mxu0 %v6909_v57  ;;  %v3471_v33 = vpack.c.bf16 %v6639_v20, %v6638_v32 }
 0x5cd   :  { %6129 = vmatpush3.bf16.msra.mxu0 %v6909_v57 }
 0x5ce   :  { %6130 = vmatprep.subr.bf16.mxu0 %v6910_v29 }
 0x5d1   :  { %6131 = vmatpush3.bf16.msra.mxu0 %v6910_v29  ;;  %v6928_v29 = vld [vmem:[%s7763_s3 + $0x20] sm:$0xff]  }
 0x5d2   :  { %6132 = vmatprep.subr.bf16.mxu0 %v6911_v31 }
 0x5d5   :  { %6133 = vmatpush3.bf16.msra.mxu0 %v6911_v31  ;;  %v6929_v31 = vld [vmem:[%s7763_s3 + $0x28] sm:$0xff]  }
 0x5d6   :  { %6134 = vmatprep.subr.bf16.mxu0 %v6912_v38 }
 0x5d9   :  { %6135 = vmatpush3.bf16.msra.mxu0 %v6912_v38  ;;  %v6930_v38 = vld [vmem:[%s7763_s3 + $0x30] sm:$0xff]  }
 0x5da   :  { %6136 = vmatprep.subr.bf16.mxu0 %v6913_v43 }
 0x5dd   :  { %6137 = vmatpush3.bf16.msra.mxu0 %v6913_v43  ;;  %v6931_v43 = vld [vmem:[%s7763_s3 + $0x38] sm:$0xff]  }
 0x5de   :  { %6138 = vmatprep.subr.bf16.mxu0 %v6914_v24 }
 0x5e1   :  { %6139 = vmatpush3.bf16.msra.mxu0 %v6914_v24  ;;  %v6932_v24 = vld [vmem:[%s7763_s3 + $0x80] sm:$0xff]  }
 0x5e2   :  { %6140 = vmatprep.subr.bf16.mxu0 %v6915_v50 }
 0x5e5   :  { %6141 = vmatpush3.bf16.msra.mxu0 %v6915_v50 }
 0x5e8   :  { %6143 = vmatmul.mubr.bf16.vlgmr.msra.gmra.mrb[4].mxu0 %v3471_v33 }
 0x6bb   :  { %v6144_v25 = vpop.f32.mrb[4].mxu0 }
 0x6bc   :  { %v3598_v39 = vadd.f32 %v6144_v25, %v5023_v42  ;;  %v3571_v40 = vpop.f32.mrb[5].mxu0 }
 0x6bd   :  { %v3596_v9 = vadd.f32 %v5023_v42, %v3571_v40  ;;  %v6145_v44 = vpop.f32.mrb[6].mxu0 }
 0x6be   :  { %v7460_v45 = vmax.f32 %v3598_v39, 0.0  ;;  %v3599_v7 = vadd.f32 %v6145_v44, %v5023_v42  ;;  %v3574_v46 = vpop.f32.mrb[7].mxu0  ;;  %v6935_v44 = vld [vmem:[%s7763_s3 + $0x98] sm:$0xff]  }
 0x6bf   :  { %v7462_v47 = vmax.f32 %v3596_v9, 0.0  ;;  %v3597_v5 = vadd.f32 %v5023_v42, %v3574_v46  ;;  %v6933_v42 = vld [vmem:[%s7763_s3 + $0x88] sm:$0xff]   ;;  %v6934_v9 = vld [vmem:[%s7763_s3 + $0x90] sm:$0xff]  }
 0x6c0   :  { %v3607_v4 = vrot.slane %v7460_v45, 7  ;;  %v7465_v8 = vmax.f32 %v3599_v7, 0.0  ;;  %v4362_v58 = vrot.slane %v7460_v45, 1  ;;  %v6936_v7 = vld [vmem:[%s7763_s3 + $0xa0] sm:$0xff]   ;;  %v6937_v46 = vld [vmem:[%s7763_s3 + $0xa8] sm:$0xff]  }
 0x6c1   :  { %v7467_v10 = vmax.f32 %v3597_v5, 0.0  ;;  %v3605_v48 = vrot.slane %v7462_v47, 7  ;;  %v4360_v53 = vrot.slane %v7462_v47, 1  ;;  %v6938_v5 = vld [vmem:[%s7763_s3 + $0xb0] sm:$0xff]  }
 0x6c2   :  { %v3608_v62 = vrot.slane %v7465_v8, 7  ;;  %v6665_v3 = vpack.i.bf16 %v7465_v8, %v7460_v45  ;;  %v4363_v6 = vrot.slane %v7465_v8, 1  ;;  %v4113_v59 = vpack.c.bf16 %v7465_v8, %v7460_v45  ;;  %v6960_v45 = vld [vmem:[%s7763_s3 + $0x160] sm:$0xff]   ;;  %v6961_v8 = vld [vmem:[%s7763_s3 + $0x168] sm:$0xff]  }
 0x6c3   :  { %v3606_v12 = vrot.slane %v7467_v10, 7  ;;  %v6660_v63 = vpack.i.bf16 %v7467_v10, %v7462_v47  ;;  %v4361_v34 = vrot.slane %v7467_v10, 1  ;;  %v4112_v57 = vpack.c.bf16 %v7467_v10, %v7462_v47  ;;  %v6953_v47 = vld [vmem:[%s7763_s3 + $0x128] sm:$0xff]   ;;  %v6954_v10 = vld [vmem:[%s7763_s3 + $0x130] sm:$0xff]  }
 0x6c4   :  { %v3612_v52 = vsel %vm113_vm0, %v3608_v62, %v3605_v48  ;;  %v3609_v61 = vsel %vm113_vm0, %v3607_v4, %v3608_v62  ;;  %v7486_v19 = vsel %vm877_vm6, %v4362_v58, %v4363_v6  ;;  %v7490_v21 = vsel %vm877_vm6, %v4363_v6, %v4360_v53 }
 0x6c5   :  { %v3611_v22 = vsel %vm113_vm0, %v3605_v48, %v3606_v12  ;;  %v3613_v26 = vsel %vm7095_vm1, %v3612_v52, 0.0  ;;  %v3610_v13 = vsel %vm113_vm0, %v3606_v12, %v3607_v4  ;;  %v7500_v0 = vsel %vm877_vm6, %v4361_v34, %v4362_v58  ;;  %v6939_v4 = vld [vmem:[%s7763_s3 + $0xb8] sm:$0xff]  }
 0x6c6   :  { %v6640_v14 = vpack.i.bf16 %v3611_v22, %v3613_v26  ;;  %v5049_v56 = vpack.c.bf16 %v3611_v22, %v3612_v52  ;;  %v5052_v49 = vpack.c.bf16 %v3609_v61, %v3610_v13  ;;  %v3615_v2 = vsel %vm7099_vm2, %v3610_v13, 0.0  ;;  %v6943_v22 = vld [vmem:[%s7763_s3 + $0xd8] sm:$0xff]   ;;  %v6944_v26 = vld [vmem:[%s7763_s3 + $0xe0] sm:$0xff]   ;;  %v6945_v13 = vld [vmem:[%s7763_s3 + $0xe8] sm:$0xff]  }
 0x6c7   :  { %v6645_v37 = vpack.i.bf16 %v3609_v61, %v3615_v2  ;;  %v7506_v15 = vsel %vm877_vm6, %v4360_v53, %v4361_v34  ;;  %v4369_v54 = vsel %vm7156_vm7, %v7500_v0, 0.0  ;;  %v4371_v1 = vsel %vm7171_vm8, %v7490_v21, 0.0  ;;  %v6941_v34 = vld [vmem:[%s7763_s3 + $0xc8] sm:$0xff]   ;;  %v6942_v61 = vld [vmem:[%s7763_s3 + $0xd0] sm:$0xff]  }
 0x6c8   :  { %6641 = vrot.lane.b32.xlu0 %v6640_v14, %s7016_s0  ;;  %6162 = vmatprep.mubr.msk.bf16.mxu1 %vm7116_vm4, %v5049_v56  ;;  %v5207_v18 = vpack.c.bf16 %v7500_v0, %v7506_v15  ;;  %v5210_v16 = vpack.c.bf16 %v7490_v21, %v7486_v19  ;;  %v6680_v27 = vpack.i.bf16 %v4369_v54, %v7506_v15  ;;  %v6947_v56 = vld [vmem:[%s7763_s3 + $0xf8] sm:$0xff]   ;;  %v6976_v0 = vld [vmem:[%s7763_s3 + $0x1e0] sm:$0xff]   ;;  %v6978_v15 = vld [vmem:[%s7763_s3 + $0x1f0] sm:$0xff]  }
 0x6c9   :  { %6163 = vmatmul.mubr.msk.bf16.vlgmr.msra.gmra.mrb[4].mxu1 %vm7143_vm5, %v5052_v49  ;;  %6646 = vrot.lane.b32.xlu1 %v6645_v37, %s7016_s0  ;;  %v6685_v55 = vpack.i.bf16 %v4371_v1, %v7486_v19  ;;  %v6949_v1 = vld [vmem:[%s7763_s3 + $0x108] sm:$0xff]   ;;  %v6986_v21 = vld [vmem:[%s7763_s3 + $0x230] sm:$0xff]  }
 0x6ca   :  { %6167 = vmatpush3.bf16.msra.mxu1 %v6924_v36  ;;  %v6985_v19 = vld [vmem:[%s7763_s3 + $0x228] sm:$0xff]  }
 0x6cb   :  { %6168 = vmatprep.subr.bf16.mxu1 %v6925_v17 }
 0x6cc   :  { %6651 = vrot.lane.b32.xlu0 %v6640_v14, %s7017_s1  ;;  %v6946_v14 = vld [vmem:[%s7763_s3 + $0xf0] sm:$0xff]  }
 0x6cd   :  { %6656 = vrot.lane.b32.xlu1 %v6645_v37, %s7017_s1 }
 0x6ce   :  { %6169 = vmatpush3.bf16.msra.mxu1 %v6925_v17  ;;  %v6948_v17 = vld [vmem:[%s7763_s3 + $0x100] sm:$0xff]  }
 0x6cf   :  { %6170 = vmatprep.subr.bf16.mxu1 %v6926_v28 }
 0x6d0   :  { %6661 = vrot.lane.b32.xlu0 %v6660_v63, %s7016_s0 }
 0x6d1   :  { %6666 = vrot.lane.b32.xlu1 %v6665_v3, %s7016_s0 }
 0x6d2   :  { %6171 = vmatpush3.bf16.msra.mxu1 %v6926_v28  ;;  %v6952_v28 = vld [vmem:[%s7763_s3 + $0x120] sm:$0xff]  }
 0x6d3   :  { %6172 = vmatprep.subr.bf16.mxu1 %v6927_v41 }
 0x6d4   :  { %6671 = vrot.lane.b32.xlu0 %v6660_v63, %s7017_s1 }
 0x6d5   :  { %6676 = vrot.lane.b32.xlu1 %v6665_v3, %s7017_s1  ;;  %v6940_v3 = vld [vmem:[%s7763_s3 + $0xc0] sm:$0xff]  }
 0x6d6   :  { %6173 = vmatpush3.bf16.msra.mxu1 %v6927_v41 }
 0x6d7   :  { %6174 = vmatprep.subr.bf16.mxu1 %v6928_v29 }
 0x6d8   :  { %6681 = vrot.lane.b32.xlu0 %v6680_v27, %s7016_s0 }
 0x6d9   :  { %6686 = vrot.lane.b32.xlu1 %v6685_v55, %s7016_s0 }
 0x6da   :  { %6175 = vmatpush3.bf16.msra.mxu1 %v6928_v29  ;;  %v6956_v29 = vld [vmem:[%s7763_s3 + $0x140] sm:$0xff]  }
 0x6db   :  { %6176 = vmatprep.subr.bf16.mxu1 %v6929_v31 }
 0x6dc   :  { %6691 = vrot.lane.b32.xlu0 %v6680_v27, %s7017_s1  ;;  %v6950_v27 = vld [vmem:[%s7763_s3 + $0x110] sm:$0xff]  }
 0x6dd   :  { %6696 = vrot.lane.b32.xlu1 %v6685_v55, %s7017_s1  ;;  %v6951_v55 = vld [vmem:[%s7763_s3 + $0x118] sm:$0xff]  }
 0x6de   :  { %6177 = vmatpush3.bf16.msra.mxu1 %v6929_v31 }
 0x6df   :  { %6178 = vmatprep.subr.bf16.mxu1 %v6930_v38 }
 0x6e2   :  { %6179 = vmatpush3.bf16.msra.mxu1 %v6930_v38 }
 0x6e3   :  { %6180 = vmatprep.subr.bf16.mxu1 %v6931_v43 }
 0x6e6   :  { %6181 = vmatpush3.bf16.msra.mxu1 %v6931_v43  ;;  %v6957_v43 = vld [vmem:[%s7763_s3 + $0x148] sm:$0xff]  }
 0x6e7   :  { %6186 = vmatprep.subr.bf16.mxu1 %v6932_v24 }
 0x73a   :  { %v6642_v50 = vpop.permute.xlu0 %6641 }
 0x73b   :  { %v6644_v51 = vunpack.i.h.bf16 %v6642_v50  ;;  %v6643_v20 = vunpack.i.l.bf16 %v6642_v50  ;;  %v6647_v32 = vpop.permute.xlu1 %6646  ;;  %v6958_v50 = vld [vmem:[%s7763_s3 + $0x150] sm:$0xff]  }
 0x73c   :  { %v6649_v33 = vunpack.i.h.bf16 %v6647_v32  ;;  %v6648_v35 = vunpack.i.l.bf16 %v6647_v32 }
 0x73d   :  { %v3625_v60 = vpack.c.bf16 %v6644_v51, %v6643_v20  ;;  %v6959_v51 = vld [vmem:[%s7763_s3 + $0x158] sm:$0xff]  }
 0x73e   :  { %v3626_v11 = vpack.c.bf16 %v6649_v33, %v6648_v35  ;;  %v6652_v36 = vpop.permute.xlu0 %6651  ;;  %v6963_v20 = vld [vmem:[%s7763_s3 + $0x178] sm:$0xff]  }
 0x73f   :  { %v6654_v25 = vunpack.i.h.bf16 %v6652_v36  ;;  %v6653_v39 = vunpack.i.l.bf16 %v6652_v36  ;;  %6182 = vmatprep.mubr.bf16.mxu1 %v3625_v60  ;;  %v6657_v48 = vpop.permute.xlu1 %6656 }
 0x740   :  { %6183 = vmatmul.mubr.bf16.vlgmr.msra.gmra.mrb[4].mxu1 %v3626_v11  ;;  %v6659_v58 = vunpack.i.h.bf16 %v6657_v48  ;;  %v6658_v62 = vunpack.i.l.bf16 %v6657_v48  ;;  %v6964_v11 = vld [vmem:[%s7763_s3 + $0x180] sm:$0xff]  }
 0x741   :  { %v3864_v40 = vpack.c.bf16 %v6654_v25, %v6653_v39  ;;  %6187 = vmatpush3.bf16.msra.mxu1 %v6932_v24  ;;  %v6965_v39 = vld [vmem:[%s7763_s3 + $0x188] sm:$0xff]  }
 0x742   :  { %6188 = vmatprep.subr.bf16.mxu1 %v6933_v42  ;;  %v6662_v53 = vpop.permute.xlu0 %6661  ;;  %v3865_v63 = vpack.c.bf16 %v6659_v58, %v6658_v62  ;;  %v6972_v62 = vld [vmem:[%s7763_s3 + $0x1c0] sm:$0xff]  }
 0x743   :  { %6202 = vmatprep.mubr.bf16.mxu1 %v3864_v40  ;;  %v6664_v6 = vunpack.i.h.bf16 %v6662_v53  ;;  %v6663_v12 = vunpack.i.l.bf16 %v6662_v53  ;;  %v6667_v49 = vpop.permute.xlu1 %6666 }
 0x744   :  { %v6669_v2 = vunpack.i.h.bf16 %v6667_v49  ;;  %v6668_v37 = vunpack.i.l.bf16 %v6667_v49 }
 0x745   :  { %6189 = vmatpush3.bf16.msra.mxu1 %v6933_v42  ;;  %v3992_v52 = vpack.c.bf16 %v6664_v6, %v6663_v12  ;;  %v6973_v6 = vld [vmem:[%s7763_s3 + $0x1c8] sm:$0xff]   ;;  %v6974_v12 = vld [vmem:[%s7763_s3 + $0x1d0] sm:$0xff]  }
 0x746   :  { %6190 = vmatprep.subr.bf16.mxu1 %v6934_v9  ;;  %v3993_v54 = vpack.c.bf16 %v6669_v2, %v6668_v37  ;;  %v6672_v41 = vpop.permute.xlu0 %6671 }
 0x747   :  { %v6674_v31 = vunpack.i.h.bf16 %v6672_v41  ;;  %v6673_v38 = vunpack.i.l.bf16 %v6672_v41  ;;  %v6677_v32 = vpop.permute.xlu1 %6676 }
 0x748   :  { %v6679_v35 = vunpack.i.h.bf16 %v6677_v32  ;;  %v6678_v60 = vunpack.i.l.bf16 %v6677_v32 }
 0x749   :  { %6191 = vmatpush3.bf16.msra.mxu1 %v6934_v9  ;;  %v4240_v24 = vpack.c.bf16 %v6674_v31, %v6673_v38  ;;  %v6966_v9 = vld [vmem:[%s7763_s3 + $0x190] sm:$0xff]  }
 0x74a   :  { %6192 = vmatprep.subr.bf16.mxu1 %v6935_v44  ;;  %v6682_v33 = vpop.permute.xlu0 %6681  ;;  %v4241_v25 = vpack.c.bf16 %v6679_v35, %v6678_v60 }
 0x74b   :  { %v6684_v36 = vunpack.i.h.bf16 %v6682_v33  ;;  %v6683_v42 = vunpack.i.l.bf16 %v6682_v33  ;;  %v6687_v48 = vpop.permute.xlu1 %6686 }
 0x74c   :  { %v6689_v53 = vunpack.i.h.bf16 %v6687_v48  ;;  %v6688_v58 = vunpack.i.l.bf16 %v6687_v48 }
 0x74d   :  { %6193 = vmatpush3.bf16.msra.mxu1 %v6935_v44  ;;  %v4380_v40 = vpack.c.bf16 %v6684_v36, %v6683_v42  ;;  %v6967_v44 = vld [vmem:[%s7763_s3 + $0x198] sm:$0xff]  }
 0x74e   :  { %6194 = vmatprep.subr.bf16.mxu1 %v6936_v7 }
 0x74f   :  { %v6697_v49 = vpop.permute.xlu1 %6696 }
 0x750   :  { %v6699_v2 = vunpack.i.h.bf16 %v6697_v49  ;;  %v6698_v37 = vunpack.i.l.bf16 %v6697_v49 }
 0x751   :  { %6195 = vmatpush3.bf16.msra.mxu1 %v6936_v7  ;;  %v6968_v7 = vld [vmem:[%s7763_s3 + $0x1a0] sm:$0xff]  }
 0x752   :  { %6196 = vmatprep.subr.bf16.mxu1 %v6937_v46 }
 0x755   :  { %6197 = vmatpush3.bf16.msra.mxu1 %v6937_v46  ;;  %v6969_v46 = vld [vmem:[%s7763_s3 + $0x1a8] sm:$0xff]  }
 0x756   :  { %6198 = vmatprep.subr.bf16.mxu1 %v6938_v5 }
 0x759   :  { %6199 = vmatpush3.bf16.msra.mxu1 %v6938_v5  ;;  %v6970_v5 = vld [vmem:[%s7763_s3 + $0x1b0] sm:$0xff]  }
 0x75a   :  { %6200 = vmatprep.subr.bf16.mxu1 %v6939_v4 }
 0x75d   :  { %6201 = vmatpush3.bf16.msra.mxu1 %v6939_v4  ;;  %v6971_v4 = vld [vmem:[%s7763_s3 + $0x1b8] sm:$0xff]  }
 0x75e   :  { %6206 = vmatprep.subr.bf16.mxu1 %v6940_v3 }
 0x760   :  { %6203 = vmatmul.mubr.bf16.vlgmr.msra.gmra.mrb[4].mxu1 %v3865_v63  ;;  %v6975_v63 = vld [vmem:[%s7763_s3 + $0x1d8] sm:$0xff]  }
 0x761   :  { %6207 = vmatpush3.bf16.msra.mxu1 %v6940_v3  ;;  %6222 = vmatprep.mubr.bf16.mxu1 %v3992_v52  ;;  %v4381_v3 = vpack.c.bf16 %v6689_v53, %v6688_v58  ;;  %v6980_v52 = vld [vmem:[%s7763_s3 + $0x200] sm:$0xff]  }
 0x762   :  { %6208 = vmatprep.subr.bf16.mxu1 %v6941_v34 }
 0x765   :  { %6209 = vmatpush3.bf16.msra.mxu1 %v6941_v34  ;;  %v6692_v34 = vpop.permute.xlu0 %6691 }
 0x766   :  { %6210 = vmatprep.subr.bf16.mxu1 %v6942_v61 }
 0x769   :  { %6211 = vmatpush3.bf16.msra.mxu1 %v6942_v61  ;;  %v6694_v61 = vunpack.i.h.bf16 %v6692_v34 }
 0x76a   :  { %6212 = vmatprep.subr.bf16.mxu1 %v6943_v22 }
 0x76d   :  { %6213 = vmatpush3.bf16.msra.mxu1 %v6943_v22  ;;  %v6693_v22 = vunpack.i.l.bf16 %v6692_v34 }
 0x76e   :  { %6214 = vmatprep.subr.bf16.mxu1 %v6944_v26 }
 0x771   :  { %6215 = vmatpush3.bf16.msra.mxu1 %v6944_v26  ;;  %v6981_v26 = vld [vmem:[%s7763_s3 + $0x208] sm:$0xff]  }
 0x772   :  { %6216 = vmatprep.subr.bf16.mxu1 %v6945_v13 }
 0x775   :  { %6217 = vmatpush3.bf16.msra.mxu1 %v6945_v13  ;;  %v4628_v13 = vpack.c.bf16 %v6694_v61, %v6693_v22 }
 0x776   :  { %6218 = vmatprep.subr.bf16.mxu1 %v6946_v14 }
 0x779   :  { %6219 = vmatpush3.bf16.msra.mxu1 %v6946_v14  ;;  %v6982_v14 = vld [vmem:[%s7763_s3 + $0x210] sm:$0xff]  }
 0x77a   :  { %6220 = vmatprep.subr.bf16.mxu1 %v6947_v56 }
 0x77d   :  { %6221 = vmatpush3.bf16.msra.mxu1 %v6947_v56  ;;  %v6983_v56 = vld [vmem:[%s7763_s3 + $0x218] sm:$0xff]  }
 0x77e   :  { %6226 = vmatprep.subr.bf16.mxu1 %v6948_v17 }
 0x780   :  { %6223 = vmatmul.mubr.bf16.vlgmr.msra.gmra.mrb[4].mxu1 %v3993_v54  ;;  %v5236_v54 = vld [vmem:[%s7764_s4] ss:$0 sm:$0xff] }
 0x781   :  { %6227 = vmatpush3.bf16.msra.mxu1 %v6948_v17  ;;  %6242 = vmatprep.mubr.bf16.mxu1 %v4112_v57  ;;  %v6955_v57 = vld [vmem:[%s7763_s3 + $0x138] sm:$0xff]   ;;  %v4629_v17 = vpack.c.bf16 %v6699_v2, %v6698_v37 }
 0x782   :  { %6228 = vmatprep.subr.bf16.mxu1 %v6949_v1 }
 0x785   :  { %6229 = vmatpush3.bf16.msra.mxu1 %v6949_v1 }
 0x786   :  { %6230 = vmatprep.subr.bf16.mxu1 %v6950_v27 }
 0x789   :  { %6231 = vmatpush3.bf16.msra.mxu1 %v6950_v27 }
 0x78a   :  { %6232 = vmatprep.subr.bf16.mxu1 %v6951_v55 }
 0x78d   :  { %6233 = vmatpush3.bf16.msra.mxu1 %v6951_v55 }
 0x78e   :  { %6234 = vmatprep.subr.bf16.mxu1 %v6952_v28 }
 0x791   :  { %6235 = vmatpush3.bf16.msra.mxu1 %v6952_v28 }
 0x792   :  { %6236 = vmatprep.subr.bf16.mxu1 %v6953_v47 }
 0x795   :  { %6237 = vmatpush3.bf16.msra.mxu1 %v6953_v47 }
 0x796   :  { %6238 = vmatprep.subr.bf16.mxu1 %v6954_v10 }
 0x799   :  { %6239 = vmatpush3.bf16.msra.mxu1 %v6954_v10 }
 0x79a   :  { %6240 = vmatprep.subr.bf16.mxu1 %v6955_v57 }
 0x79d   :  { %6241 = vmatpush3.bf16.msra.mxu1 %v6955_v57 }
 0x79e   :  { %6246 = vmatprep.subr.bf16.mxu1 %v6956_v29 }
 0x7a0   :  { %6243 = vmatmul.mubr.bf16.vlgmr.msra.gmra.mrb[4].mxu1 %v4113_v59  ;;  %v6962_v59 = vld [vmem:[%s7763_s3 + $0x170] sm:$0xff]  }
 0x7a1   :  { %6247 = vmatpush3.bf16.msra.mxu1 %v6956_v29  ;;  %6262 = vmatprep.mubr.bf16.mxu1 %v4240_v24 }
 0x7a2   :  { %6248 = vmatprep.subr.bf16.mxu1 %v6957_v43 }
 0x7a5   :  { %6249 = vmatpush3.bf16.msra.mxu1 %v6957_v43 }
 0x7a6   :  { %6250 = vmatprep.subr.bf16.mxu1 %v6958_v50 }
 0x7a9   :  { %6251 = vmatpush3.bf16.msra.mxu1 %v6958_v50 }
 0x7aa   :  { %6252 = vmatprep.subr.bf16.mxu1 %v6959_v51 }
 0x7ad   :  { %6253 = vmatpush3.bf16.msra.mxu1 %v6959_v51 }
 0x7ae   :  { %6254 = vmatprep.subr.bf16.mxu1 %v6960_v45 }
 0x7b1   :  { %6255 = vmatpush3.bf16.msra.mxu1 %v6960_v45 }
 0x7b2   :  { %6256 = vmatprep.subr.bf16.mxu1 %v6961_v8 }
 0x7b5   :  { %6257 = vmatpush3.bf16.msra.mxu1 %v6961_v8 }
 0x7b6   :  { %6258 = vmatprep.subr.bf16.mxu1 %v6962_v59 }
 0x7b9   :  { %6259 = vmatpush3.bf16.msra.mxu1 %v6962_v59 }
 0x7ba   :  { %6260 = vmatprep.subr.bf16.mxu1 %v6963_v20 }
 0x7bd   :  { %6261 = vmatpush3.bf16.msra.mxu1 %v6963_v20 }
 0x7be   :  { %6266 = vmatprep.subr.bf16.mxu1 %v6964_v11 }
 0x7c0   :  { %6263 = vmatmul.mubr.bf16.vlgmr.msra.gmra.mrb[4].mxu1 %v4241_v25 }
 0x7c1   :  { %6267 = vmatpush3.bf16.msra.mxu1 %v6964_v11  ;;  %6282 = vmatprep.mubr.bf16.mxu1 %v4380_v40 }
 0x7c2   :  { %6268 = vmatprep.subr.bf16.mxu1 %v6965_v39 }
 0x7c5   :  { %6269 = vmatpush3.bf16.msra.mxu1 %v6965_v39 }
 0x7c6   :  { %6270 = vmatprep.subr.bf16.mxu1 %v6966_v9 }
 0x7c9   :  { %6271 = vmatpush3.bf16.msra.mxu1 %v6966_v9 }
 0x7ca   :  { %6272 = vmatprep.subr.bf16.mxu1 %v6967_v44 }
 0x7cd   :  { %6273 = vmatpush3.bf16.msra.mxu1 %v6967_v44 }
 0x7ce   :  { %6274 = vmatprep.subr.bf16.mxu1 %v6968_v7 }
 0x7d1   :  { %6275 = vmatpush3.bf16.msra.mxu1 %v6968_v7 }
 0x7d2   :  { %6276 = vmatprep.subr.bf16.mxu1 %v6969_v46 }
 0x7d5   :  { %6277 = vmatpush3.bf16.msra.mxu1 %v6969_v46 }
 0x7d6   :  { %6278 = vmatprep.subr.bf16.mxu1 %v6970_v5 }
 0x7d9   :  { %6279 = vmatpush3.bf16.msra.mxu1 %v6970_v5 }
 0x7da   :  { %6280 = vmatprep.subr.bf16.mxu1 %v6971_v4 }
 0x7dd   :  { %6281 = vmatpush3.bf16.msra.mxu1 %v6971_v4 }
 0x7de   :  { %6286 = vmatprep.subr.bf16.mxu1 %v6972_v62 }
 0x7e0   :  { %6283 = vmatmul.mubr.bf16.vlgmr.msra.gmra.mrb[4].mxu1 %v4381_v3 }
 0x7e1   :  { %6287 = vmatpush3.bf16.msra.mxu1 %v6972_v62  ;;  %6302 = vmatprep.mubr.msk.bf16.mxu1 %vm7203_vm9, %v5207_v18  ;;  %v6979_v18 = vld [vmem:[%s7763_s3 + $0x1f8] sm:$0xff]  }
 0x7e2   :  { %6288 = vmatprep.subr.bf16.mxu1 %v6973_v6 }
 0x7e5   :  { %6289 = vmatpush3.bf16.msra.mxu1 %v6973_v6 }
 0x7e6   :  { %6290 = vmatprep.subr.bf16.mxu1 %v6974_v12 }
 0x7e9   :  { %6291 = vmatpush3.bf16.msra.mxu1 %v6974_v12 }
 0x7ea   :  { %6292 = vmatprep.subr.bf16.mxu1 %v6975_v63 }
 0x7ed   :  { %6293 = vmatpush3.bf16.msra.mxu1 %v6975_v63 }
 0x7ee   :  { %6294 = vmatprep.subr.bf16.mxu1 %v6976_v0 }
 0x7f1   :  { %6295 = vmatpush3.bf16.msra.mxu1 %v6976_v0 }
 0x7f2   :  { %6296 = vmatprep.subr.bf16.mxu1 %v6977_v23 }
 0x7f5   :  { %6297 = vmatpush3.bf16.msra.mxu1 %v6977_v23 }
 0x7f6   :  { %6298 = vmatprep.subr.bf16.mxu1 %v6978_v15 }
 0x7f9   :  { %6299 = vmatpush3.bf16.msra.mxu1 %v6978_v15 }
 0x7fa   :  { %6300 = vmatprep.subr.bf16.mxu1 %v6979_v18 }
 0x7fd   :  { %6301 = vmatpush3.bf16.msra.mxu1 %v6979_v18 }
 0x7fe   :  { %6306 = vmatprep.subr.bf16.mxu1 %v6980_v52 }
 0x800   :  { %6303 = vmatmul.mubr.msk.bf16.vlgmr.msra.gmra.mrb[4].mxu1 %vm7215_vm10, %v5210_v16  ;;  %v6987_v16 = vld [vmem:[%s7763_s3 + $0x238] sm:$0xff]  }
 0x801   :  { %6307 = vmatpush3.bf16.msra.mxu1 %v6980_v52  ;;  %6322 = vmatprep.mubr.bf16.mxu1 %v4628_v13 }
 0x802   :  { %6308 = vmatprep.subr.bf16.mxu1 %v6981_v26 }
 0x805   :  { %6309 = vmatpush3.bf16.msra.mxu1 %v6981_v26 }
 0x806   :  { %6310 = vmatprep.subr.bf16.mxu1 %v6982_v14 }
 0x809   :  { %6311 = vmatpush3.bf16.msra.mxu1 %v6982_v14 }
 0x80a   :  { %6312 = vmatprep.subr.bf16.mxu1 %v6983_v56 }
 0x80d   :  { %6313 = vmatpush3.bf16.msra.mxu1 %v6983_v56 }
 0x80e   :  { %6314 = vmatprep.subr.bf16.mxu1 %v6984_v30 }
 0x811   :  { %6315 = vmatpush3.bf16.msra.mxu1 %v6984_v30 }
 0x812   :  { %6316 = vmatprep.subr.bf16.mxu1 %v6985_v19 }
 0x815   :  { %6317 = vmatpush3.bf16.msra.mxu1 %v6985_v19 }
 0x816   :  { %6318 = vmatprep.subr.bf16.mxu1 %v6986_v21 }
 0x819   :  { %6319 = vmatpush3.bf16.msra.mxu1 %v6986_v21 }
 0x81a   :  { %6320 = vmatprep.subr.bf16.mxu1 %v6987_v16 }
 0x81d   :  { %6321 = vmatpush3.bf16.msra.mxu1 %v6987_v16 }
 0x820   :  { %6323 = vmatmul.mubr.bf16.vlgmr.msra.gmra.mrb[4].mxu1 %v4629_v17 }
 0x8f3   :  { %v6324_v1 = vpop.f32.mrb[4].mxu1 }
 0x8f4   :  { %v4756_v27 = vadd.f32 %v6324_v1, %v5236_v54  ;;  %v4729_v55 = vpop.f32.mrb[5].mxu1 }
 0x8f5   :  { %v4754_v28 = vadd.f32 %v5236_v54, %v4729_v55  ;;  %v6325_v47 = vpop.f32.mrb[6].mxu1 }
 0x8f6   :  { %4760 = vst [vmem:[%s7765_s5 + $0x10] sm:$0xff] %v4756_v27  ;;  %v4757_v10 = vadd.f32 %v6325_v47, %v5236_v54  ;;  %v4732_v57 = vpop.f32.mrb[7].mxu1 }
 0x8f7   :  { %4758 = vst [vmem:[%s7765_s5] sm:$0xff] %v4754_v28  ;;  %v4755_v41 = vadd.f32 %v5236_v54, %v4732_v57 }
 0x8f8   :  { %4761 = vst [vmem:[%s7765_s5 + $0x18] sm:$0xff] %v4757_v10 }
 0x8f9   :  { %4759 = vst [vmem:[%s7765_s5 + $0x8] sm:$0xff] %v4755_v41 }
 0x8fa   :  { %4766 = vsyncpa [#allocation3], 1 }

</bundles_post_ra>
